<compile_context>
chip_gen: v6e
topology: v6e:2x2x1
jax: 0.10.0
libtpu: 0.0.40
codegen_flags: <defaults>
</compile_context>

<pallas_src>
from functools import partial
from typing import NamedTuple, Optional

import numpy as np
import jax
import jax.numpy as jnp
from jax.experimental import pallas as pl
from jax.experimental.pallas import tpu as pltpu


class MeshGraph(NamedTuple):
    """Static per-graph preprocessing.  Compute ONCE per mesh and reuse."""
    num_nodes: int
    num_edges: int
    tile_n: int
    chunk_e: int
    n_pad: int
    e_pad: int
    num_tiles: int
    max_chunks: int
    total_chunks: int
    aggregation: str
    perm: jax.Array                       # (E,)       int32, edge order sorted by dst
    dst_col: jax.Array                    # (E_pad, 1) int32, sorted dst (sentinel = n_pad)
    chunk_start: jax.Array                # (num_tiles,) int32, first edge chunk per node tile
    n_chunks: jax.Array                   # (num_tiles,) int32, edge chunks per node tile
    inv_deg_row: Optional[jax.Array]      # (1, n_pad) f32, only for aggregation == "mean"


def prepare_mesh_graph(edge_dst, num_nodes, *, aggregation="sum",
                       tile_n=256, chunk_e=2048):
    """Host-side, per-graph preprocessing (NumPy argsort + chunk tables).

    This is the only function that syncs to host; cache its result for a static
    mesh.  mesh_node_block() itself is jittable with no host round trips.
    """
    if aggregation not in ("sum", "mean"):
        raise ValueError(f"unknown aggregation: {aggregation}")
    dst_np = np.asarray(jax.device_get(edge_dst)).astype(np.int64).ravel()
    E = int(dst_np.shape[0])
    assert E > 0
    order = np.argsort(dst_np, kind="stable")
    dst_sorted = dst_np[order]

    n_pad = int(pl.cdiv(num_nodes, tile_n) * tile_n)
    e_pad = int(pl.cdiv(E, chunk_e) * chunk_e)
    num_tiles = n_pad // tile_n
    num_chunks_total = e_pad // chunk_e

    # Padded dst: sentinel = n_pad keeps sortedness and never matches a node row.
    dst_pad = np.full((e_pad,), n_pad, dtype=np.int32)
    dst_pad[:E] = dst_sorted

    # Per node-tile edge-chunk ranges (scalar prefetch tables).
    tile_bounds = np.arange(num_tiles + 1, dtype=np.int64) * tile_n
    edge_bounds = np.searchsorted(dst_sorted, tile_bounds, side="left")
    cs_raw = edge_bounds[:-1] // chunk_e
    ce_raw = -(-edge_bounds[1:] // chunk_e)                      # ceil divide
    n_chunks = np.where(edge_bounds[1:] > edge_bounds[:-1], ce_raw - cs_raw, 0)
    chunk_start = np.minimum(cs_raw, num_chunks_total - 1)       # keep in range for empty tiles
    max_chunks = max(1, int(n_chunks.max()))
    total_chunks = int(n_chunks.sum())

    inv_deg_row = None
    if aggregation == "mean":
        deg = np.bincount(dst_np, minlength=num_nodes).astype(np.float32)
        inv = np.ones((1, n_pad), np.float32)
        inv[0, :num_nodes] = 1.0 / np.maximum(deg, 1.0)
        inv_deg_row = jnp.asarray(inv)

    return MeshGraph(
        num_nodes=int(num_nodes), num_edges=E, tile_n=tile_n, chunk_e=chunk_e,
        n_pad=n_pad, e_pad=e_pad, num_tiles=num_tiles, max_chunks=max_chunks,
        total_chunks=total_chunks, aggregation=aggregation,
        perm=jnp.asarray(order.astype(np.int32)),
        dst_col=jnp.asarray(dst_pad.reshape(e_pad, 1)),
        chunk_start=jnp.asarray(chunk_start.astype(np.int32)),
        n_chunks=jnp.asarray(n_chunks.astype(np.int32)),
        inv_deg_row=inv_deg_row)


def _mesh_node_block_kernel(mean_agg, cs_ref, nc_ref,            # scalar prefetch (SMEM)
                            dst_ref, efeat_ref, nfeat_ref, *rest):
    if mean_agg:
        (inv_ref, w1e_ref, w1n_ref, b1_ref, w2_ref, b2_ref,
         gamma_ref, beta_ref, out_ref, acc_ref) = rest
    else:
        inv_ref = None
        (w1e_ref, w1n_ref, b1_ref, w2_ref, b2_ref,
         gamma_ref, beta_ref, out_ref, acc_ref) = rest

    i = pl.program_id(0)                       # node tile
    k = pl.program_id(1)                       # edge-chunk (contraction) step
    tile_n = acc_ref.shape[1]
    chunk_e = dst_ref.shape[0]

    @pl.when(k == 0)
    def _init():
        acc_ref[...] = jnp.zeros_like(acc_ref)

    # Scatter-accumulate this edge chunk.  Steps past n_chunks[i] are skipped and
    # their DMAs are elided (index map repeats the previous block index).
    @pl.when(k < nc_ref[i])
    def _accumulate():
        # Lane-dense transposed scatter:
        #   acc(De, tile_n) += efeat_T(De, chunk_e) @ onehot(chunk_e, tile_n)
        node_lane = jax.lax.broadcasted_iota(jnp.int32, (chunk_e, tile_n), 1)
        dst_local = dst_ref[...] - i * tile_n              # (chunk_e, 1): cheap side of shift
        onehot_t = (node_lane == dst_local).astype(jnp.bfloat16)   # compare-and-cast
        acc_ref[...] += jnp.dot(efeat_ref[...], onehot_t,
                                preferred_element_type=jnp.float32)

    # Finalize once per node tile: MLP + LayerNorm + residual.
    @pl.when(k == pl.num_programs(1) - 1)
    def _finalize():
        agg_t = acc_ref[...]                               # (De, tile_n) fp32
        if mean_agg:
            agg_t = agg_t * inv_ref[...]                   # (1, tile_n) lane-dense 1/deg
        agg = agg_t.T.astype(jnp.bfloat16)                 # one small transpose per tile
        nfeat = nfeat_ref[...].astype(jnp.float32)         # (tile_n, Dn)

        # MeshGraphMLP layer 1: W1 split into edge/node halves (no concat relayout).
        h = jnp.dot(agg, w1e_ref[...], preferred_element_type=jnp.float32)
        h = h + jnp.dot(nfeat.astype(jnp.bfloat16), w1n_ref[...],
                        preferred_element_type=jnp.float32)
        h = h + b1_ref[...]
        h = h * jax.nn.sigmoid(h)                          # SiLU (EUP)

        y = (jnp.dot(h.astype(jnp.bfloat16), w2_ref[...],
                     preferred_element_type=jnp.float32) + b2_ref[...])

        mu = jnp.mean(y, axis=-1, keepdims=True)           # LayerNorm, eps = 1e-5
        yc = y - mu
        var = jnp.mean(yc * yc, axis=-1, keepdims=True)
        y = yc * jax.lax.rsqrt(var + 1e-5)
        y = y * gamma_ref[...] + beta_ref[...]

        out_ref[...] = (y + nfeat).astype(out_ref.dtype)   # residual


def mesh_node_block(efeat, nfeat, graph: MeshGraph, params):
    """MeshNodeBlock.forward -> (efeat, nfeat_new).

    Pure JAX / jittable; treat `graph` as a Python-level constant (close over it
    before jax.jit) so its tables become compile-time constants.
    """
    w1, b1, w2, b2, gamma, beta = params
    E, De = efeat.shape
    N, Dn = nfeat.shape
    H = w1.shape[1]
    Do = w2.shape[1]
    assert N == graph.num_nodes and E == graph.num_edges
    assert w1.shape[0] == De + Dn
    assert Do == Dn, "residual requires output_dim == input_dim_nodes"

    tile_n, chunk_e = graph.tile_n, graph.chunk_e
    n_pad, e_pad = graph.n_pad, graph.e_pad
    mean_agg = graph.aggregation == "mean"

    # Per-call device work: permute edges into dst-sorted order, pad, cast, transpose.
    ef = jnp.take(efeat, graph.perm, axis=0)
    if e_pad != E:
        ef = jnp.pad(ef, ((0, e_pad - E), (0, 0)))
    efeat_t = ef.astype(jnp.bfloat16).T                         # (De, E_pad), lane-dense edges
    nfeat_p = jnp.pad(nfeat, ((0, n_pad - N), (0, 0))) if n_pad != N else nfeat

    w1e = w1[:De].astype(jnp.bfloat16)                          # split-concat weights
    w1n = w1[De:].astype(jnp.bfloat16)
    w2b = w2.astype(jnp.bfloat16)
    b1r = jnp.asarray(b1, jnp.float32).reshape(1, H)
    b2r = jnp.asarray(b2, jnp.float32).reshape(1, Do)
    gammar = jnp.asarray(gamma, jnp.float32).reshape(1, Do)
    betar = jnp.asarray(beta, jnp.float32).reshape(1, Do)

    # Skipped steps (k >= n_chunks[i]) repeat the previous block index so the
    # pipeline elides their efeat/dst copies entirely.
    def chunk_index(i, k, cs_ref, nc_ref):
        kk = jnp.minimum(k, jnp.maximum(nc_ref[i] - 1, 0))
        return cs_ref[i] + kk

    in_specs = [
        pl.BlockSpec((chunk_e, 1), lambda i, k, cs, nc: (chunk_index(i, k, cs, nc), 0)),
        pl.BlockSpec((De, chunk_e), lambda i, k, cs, nc: (0, chunk_index(i, k, cs, nc))),
        pl.BlockSpec((tile_n, Dn), lambda i, k, cs, nc: (i, 0)),
    ]
    operands = [graph.dst_col, efeat_t, nfeat_p]
    if mean_agg:
        in_specs.append(pl.BlockSpec((1, tile_n), lambda i, k, cs, nc: (0, i)))
        operands.append(graph.inv_deg_row)
    in_specs += [
        pl.BlockSpec((De, H), lambda i, k, cs, nc: (0, 0)),     # resident weights
        pl.BlockSpec((Dn, H), lambda i, k, cs, nc: (0, 0)),
        pl.BlockSpec((1, H), lambda i, k, cs, nc: (0, 0)),
        pl.BlockSpec((H, Do), lambda i, k, cs, nc: (0, 0)),
        pl.BlockSpec((1, Do), lambda i, k, cs, nc: (0, 0)),
        pl.BlockSpec((1, Do), lambda i, k, cs, nc: (0, 0)),
        pl.BlockSpec((1, Do), lambda i, k, cs, nc: (0, 0)),
    ]
    operands += [w1e, w1n, b1r, w2b, b2r, gammar, betar]

    grid_spec = pltpu.PrefetchScalarGridSpec(
        num_scalar_prefetch=2,
        grid=(graph.num_tiles, graph.max_chunks),
        in_specs=in_specs,
        out_specs=pl.BlockSpec((tile_n, Do), lambda i, k, cs, nc: (i, 0)),
        scratch_shapes=[pltpu.VMEM((De, tile_n), jnp.float32)],  # transposed fp32 accumulator
    )

    # Advisory cost estimate (only real chunks counted for the scatter matmul).
    flops = int(2 * De * chunk_e * tile_n * graph.total_chunks
                + 2 * n_pad * (De * H + Dn * H + H * Do))
    transcendentals = int(n_pad * H + n_pad)
    bytes_accessed = int(e_pad * De * 2 + e_pad * 4
                         + n_pad * Dn * 4 + n_pad * Do * 4
                         + (De + Dn) * H * 2 + H * Do * 2 + (H + 3 * Do) * 4)

    nfeat_new = pl.pallas_call(
        partial(_mesh_node_block_kernel, mean_agg),
        out_shape=jax.ShapeDtypeStruct((n_pad, Do), nfeat.dtype),
        grid_spec=grid_spec,
        compiler_params=pltpu.CompilerParams(
            dimension_semantics=("parallel", "arbitrary"),
            vmem_limit_bytes=32 * 1024 * 1024),      # plenty of headroom even on v7x (64 MiB)
        cost_estimate=pl.CostEstimate(flops=flops,
                                      transcendentals=transcendentals,
                                      bytes_accessed=bytes_accessed),
    )(graph.chunk_start, graph.n_chunks, *operands)

    return efeat, nfeat_new[:N]


def reference(efeat, nfeat, edge_dst, params, *, num_nodes, aggregation="sum"):
    """Plain-JAX fp32 reference of MeshNodeBlock.forward for verification."""
    w1, b1, w2, b2, gamma, beta = params
    agg = jax.ops.segment_sum(efeat, edge_dst, num_segments=num_nodes)
    if aggregation == "mean":
        cnt = jax.ops.segment_sum(jnp.ones((efeat.shape[0],)), edge_dst,
                                  num_segments=num_nodes)
        agg = agg / jnp.maximum(cnt, 1.0)[:, None]
    cat = jnp.concatenate([agg, nfeat], axis=-1)
    h = cat @ w1 + b1.reshape(1, -1)
    h = h * jax.nn.sigmoid(h)
    y = h @ w2 + b2.reshape(1, -1)
    mean = y.mean(-1, keepdims=True)
    var = ((y - mean) ** 2).mean(-1, keepdims=True)
    y = (y - mean) / jnp.sqrt(var + 1e-5) * gamma.reshape(1, -1) + beta.reshape(1, -1)
    return efeat, y + nfeat


if __name__ == "__main__":
    # Small shapes consistent with the module (node/edge dims, hidden, output).
    N_NODES = 500       # mesh nodes (not a tile multiple -> exercises padding)
    N_EDGES = 8000      # mesh edges (not a chunk multiple -> exercises padding)
    DIM_N = 32          # input_dim_nodes
    DIM_E = 32          # input_dim_edges
    HIDDEN = 64         # hidden_dim
    DIM_O = 32          # output_dim (== DIM_N for the residual)

    key = jax.random.PRNGKey(0)
    keys = jax.random.split(key, 8)

    efeat = jax.random.normal(keys[0], (N_EDGES, DIM_E), jnp.float32)
    nfeat = jax.random.normal(keys[1], (N_NODES, DIM_N), jnp.float32)
    edge_dst = jax.random.randint(keys[2], (N_EDGES,), 0, N_NODES)

    # Deterministic synthetic parameters (MeshGraphMLP with hidden_layers=1).
    w1 = 0.05 * jax.random.normal(keys[3], (DIM_E + DIM_N, HIDDEN), jnp.float32)
    b1 = 0.01 * jax.random.normal(keys[4], (1, HIDDEN), jnp.float32)
    w2 = 0.05 * jax.random.normal(keys[5], (HIDDEN, DIM_O), jnp.float32)
    b2 = 0.01 * jax.random.normal(keys[6], (1, DIM_O), jnp.float32)
    gamma = 1.0 + 0.1 * jax.random.normal(keys[7], (1, DIM_O), jnp.float32)
    beta = jnp.zeros((1, DIM_O), jnp.float32)
    params = (w1, b1, w2, b2, gamma, beta)

    for aggregation in ("sum", "mean"):
        # Host preprocessing runs once per (static) graph; forward is jitted.
        # chunk_e=1024 here (vs default 2048) just to exercise multiple chunks
        # per node tile at this small test size.
        graph = prepare_mesh_graph(edge_dst, N_NODES, aggregation=aggregation,
                                   tile_n=256, chunk_e=1024)
        fwd = jax.jit(lambda ef, nf, ps, g=graph: mesh_node_block(ef, nf, g, ps))
        efeat_out, nfeat_out = fwd(efeat, nfeat, params)
        jax.block_until_ready(nfeat_out)

        # Verify against plain-JAX fp32 reference (bf16 matmul operands -> looser tol).
        _, nfeat_ref = reference(efeat, nfeat, edge_dst, params,
                                 num_nodes=N_NODES, aggregation=aggregation)
        np.testing.assert_allclose(np.asarray(nfeat_out), np.asarray(nfeat_ref),
                                   rtol=3e-2, atol=3e-2)
        assert efeat_out.shape == efeat.shape and nfeat_out.shape == nfeat.shape

    print("KERNEL_OK")
</pallas_src>

<mosaic_0001>
module attributes {stable_mosaic.version = 11 : i64} {
  func.func @_mesh_node_block_kernel(%arg0: i32, %arg1: i32, %arg2: memref<2xi32, #tpu.memory_space<smem>>, %arg3: memref<2xi32, #tpu.memory_space<smem>>, %arg4: memref<1024x1xi32, #tpu.memory_space<vmem>>, %arg5: memref<32x1024xbf16, #tpu.memory_space<vmem>>, %arg6: memref<256x32xf32, #tpu.memory_space<vmem>>, %arg7: memref<32x64xbf16, #tpu.memory_space<vmem>>, %arg8: memref<32x64xbf16, #tpu.memory_space<vmem>>, %arg9: memref<1x64xf32, #tpu.memory_space<vmem>>, %arg10: memref<64x32xbf16, #tpu.memory_space<vmem>>, %arg11: memref<1x32xf32, #tpu.memory_space<vmem>>, %arg12: memref<1x32xf32, #tpu.memory_space<vmem>>, %arg13: memref<1x32xf32, #tpu.memory_space<vmem>>, %arg14: memref<256x32xf32, #tpu.memory_space<vmem>>, %arg15: memref<32x256xf32, #tpu.memory_space<vmem>>) attributes {dimension_semantics = [#tpu.dimension_semantics<parallel>, #tpu.dimension_semantics<arbitrary>], iteration_bounds = array<i64: 2, 5>, scalar_prefetch = 2 : i64, scratch_operands = 1 : i64, tpu.core_type = #tpu.core_type<tc>, window_params = [{transform_indices = @transform_0, window_bounds = array<i64: 1024, 1>}, {transform_indices = @transform_1, window_bounds = array<i64: 32, 1024>}, {transform_indices = @transform_2, window_bounds = array<i64: 256, 32>}, {pipeline_mode = #tpu.pipeline_mode<synchronous>, transform_indices = @transform_3, window_bounds = array<i64: 32, 64>}, {pipeline_mode = #tpu.pipeline_mode<synchronous>, transform_indices = @transform_4, window_bounds = array<i64: 32, 64>}, {pipeline_mode = #tpu.pipeline_mode<synchronous>, transform_indices = @transform_5, window_bounds = array<i64: 1, 64>}, {pipeline_mode = #tpu.pipeline_mode<synchronous>, transform_indices = @transform_6, window_bounds = array<i64: 64, 32>}, {pipeline_mode = #tpu.pipeline_mode<synchronous>, transform_indices = @transform_7, window_bounds = array<i64: 1, 32>}, {pipeline_mode = #tpu.pipeline_mode<synchronous>, transform_indices = @transform_8, window_bounds = array<i64: 1, 32>}, {pipeline_mode = #tpu.pipeline_mode<synchronous>, transform_indices = @transform_9, window_bounds = array<i64: 1, 32>}, {transform_indices = @transform_10, window_bounds = array<i64: 256, 32>}]} {
    %c0_i32 = arith.constant 0 : i32
    %0 = arith.cmpi eq, %arg1, %c0_i32 : i32
    %1 = arith.extui %0 : i1 to i32
    %c0_i32_0 = arith.constant 0 : i32
    %2 = arith.cmpi ne, %1, %c0_i32_0 : i32
    scf.if %2 {
      %cst = arith.constant 0.000000e+00 : f32
      %11 = vector.broadcast %cst : f32 to vector<32x256xf32>
      %c0 = arith.constant 0 : index
      %c0_3 = arith.constant 0 : index
      %12 = vector.load %arg15[%c0, %c0_3] : memref<32x256xf32, #tpu.memory_space<vmem>>, vector<32x256xf32>
      tpu.vector_store %arg15[%c0, %c0_3], %11 {strides = array<i32>} : memref<32x256xf32, #tpu.memory_space<vmem>>, vector<32x256xf32>,
    } else {
    }
    %3 = arith.index_cast %arg0 : i32 to index
    %4 = memref.load %arg3[%3] : memref<2xi32, #tpu.memory_space<smem>>
    %5 = arith.cmpi slt, %arg1, %4 : i32
    %6 = arith.extui %5 : i1 to i32
    %c0_i32_1 = arith.constant 0 : i32
    %7 = arith.cmpi ne, %6, %c0_i32_1 : i32
    scf.if %7 {
      %11 = tpu.iota {dimensions = array<i32: 1>} : vector<1024x256xi32>
      %c0 = arith.constant 0 : index
      %c0_3 = arith.constant 0 : index
      %12 = vector.load %arg4[%c0, %c0_3] : memref<1024x1xi32, #tpu.memory_space<vmem>>, vector<1024x1xi32>
      %c256_i32 = arith.constant 256 : i32
      %13 = arith.muli %arg0, %c256_i32 : i32
      %14 = vector.broadcast %13 : i32 to vector<1024x1xi32>
      %15 = arith.subi %12, %14 : vector<1024x1xi32>
      %16 = vector.broadcast %15 : vector<1024x1xi32> to vector<1024x256xi32>
      %17 = arith.cmpi eq, %11, %16 : vector<1024x256xi32>
      %18 = arith.extui %17 : vector<1024x256xi1> to vector<1024x256xi32>
      %19 = arith.sitofp %18 : vector<1024x256xi32> to vector<1024x256xf32>
      %20 = arith.truncf %19 : vector<1024x256xf32> to vector<1024x256xbf16>
      %c0_4 = arith.constant 0 : index
      %c0_5 = arith.constant 0 : index
      %21 = vector.load %arg15[%c0_4, %c0_5] : memref<32x256xf32, #tpu.memory_space<vmem>>, vector<32x256xf32>
      %c0_6 = arith.constant 0 : index
      %c0_7 = arith.constant 0 : index
      %22 = vector.load %arg5[%c0_6, %c0_7] : memref<32x1024xbf16, #tpu.memory_space<vmem>>, vector<32x1024xbf16>
      %cst = arith.constant dense<0.000000e+00> : vector<32x256xf32>
      %23 = tpu.matmul %22, %20, %cst {dimension_numbers = #tpu.dot_dimension_numbers<[1], [0], [0], [1], [0, 0, 1, 1], [], []>} : vector<32x1024xbf16>, vector<1024x256xbf16>, vector<32x256xf32> -> vector<32x256xf32>
      %24 = arith.addf %21, %23 : vector<32x256xf32>
      %c0_8 = arith.constant 0 : index
      %c0_9 = arith.constant 0 : index
      %25 = vector.load %arg15[%c0_8, %c0_9] : memref<32x256xf32, #tpu.memory_space<vmem>>, vector<32x256xf32>
      tpu.vector_store %arg15[%c0_8, %c0_9], %24 {strides = array<i32>} : memref<32x256xf32, #tpu.memory_space<vmem>>, vector<32x256xf32>,
    } else {
    }
    %c4_i32 = arith.constant 4 : i32
    %8 = arith.cmpi eq, %arg1, %c4_i32 : i32
    %9 = arith.extui %8 : i1 to i32
    %c0_i32_2 = arith.constant 0 : i32
    %10 = arith.cmpi ne, %9, %c0_i32_2 : i32
    scf.if %10 {
      %c0 = arith.constant 0 : index
      %c0_3 = arith.constant 0 : index
      %11 = vector.load %arg15[%c0, %c0_3] : memref<32x256xf32, #tpu.memory_space<vmem>>, vector<32x256xf32>
      %12 = tpu.transpose %11, [1, 0] : vector<32x256xf32> -> vector<256x32xf32>
      %13 = arith.truncf %12 : vector<256x32xf32> to vector<256x32xbf16>
      %c0_4 = arith.constant 0 : index
      %c0_5 = arith.constant 0 : index
      %14 = vector.load %arg6[%c0_4, %c0_5] : memref<256x32xf32, #tpu.memory_space<vmem>>, vector<256x32xf32>
      %c0_6 = arith.constant 0 : index
      %c0_7 = arith.constant 0 : index
      %15 = vector.load %arg7[%c0_6, %c0_7] : memref<32x64xbf16, #tpu.memory_space<vmem>>, vector<32x64xbf16>
      %cst = arith.constant dense<0.000000e+00> : vector<256x64xf32>
      %16 = tpu.matmul %13, %15, %cst {dimension_numbers = #tpu.dot_dimension_numbers<[1], [0], [0], [1], [0, 0, 1, 1], [], []>} : vector<256x32xbf16>, vector<32x64xbf16>, vector<256x64xf32> -> vector<256x64xf32>
      %17 = arith.truncf %14 : vector<256x32xf32> to vector<256x32xbf16>
      %c0_8 = arith.constant 0 : index
      %c0_9 = arith.constant 0 : index
      %18 = vector.load %arg8[%c0_8, %c0_9] : memref<32x64xbf16, #tpu.memory_space<vmem>>, vector<32x64xbf16>
      %cst_10 = arith.constant dense<0.000000e+00> : vector<256x64xf32>
      %19 = tpu.matmul %17, %18, %cst_10 {dimension_numbers = #tpu.dot_dimension_numbers<[1], [0], [0], [1], [0, 0, 1, 1], [], []>} : vector<256x32xbf16>, vector<32x64xbf16>, vector<256x64xf32> -> vector<256x64xf32>
      %20 = arith.addf %16, %19 : vector<256x64xf32>
      %c0_11 = arith.constant 0 : index
      %c0_12 = arith.constant 0 : index
      %21 = vector.load %arg9[%c0_11, %c0_12] : memref<1x64xf32, #tpu.memory_space<vmem>>, vector<1x64xf32>
      %22 = vector.broadcast %21 : vector<1x64xf32> to vector<256x64xf32>
      %23 = arith.addf %20, %22 : vector<256x64xf32>
      %24 = arith.negf %23 : vector<256x64xf32>
      %25 = math.exp %24 : vector<256x64xf32>
      %cst_13 = arith.constant 1.000000e+00 : f32
      %26 = vector.broadcast %cst_13 : f32 to vector<256x64xf32>
      %27 = arith.addf %26, %25 : vector<256x64xf32>
      %28 = arith.divf %26, %27 : vector<256x64xf32>
      %29 = arith.mulf %23, %28 : vector<256x64xf32>
      %30 = arith.truncf %29 : vector<256x64xf32> to vector<256x64xbf16>
      %c0_14 = arith.constant 0 : index
      %c0_15 = arith.constant 0 : index
      %31 = vector.load %arg10[%c0_14, %c0_15] : memref<64x32xbf16, #tpu.memory_space<vmem>>, vector<64x32xbf16>
      %cst_16 = arith.constant dense<0.000000e+00> : vector<256x32xf32>
      %32 = tpu.matmul %30, %31, %cst_16 {dimension_numbers = #tpu.dot_dimension_numbers<[1], [0], [0], [1], [0, 0, 1, 1], [], []>} : vector<256x64xbf16>, vector<64x32xbf16>, vector<256x32xf32> -> vector<256x32xf32>
      %c0_17 = arith.constant 0 : index
      %c0_18 = arith.constant 0 : index
      %33 = vector.load %arg11[%c0_17, %c0_18] : memref<1x32xf32, #tpu.memory_space<vmem>>, vector<1x32xf32>
      %34 = vector.broadcast %33 : vector<1x32xf32> to vector<256x32xf32>
      %35 = arith.addf %32, %34 : vector<256x32xf32>
      %cst_19 = arith.constant dense<0.000000e+00> : vector<256xf32>
      %36 = vector.multi_reduction <add>, %35, %cst_19 [1] : vector<256x32xf32> to vector<256xf32>
      %37 = vector.shape_cast %36 : vector<256xf32> to vector<256x1xf32>
      %cst_20 = arith.constant 3.200000e+01 : f32
      %38 = vector.broadcast %cst_20 : f32 to vector<256x1xf32>
      %39 = arith.divf %37, %38 : vector<256x1xf32>
      %40 = vector.broadcast %39 : vector<256x1xf32> to vector<256x32xf32>
      %41 = arith.subf %35, %40 : vector<256x32xf32>
      %42 = arith.mulf %41, %41 : vector<256x32xf32>
      %cst_21 = arith.constant dense<0.000000e+00> : vector<256xf32>
      %43 = vector.multi_reduction <add>, %42, %cst_21 [1] : vector<256x32xf32> to vector<256xf32>
      %44 = vector.shape_cast %43 : vector<256xf32> to vector<256x1xf32>
      %cst_22 = arith.constant 3.200000e+01 : f32
      %45 = vector.broadcast %cst_22 : f32 to vector<256x1xf32>
      %46 = arith.divf %44, %45 : vector<256x1xf32>
      %cst_23 = arith.constant 9.99999974E-6 : f32
      %47 = vector.broadcast %cst_23 : f32 to vector<256x1xf32>
      %48 = arith.addf %46, %47 : vector<256x1xf32>
      %49 = math.rsqrt %48 : vector<256x1xf32>
      %50 = vector.broadcast %49 : vector<256x1xf32> to vector<256x32xf32>
      %51 = arith.mulf %41, %50 : vector<256x32xf32>
      %c0_24 = arith.constant 0 : index
      %c0_25 = arith.constant 0 : index
      %52 = vector.load %arg12[%c0_24, %c0_25] : memref<1x32xf32, #tpu.memory_space<vmem>>, vector<1x32xf32>
      %53 = vector.broadcast %52 : vector<1x32xf32> to vector<256x32xf32>
      %54 = arith.mulf %51, %53 : vector<256x32xf32>
      %c0_26 = arith.constant 0 : index
      %c0_27 = arith.constant 0 : index
      %55 = vector.load %arg13[%c0_26, %c0_27] : memref<1x32xf32, #tpu.memory_space<vmem>>, vector<1x32xf32>
      %56 = vector.broadcast %55 : vector<1x32xf32> to vector<256x32xf32>
      %57 = arith.addf %54, %56 : vector<256x32xf32>
      %58 = arith.addf %57, %14 : vector<256x32xf32>
      %c0_28 = arith.constant 0 : index
      %c0_29 = arith.constant 0 : index
      %59 = vector.load %arg14[%c0_28, %c0_29] : memref<256x32xf32, #tpu.memory_space<vmem>>, vector<256x32xf32>
      tpu.vector_store %arg14[%c0_28, %c0_29], %58 {strides = array<i32>} : memref<256x32xf32, #tpu.memory_space<vmem>>, vector<256x32xf32>,
    } else {
    }
    return
  }
  func.func @transform_0(%arg0: i32, %arg1: i32, %arg2: memref<2xi32, #tpu.memory_space<smem>>, %arg3: memref<2xi32, #tpu.memory_space<smem>>) -> (i32, i32) {
    %0 = arith.index_cast %arg0 : i32 to index
    %1 = memref.load %arg3[%0] : memref<2xi32, #tpu.memory_space<smem>>
    %c1_i32 = arith.constant 1 : i32
    %2 = arith.subi %1, %c1_i32 : i32
    %c0_i32 = arith.constant 0 : i32
    %3 = arith.maxsi %2, %c0_i32 : i32
    %4 = arith.minsi %arg1, %3 : i32
    %5 = arith.index_cast %arg0 : i32 to index
    %6 = memref.load %arg2[%5] : memref<2xi32, #tpu.memory_space<smem>>
    %7 = arith.addi %6, %4 : i32
    %c0_i32_0 = arith.constant 0 : i32
    %c0_i32_1 = arith.constant 0 : i32
    return %7, %c0_i32_0 : i32, i32
  }
  func.func @transform_1(%arg0: i32, %arg1: i32, %arg2: memref<2xi32, #tpu.memory_space<smem>>, %arg3: memref<2xi32, #tpu.memory_space<smem>>) -> (i32, i32) {
    %0 = arith.index_cast %arg0 : i32 to index
    %1 = memref.load %arg3[%0] : memref<2xi32, #tpu.memory_space<smem>>
    %c1_i32 = arith.constant 1 : i32
    %2 = arith.subi %1, %c1_i32 : i32
    %c0_i32 = arith.constant 0 : i32
    %3 = arith.maxsi %2, %c0_i32 : i32
    %4 = arith.minsi %arg1, %3 : i32
    %5 = arith.index_cast %arg0 : i32 to index
    %6 = memref.load %arg2[%5] : memref<2xi32, #tpu.memory_space<smem>>
    %7 = arith.addi %6, %4 : i32
    %c0_i32_0 = arith.constant 0 : i32
    %c0_i32_1 = arith.constant 0 : i32
    return %c0_i32_0, %7 : i32, i32
  }
  func.func @transform_2(%arg0: i32, %arg1: i32, %arg2: memref<2xi32, #tpu.memory_space<smem>>, %arg3: memref<2xi32, #tpu.memory_space<smem>>) -> (i32, i32) {
    %c0_i32 = arith.constant 0 : i32
    %c0_i32_0 = arith.constant 0 : i32
    return %arg0, %c0_i32 : i32, i32
  }
  func.func @transform_3(%arg0: i32, %arg1: i32, %arg2: memref<2xi32, #tpu.memory_space<smem>>, %arg3: memref<2xi32, #tpu.memory_space<smem>>) -> (i32, i32) {
    %c0_i32 = arith.constant 0 : i32
    %c0_i32_0 = arith.constant 0 : i32
    %c0_i32_1 = arith.constant 0 : i32
    return %c0_i32, %c0_i32_0 : i32, i32
  }
  func.func @transform_4(%arg0: i32, %arg1: i32, %arg2: memref<2xi32, #tpu.memory_space<smem>>, %arg3: memref<2xi32, #tpu.memory_space<smem>>) -> (i32, i32) {
    %c0_i32 = arith.constant 0 : i32
    %c0_i32_0 = arith.constant 0 : i32
    %c0_i32_1 = arith.constant 0 : i32
    return %c0_i32, %c0_i32_0 : i32, i32
  }
  func.func @transform_5(%arg0: i32, %arg1: i32, %arg2: memref<2xi32, #tpu.memory_space<smem>>, %arg3: memref<2xi32, #tpu.memory_space<smem>>) -> (i32, i32) {
    %c0_i32 = arith.constant 0 : i32
    %c0_i32_0 = arith.constant 0 : i32
    %c0_i32_1 = arith.constant 0 : i32
    return %c0_i32, %c0_i32_0 : i32, i32
  }
  func.func @transform_6(%arg0: i32, %arg1: i32, %arg2: memref<2xi32, #tpu.memory_space<smem>>, %arg3: memref<2xi32, #tpu.memory_space<smem>>) -> (i32, i32) {
    %c0_i32 = arith.constant 0 : i32
    %c0_i32_0 = arith.constant 0 : i32
    %c0_i32_1 = arith.constant 0 : i32
    return %c0_i32, %c0_i32_0 : i32, i32
  }
  func.func @transform_7(%arg0: i32, %arg1: i32, %arg2: memref<2xi32, #tpu.memory_space<smem>>, %arg3: memref<2xi32, #tpu.memory_space<smem>>) -> (i32, i32) {
    %c0_i32 = arith.constant 0 : i32
    %c0_i32_0 = arith.constant 0 : i32
    %c0_i32_1 = arith.constant 0 : i32
    return %c0_i32, %c0_i32_0 : i32, i32
  }
  func.func @transform_8(%arg0: i32, %arg1: i32, %arg2: memref<2xi32, #tpu.memory_space<smem>>, %arg3: memref<2xi32, #tpu.memory_space<smem>>) -> (i32, i32) {
    %c0_i32 = arith.constant 0 : i32
    %c0_i32_0 = arith.constant 0 : i32
    %c0_i32_1 = arith.constant 0 : i32
    return %c0_i32, %c0_i32_0 : i32, i32
  }
  func.func @transform_9(%arg0: i32, %arg1: i32, %arg2: memref<2xi32, #tpu.memory_space<smem>>, %arg3: memref<2xi32, #tpu.memory_space<smem>>) -> (i32, i32) {
    %c0_i32 = arith.constant 0 : i32
    %c0_i32_0 = arith.constant 0 : i32
    %c0_i32_1 = arith.constant 0 : i32
    return %c0_i32, %c0_i32_0 : i32, i32
  }
  func.func @transform_10(%arg0: i32, %arg1: i32, %arg2: memref<2xi32, #tpu.memory_space<smem>>, %arg3: memref<2xi32, #tpu.memory_space<smem>>) -> (i32, i32) {
    %c0_i32 = arith.constant 0 : i32
    %c0_i32_0 = arith.constant 0 : i32
    return %arg0, %c0_i32 : i32, i32
  }
}

</mosaic_0001>

<bundles_post_ra>
// kernel: _lambda_.1
= control target key start
LH: loop header
LB: loop body
LE: loop exit
PB: predicated region body
PF: predicated region fallthrough
CT: control target
= control target key end

     0   :  { %s7471_s0 = inlined_call_operand.vmem [shape: s32[2], index: 0, kind: input, shape index: {}]   ;;  %s7472_s2 = inlined_call_operand.vmem [shape: s32[8192,1], index: 2, kind: input, shape index: {}]   ;;  %s7473_s3 = inlined_call_operand.vmem [shape: bf16[32,8192], index: 3, kind: input, shape index: {}]   ;;  %s7474_s4 = inlined_call_operand.vmem [shape: f32[512,32], index: 4, kind: input, shape index: {}]   ;;  %s7475_s5 = inlined_call_operand.vmem [shape: bf16[32,64], index: 5, kind: input, shape index: {}]   ;;  %s7476_s6 = inlined_call_operand.vmem [shape: bf16[32,64], index: 6, kind: input, shape index: {}]   ;;  %s7477_s7 = inlined_call_operand.vmem [shape: f32[1,64], index: 7, kind: input, shape index: {}]   ;;  %s7478_s8 = inlined_call_operand.vmem [shape: bf16[64,32], index: 8, kind: input, shape index: {}]   ;;  %s7479_s9 = inlined_call_operand.vmem [shape: f32[1,32], index: 9, kind: input, shape index: {}]   ;;  %s7480_s10 = inlined_call_operand.vmem [shape: f32[1,32], index: 10, kind: input, shape index: {}]   ;;  %s7481_s11 = inlined_call_operand.vmem [shape: f32[1,32], index: 11, kind: input, shape index: {}]   ;;  %s7482_s12 = inlined_call_operand.vmem [shape: f32[512,32], index: 12, kind: output, shape index: {}]   ;;  %s7483_s1 = inlined_call_operand.vmem [shape: s32[2], index: 1, kind: input, shape index: {}]  }
   0x1   :  { %7486 = sst [smem:[#allocation10_spill]] %s7473_s3  ;;  %s17_s23 = sshll.u32 %s7471_s0, 4  ;;  %s18_s23 = int_to_ptr.vmem [resolvable:$true] %s17_s23 }
   0x2   :  { %7487 = sst [smem:[#allocation11_spill]] %s7479_s9  ;;  %s21_s26 = sshll.u32 %s7483_s1, 4  ;;  %s22_s26 = int_to_ptr.vmem [resolvable:$true] %s21_s26 }
   0x3   :  { %7488 = sst [smem:[#allocation12_spill]] %s7480_s10  ;;  %s5352_s27 = scalar_lea.vmem %s18_s23, 16 }
   0x4   :  { %7489 = sst [smem:[#allocation13_spill]] %s7481_s11  ;;  %p5353_p0 = scmp.ne.s32.totalorder %s18_s23, %s5352_s27 }
   0x5   :  { %p5357_p1 = scmp.lt.s32.totalorder %s18_s23, %s18_s23  ;;  %p5358_p2 = scmp.lt.s32.totalorder %s5352_s27, %s5352_s27 }
   0x7   :  { %p5359_p3 = por %p5358_p2, %p5357_p1 }
   0x9   :  { %p5360_p4 = pnand %p5359_p3, %p5353_p0 }
   0xb   :  { %5363 = shalt.err (!%p5360_p4)  }
   0xc   :  { %s5434_s28 = smov [#allocation4]   ;;  %s5364_s29 = scalar_lea.vmem %s22_s26, 16 }
   0xd   :  { %20 = dma.vmem_to_smem %s18_s23, 16, %s5434_s28, [#allocation3] }
   0xe   :  { %p5365_p5 = scmp.ne.s32.totalorder %s22_s26, %s5364_s29  ;;  %p5369_p6 = scmp.lt.s32.totalorder %s22_s26, %s22_s26 }
   0xf   :  { %p5370_p7 = scmp.lt.s32.totalorder %s5364_s29, %s5364_s29 }
  0x11   :  { %p5371_p8 = por %p5370_p7, %p5369_p6 }
  0x13   :  { %p5372_p9 = pnand %p5371_p8, %p5365_p5 }
  0x15   :  { %5375 = shalt.err (!%p5372_p9)  }
  0x16   :  { %s5435_s0 = smov [#allocation5]  }
  0x17   :  { %24 = dma.vmem_to_smem %s22_s26, 16, %s5435_s0, [#allocation3] }
  0x18   :  { %5404 = dma.done.wait [#allocation3], 32 }
  0x19   :  { %5405 = vsyncadd [#allocation3], 4294967264 }
  0x1a   :  { %26 = sfence }
  0x1b   :  { %s5510_s1 = smov 0   ;;  %s5512_s30 = smov 0  }
  0x1c   :  { %s5514_s13 = smov 0   ;;  %s5516_s14 = smov 0  }
  0x1d   :  { %s5518_s15 = smov 0   ;;  %s5520_s16 = smov 0  }
  0x1e   :  { %s5522_s17 = smov 0  }
  0x1f LB: > { %s41_s18 = sadd.s32 1, %s5424_s15  ;;  %s44_s19 = sadd.s32 1, %s5428_s16  ;;  %s5432_s17 = sphi %s5522_s17, %s32_s17   ;;  %s5428_s16 = sphi %s5520_s16, %s7521_s16   ;;  %s5424_s15 = sphi %s5518_s15, %s7520_s15   ;;  %s5420_s14 = sphi %s5516_s14, %s7519_s14   ;;  %s5416_s13 = sphi %s5514_s13, %s7518_s13   ;;  %s5412_s30 = sphi %s5512_s30, %s7517_s30   ;;  %s5408_s1 = sphi %s5510_s1, %s7516_s1  }
  0x20   : > { %p5547_p10 = scmp.ge.s32.totalorder %s41_s18, 5  ;;  %s90_s21 = sld [smem:[#allocation5 + %s5428_s16]] }
  0x21   : > { %p116_p11 = scmp.ne.s32.totalorder %s5412_s30, %s5408_s1  ;;  %p117_p12 = scmp.eq.s32.totalorder %s5432_s17, 0 }
  0x22   : > { %s7523_s19 = smov (!%p5547_p10, %s44_s19), %s5428_s16  ;;  %s96_s25 = sld [smem:[#allocation4 + %s5428_s16]] }
  0x23   : > { %p46_p13 = scmp.ge.s32.totalorder %s7523_s19, 2  ;;  %p5558_p0 = por %p117_p12, %p116_p11 }
  0x24   : > { %s7529_s18 = smov (%p5547_p10, %s41_s18), 0  ;;  %s109_s10 = sadd.s32 1, %s5412_s30 }
  0x25   : > { %s7525_s19 = smov (%p46_p13, %s7523_s19), 0  ;;  %7493 = sst [smem:[#allocation9_spill]] %s7529_s18 }
  0x26   : > { %s4240_s22 = sadd.s32 4294967295, %s90_s21  ;;  %7492 = sst [smem:[#allocation8_spill]] %s7525_s19 }
  0x27   : > { %p92_p1 = scmp.gt.s32.totalorder %s4240_s22, 0  ;;  %s98_s24 = sld [smem:[#allocation5 + %s7525_s19]] }
  0x28   : > { %s104_s27 = sld [smem:[#allocation4 + %s7525_s19]]  ;;  %p4243_p6 = scmp.ge.s32.totalorder %s5432_s17, 10 }
  0x29   : > { %s7527_s22 = smov (!%p92_p1, %s4240_s22), 0 }
  0x2a   : > { %p94_p2 = scmp.lt.s32.totalorder %s5424_s15, %s7527_s22 }
  0x2c   : > { %s95_s28 = scalar_select %p94_p2, %s5424_s15, %s7527_s22 }
  0x2d   : > { %s4241_s26 = sadd.s32 4294967295, %s98_s24 }
  0x2e   : > { %p100_p3 = scmp.gt.s32.totalorder %s4241_s26, 0  ;;  %s97_s29 = sadd.s32 %s96_s25, %s95_s28 }
  0x30   : > { %s7531_s26 = smov (!%p100_p3, %s4241_s26), 0 }
  0x31   : > { %p102_p4 = scmp.lt.s32.totalorder %s7529_s18, %s7531_s26 }
  0x33   : > { %s103_s0 = scalar_select %p102_p4, %s7529_s18, %s7531_s26 }
  0x35   : > { %s105_s21 = sadd.s32 %s104_s27, %s103_s0  ;;  %362 = sbr.rel (%p4243_p6) target bundleno = 84 (0x54), region = 44 }
  0x36   : > { %s106_s11 = ssub.s32 %s97_s29, %s105_s21 }
  0x37   : > { %p107_p5 = scmp.eq.s32.totalorder %s106_s11, 0 }
  0x39   : > { %s5577_s9 = scalar_select %p107_p5, %s5412_s30, %s109_s10  }
  0x3a   : > { %390 = sbr.rel (!%p5558_p0) target bundleno = 84 (0x54), region = 52  ;;  %s395_s20 = sld [smem:[#allocation5 + %s5428_s16]] (%p5558_p0) }
  0x3b   : > { %s401_s24 = sld [smem:[#allocation4 + %s5428_s16]] (%p5558_p0)  ;;  %s392_s25 = sand.u32 (%p5558_p0), 1, %s5412_s30  }
  0x3c   : > { %s4244_s10 = sshll.u32 (%p5558_p0), %s392_s25, 7  ;;  %s7494_s3 = sld [smem:[#allocation10_spill]] (%p5558_p0) }
  0x3d   : > { %s394_s0 = scalar_lea.vmem (%p5558_p0), [#allocation6], %s4244_s10 }
  0x40   : > { %s4245_s22 = sadd.s32 4294967295, %s395_s20 }
  0x41   : > { %p397_p7 = scmp.gt.s32.totalorder %s4245_s22, 0 }
  0x43   : > { %s7533_s22 = smov (!%p397_p7, %s4245_s22), 0 }
  0x44   : > { %p399_p8 = scmp.lt.s32.totalorder %s5424_s15, %s7533_s22 }
  0x46   : > { %s400_s11 = scalar_select %p399_p8, %s5424_s15, %s7533_s22 }
  0x48   : > { %s402_s26 = sadd.s32 %s401_s24, %s400_s11 }
  0x49   : > { %s4883_s27 = sshll.u32 %s402_s26, 5 }
  0x4a   : > { %s5590_s23 = scalar_lea.vmem %s7494_s3, %s4883_s27 }
  0x4b   : > { %v418_v0 = vld [vmem:[%s5590_s23] sm:$0xff]  ;;  %v420_v1 = vld [vmem:[%s5590_s23 + $0x8] sm:$0xff]  ;;  %v422_v2 = vld [vmem:[%s5590_s23 + $0x10] sm:$0xff] }
  0x4c   : > { %419 = vst [vmem:[%s394_s0] sm:$0xff] %v418_v0  ;;  %421 = vst [vmem:[%s394_s0 + $0x8] sm:$0xff] %v420_v1  ;;  %v424_v3 = vld [vmem:[%s5590_s23 + $0x18] sm:$0xff]  ;;  %v426_v4 = vld [vmem:[%s5590_s23 + $0x100] sm:$0xff] }
  0x4d   : > { %423 = vst [vmem:[%s394_s0 + $0x10] sm:$0xff] %v422_v2  ;;  %v428_v5 = vld [vmem:[%s5590_s23 + $0x108] sm:$0xff]  ;;  %425 = vst [vmem:[%s394_s0 + $0x18] sm:$0xff] %v424_v3  ;;  %v430_v6 = vld [vmem:[%s5590_s23 + $0x110] sm:$0xff] }
  0x4e   : > { %427 = vst [vmem:[%s394_s0 + $0x20] sm:$0xff] %v426_v4  ;;  %429 = vst [vmem:[%s394_s0 + $0x28] sm:$0xff] %v428_v5  ;;  %v432_v7 = vld [vmem:[%s5590_s23 + $0x118] sm:$0xff]  ;;  %v434_v8 = vld [vmem:[%s5590_s23 + $0x200] sm:$0xff] }
  0x4f   : > { %431 = vst [vmem:[%s394_s0 + $0x30] sm:$0xff] %v430_v6  ;;  %433 = vst [vmem:[%s394_s0 + $0x38] sm:$0xff] %v432_v7  ;;  %v436_v9 = vld [vmem:[%s5590_s23 + $0x208] sm:$0xff]  ;;  %v438_v10 = vld [vmem:[%s5590_s23 + $0x210] sm:$0xff] }
  0x50   : > { %435 = vst [vmem:[%s394_s0 + $0x40] sm:$0xff] %v434_v8  ;;  %v440_v11 = vld [vmem:[%s5590_s23 + $0x218] sm:$0xff]  ;;  %437 = vst [vmem:[%s394_s0 + $0x48] sm:$0xff] %v436_v9  ;;  %v442_v12 = vld [vmem:[%s5590_s23 + $0x300] sm:$0xff] }
  0x51   : > { %439 = vst [vmem:[%s394_s0 + $0x50] sm:$0xff] %v438_v10  ;;  %441 = vst [vmem:[%s394_s0 + $0x58] sm:$0xff] %v440_v11  ;;  %v444_v13 = vld [vmem:[%s5590_s23 + $0x308] sm:$0xff]  ;;  %v446_v14 = vld [vmem:[%s5590_s23 + $0x310] sm:$0xff] }
  0x52   : > { %443 = vst [vmem:[%s394_s0 + $0x60] sm:$0xff] %v442_v12  ;;  %445 = vst [vmem:[%s394_s0 + $0x68] sm:$0xff] %v444_v13  ;;  %v448_v15 = vld [vmem:[%s5590_s23 + $0x318] sm:$0xff] }
  0x53   : > { %447 = vst [vmem:[%s394_s0 + $0x70] sm:$0xff] %v446_v14  ;;  %449 = vst [vmem:[%s394_s0 + $0x78] sm:$0xff] %v448_v15 }
  0x54 PF: > { %p4248_p9 = scmp.ge.s32.totalorder %s5432_s17, 1  ;;  %p463_p10 = scmp.lt.s32.totalorder %s5432_s17, 11 }
  0x56   : > { %p464_p11 = pnand %p4248_p9, %p463_p10 }
  0x57   : > { %s470_s21 = sand.u32 (!%p464_p11), 1, %s5408_s1   ;;  %s525_s20 = sld [smem:[#allocation5 + %s5420_s14]] (!%p464_p11) }
  0x58   : > { %467 = sbr.rel (%p464_p11) target bundleno = 1711 (0x6af), region = 79  ;;  %s4249_s22 = sshll.u32 (!%p464_p11), %s470_s21, 7 }
  0x59   : > { %s4253_s24 = sshll.u32 (!%p464_p11), %s5420_s14, 5  ;;  %s531_s10 = sld [smem:[#allocation4 + %s5420_s14]] (!%p464_p11) }
  0x5a   : > { %p557_p12 = scmp.lt.s32.totalorder (!%p464_p11), %s4253_s24, 63  ;;  %s5631_s26 = scalar_lea.vmem (!%p464_p11), [#allocation6], %s4249_s22 }
  0x5b   : > { %p4257_p2 = scmp.ne.s32.totalorder (!%p464_p11), %s5416_s13, 0 }
  0x5d   : > { %s7535_s24 = smov (!%p557_p12, %s4253_s24), 63  ;;  %s4250_s25 = sadd.s32 4294967295, %s525_s20 }
  0x5e   : > { %p527_p13 = scmp.gt.s32.totalorder %s4250_s25, 0  ;;  %s4254_s11 = sshll.u32 %s7535_s24, 3 }
  0x5f   : > { %s5617_s28 = scalar_lea.vmem %s7474_s4, %s4254_s11  ;;  %s5622_s0 = scalar_lea.vmem %s7482_s12, %s4254_s11 }
  0x60   : > { %s7537_s25 = smov (!%p527_p13, %s4250_s25), 0 }
  0x61   : > { %p529_p0 = scmp.lt.s32.totalorder %s5416_s13, %s7537_s25 }
  0x63   : > { %s530_s1 = scalar_select %p529_p0, %s5416_s13, %s7537_s25 }
  0x65   : > { %s532_s21 = sadd.s32 %s531_s10, %s530_s1 }
  0x66   : > { %s4251_s3 = sshll.u32 %s532_s21, 7 }
  0x67   : > { %p534_p1 = scmp.lt.s32.totalorder %s4251_s3, 1023  ;;  %572 = sbr.rel (%p4257_p2) target bundleno = 113 (0x71), region = 87 }
  0x69   : > { %s7539_s3 = smov (!%p534_p1, %s4251_s3), 1023 }
  0x6a   : > { %s4252_s20 = sshll.u32 %s7539_s3, 3 }
  0x6b   : > { %s5629_s18 = scalar_lea.vmem %s7472_s2, %s4252_s20 }
  0x6c   : > { %v5436_v16 = vmov 0.0  }
  0x6d   : > { %573 = vst [vmem:[#allocation2 + $0x30] sm:$0xff] %v5436_v16  ;;  %574 = vst [vmem:[#allocation2] sm:$0xff] %v5436_v16 }
  0x6e   : > { %575 = vst [vmem:[#allocation2 + $0x18] sm:$0xff] %v5436_v16  ;;  %576 = vst [vmem:[#allocation2 + $0x10] sm:$0xff] %v5436_v16 }
  0x6f   : > { %577 = vst [vmem:[#allocation2 + $0x8] sm:$0xff] %v5436_v16  ;;  %578 = vst [vmem:[#allocation2 + $0x20] sm:$0xff] %v5436_v16 }
  0x70   : > { %579 = vst [vmem:[#allocation2 + $0x28] sm:$0xff] %v5436_v16  ;;  %580 = vst [vmem:[#allocation2 + $0x38] sm:$0xff] %v5436_v16 }
  0x71 PF: > { %s581_s3 = sld [smem:[#allocation5 + %s5420_s14]] }
  0x77   : > { %p4258_p3 = scmp.ge.s32.totalorder %s5416_s13, %s581_s3 }
  0x78   : > { %s4259_s19 = sshll.u32 (!%p4258_p3), %s5420_s14, 8 }
  0x79   : > { %585 = sbr.rel (%p4258_p3) target bundleno = 725 (0x2d5), region = 91 }
  0x7e   : > { %v591_v17 = vld [vmem:[%s5629_s18 + $0x10] sm:$0xff]  ;;  %v589_v18 = vld [vmem:[%s5629_s18] sm:$0xff]  ;;  %v5437_v19 = vmov 0   ;;  %v5639_v20 = vstv %s4259_s19  ;;  %v592_v21 = vld [vmem:[%s5629_s18 + $0x18] sm:$0xff] }
  0x7f   : > { %5119 = vset.pattern.permute.xlu1 %v5437_v19  ;;  %5118 = vset.pattern.permute.xlu0 %v5437_v19  ;;  %v590_v22 = vld [vmem:[%s5629_s18 + $0x8] sm:$0xff]  ;;  %v721_v23 = vsub.s32 %v591_v17, %v5639_v20  ;;  %v719_v24 = vsub.s32 %v589_v18, %v5639_v20  ;;  %v722_v25 = vsub.s32 %v592_v21, %v5639_v20  ;;  %v593_v28 = vld [vmem:[%s5629_s18 + $0x20] sm:$0xff]  ;;  %v596_v31 = vld [vmem:[%s5629_s18 + $0x38] sm:$0xff] }
  0x80   : > { %v720_v26 = vsub.s32 %v590_v22, %v5639_v20  ;;  %v594_v27 = vld [vmem:[%s5629_s18 + $0x28] sm:$0xff]  ;;  %v723_v30 = vsub.s32 %v593_v28, %v5639_v20  ;;  %v595_v32 = vld [vmem:[%s5629_s18 + $0x30] sm:$0xff]  ;;  %v726_v33 = vsub.s32 %v596_v31, %v5639_v20  ;;  %v597_v36 = vld [vmem:[%s5629_s18 + $0x40] sm:$0xff] }
  0x81   : > { %854 = vperm.xlu1 %5119, %v721_v23   ;;  %848 = vperm.xlu0 %5118, %v719_v24   ;;  %v724_v29 = vsub.s32 %v594_v27, %v5639_v20  ;;  %v725_v34 = vsub.s32 %v595_v32, %v5639_v20  ;;  %v598_v35 = vld [vmem:[%s5629_s18 + $0x48] sm:$0xff]  ;;  %v727_v38 = vsub.s32 %v597_v36, %v5639_v20  ;;  %v600_v39 = vld [vmem:[%s5629_s18 + $0x58] sm:$0xff]  ;;  %v599_v40 = vld [vmem:[%s5629_s18 + $0x50] sm:$0xff] }
  0x82   : > { %v728_v37 = vsub.s32 %v598_v35, %v5639_v20  ;;  %v730_v41 = vsub.s32 %v600_v39, %v5639_v20  ;;  %v729_v42 = vsub.s32 %v599_v40, %v5639_v20  ;;  %v602_v43 = vld [vmem:[%s5629_s18 + $0x68] sm:$0xff]  ;;  %v601_v44 = vld [vmem:[%s5629_s18 + $0x60] sm:$0xff]  ;;  %v604_v47 = vld [vmem:[%s5629_s18 + $0x78] sm:$0xff] }
  0x83   : > { %v732_v45 = vsub.s32 %v602_v43, %v5639_v20  ;;  %v731_v46 = vsub.s32 %v601_v44, %v5639_v20  ;;  %v603_v48 = vld [vmem:[%s5629_s18 + $0x70] sm:$0xff]  ;;  %v734_v49 = vsub.s32 %v604_v47, %v5639_v20  ;;  %v606_v51 = vld [vmem:[%s5629_s18 + $0x88] sm:$0xff]  ;;  %v605_v52 = vld [vmem:[%s5629_s18 + $0x80] sm:$0xff] }
  0x84   : > { %v733_v50 = vsub.s32 %v603_v48, %v5639_v20  ;;  %v736_v53 = vsub.s32 %v606_v51, %v5639_v20  ;;  %v735_v54 = vsub.s32 %v605_v52, %v5639_v20  ;;  %v608_v55 = vld [vmem:[%s5629_s18 + $0x98] sm:$0xff]  ;;  %v607_v56 = vld [vmem:[%s5629_s18 + $0x90] sm:$0xff]  ;;  %v610_v59 = vld [vmem:[%s5629_s18 + $0xa8] sm:$0xff] }
  0x85   : > { %857 = vperm.xlu1 %5119, %v722_v25   ;;  %851 = vperm.xlu0 %5118, %v720_v26   ;;  %v738_v57 = vsub.s32 %v608_v55, %v5639_v20  ;;  %v737_v58 = vsub.s32 %v607_v56, %v5639_v20  ;;  %v609_v60 = vld [vmem:[%s5629_s18 + $0xa0] sm:$0xff]  ;;  %v740_v61 = vsub.s32 %v610_v59, %v5639_v20  ;;  %v612_v63 = vld [vmem:[%s5629_s18 + $0xb8] sm:$0xff]  ;;  %v611_v0 = vld [vmem:[%s5629_s18 + $0xb0] sm:$0xff] }
  0x86   : > { %v739_v62 = vsub.s32 %v609_v60, %v5639_v20  ;;  %v742_v1 = vsub.s32 %v612_v63, %v5639_v20  ;;  %v741_v2 = vsub.s32 %v611_v0, %v5639_v20  ;;  %v614_v3 = vld [vmem:[%s5629_s18 + $0xc8] sm:$0xff]  ;;  %v613_v4 = vld [vmem:[%s5629_s18 + $0xc0] sm:$0xff]  ;;  %v635_v7 = vld [vmem:[%s5629_s18 + $0x170] sm:$0xff] }
  0x87   : > { %v744_v5 = vsub.s32 %v614_v3, %v5639_v20  ;;  %v743_v6 = vsub.s32 %v613_v4, %v5639_v20  ;;  %v615_v8 = vld [vmem:[%s5629_s18 + $0xd0] sm:$0xff]  ;;  %v765_v9 = vsub.s32 %v635_v7, %v5639_v20  ;;  %v633_v11 = vld [vmem:[%s5629_s18 + $0x160] sm:$0xff]  ;;  %v636_v12 = vld [vmem:[%s5629_s18 + $0x178] sm:$0xff] }
  0x88   : > { %v745_v10 = vsub.s32 %v615_v8, %v5639_v20  ;;  %v763_v13 = vsub.s32 %v633_v11, %v5639_v20  ;;  %v766_v14 = vsub.s32 %v636_v12, %v5639_v20  ;;  %v631_v15 = vld [vmem:[%s5629_s18 + $0x150] sm:$0xff]  ;;  %v634_v16 = vld [vmem:[%s5629_s18 + $0x168] sm:$0xff]  ;;  %v629_v19 = vld [vmem:[%s5629_s18 + $0x140] sm:$0xff] }
  0x89   : > { %863 = vperm.xlu1 %5119, %v724_v29   ;;  %860 = vperm.xlu0 %5118, %v723_v30   ;;  %v761_v17 = vsub.s32 %v631_v15, %v5639_v20  ;;  %v764_v18 = vsub.s32 %v634_v16, %v5639_v20  ;;  %v632_v21 = vld [vmem:[%s5629_s18 + $0x158] sm:$0xff]  ;;  %v759_v22 = vsub.s32 %v629_v19, %v5639_v20  ;;  %v627_v24 = vld [vmem:[%s5629_s18 + $0x130] sm:$0xff]  ;;  %v630_v25 = vld [vmem:[%s5629_s18 + $0x148] sm:$0xff] }
  0x8a   : > { %v762_v23 = vsub.s32 %v632_v21, %v5639_v20  ;;  %v757_v26 = vsub.s32 %v627_v24, %v5639_v20  ;;  %v760_v27 = vsub.s32 %v630_v25, %v5639_v20  ;;  %v625_v28 = vld [vmem:[%s5629_s18 + $0x120] sm:$0xff]  ;;  %v628_v29 = vld [vmem:[%s5629_s18 + $0x138] sm:$0xff]  ;;  %v623_v32 = vld [vmem:[%s5629_s18 + $0x110] sm:$0xff] }
  0x8b   : > { %v755_v30 = vsub.s32 %v625_v28, %v5639_v20  ;;  %v758_v31 = vsub.s32 %v628_v29, %v5639_v20  ;;  %v621_v36 = vld [vmem:[%s5629_s18 + $0x100] sm:$0xff]  ;;  %v619_v40 = vld [vmem:[%s5629_s18 + $0xf0] sm:$0xff]  ;;  %v616_v56 = vld [vmem:[%s5629_s18 + $0xd8] sm:$0xff] }
  0x8c   : > { %v651_v44 = vld [vmem:[%s5629_s18 + $0x1f0] sm:$0xff]  ;;  %v617_v48 = vld [vmem:[%s5629_s18 + $0xe0] sm:$0xff]  ;;  %v648_v60 = vld [vmem:[%s5629_s18 + $0x1d8] sm:$0xff] }
  0x8d   : > { %869 = vperm.xlu1 %5119, %v726_v33   ;;  %866 = vperm.xlu0 %5118, %v725_v34   ;;  %v626_v33 = vld [vmem:[%s5629_s18 + $0x128] sm:$0xff]  ;;  %v753_v34 = vsub.s32 %v623_v32, %v5639_v20  ;;  %v649_v52 = vld [vmem:[%s5629_s18 + $0x1e0] sm:$0xff]  ;;  %v644_v4 = vld [vmem:[%s5629_s18 + $0x1b8] sm:$0xff] }
  0x8e   : > { %v756_v35 = vsub.s32 %v626_v33, %v5639_v20  ;;  %v646_v0 = vld [vmem:[%s5629_s18 + $0x1c8] sm:$0xff]  ;;  %v640_v12 = vld [vmem:[%s5629_s18 + $0x198] sm:$0xff]  ;;  %v699_v28 = vld [vmem:[%s5629_s18 + $0x370] sm:$0xff] }
  0x8f   : > { %v642_v8 = vld [vmem:[%s5629_s18 + $0x1a8] sm:$0xff]  ;;  %v668_v21 = vld [vmem:[%s5629_s18 + $0x278] sm:$0xff]  ;;  %v5778_v29 = vld [vmem:[%s5631_s26] sm:$0xff] }
  0x90   : > { %v638_v16 = vld [vmem:[%s5629_s18 + $0x188] sm:$0xff]  ;;  %v798_v25 = vsub.s32 %v668_v21, %v5639_v20 }
  0x91   : > { %875 = vperm.xlu1 %5119, %v728_v37   ;;  %872 = vperm.xlu0 %5118, %v727_v38   ;;  %v624_v37 = vld [vmem:[%s5629_s18 + $0x118] sm:$0xff]  ;;  %v751_v38 = vsub.s32 %v621_v36, %v5639_v20  ;;  %v829_v36 = vsub.s32 %v699_v28, %v5639_v20 }
  0x92   : > { %v754_v39 = vsub.s32 %v624_v37, %v5639_v20  ;;  %v666_v37 = vld [vmem:[%s5629_s18 + $0x268] sm:$0xff] }
  0x95   : > { %881 = vperm.xlu1 %5119, %v730_v41   ;;  %878 = vperm.xlu0 %5118, %v729_v42   ;;  %v622_v41 = vld [vmem:[%s5629_s18 + $0x108] sm:$0xff]  ;;  %v749_v42 = vsub.s32 %v619_v40, %v5639_v20 }
  0x96   : > { %v752_v43 = vsub.s32 %v622_v41, %v5639_v20  ;;  %v5799_v40 = vld [vmem:[%s5631_s26 + $0x28] sm:$0xff] }
  0x99   : > { %887 = vperm.xlu1 %5119, %v732_v45   ;;  %884 = vperm.xlu0 %5118, %v731_v46   ;;  %v620_v45 = vld [vmem:[%s5629_s18 + $0xf8] sm:$0xff]  ;;  %v781_v46 = vsub.s32 %v651_v44, %v5639_v20 }
  0x9a   : > { %v750_v47 = vsub.s32 %v620_v45, %v5639_v20  ;;  %v796_v45 = vsub.s32 %v666_v37, %v5639_v20  ;;  %v658_v37 = vld [vmem:[%s5629_s18 + $0x228] sm:$0xff] }
  0x9d   : > { %893 = vperm.xlu1 %5119, %v734_v49   ;;  %890 = vperm.xlu0 %5118, %v733_v50   ;;  %v652_v49 = vld [vmem:[%s5629_s18 + $0x1f8] sm:$0xff]  ;;  %v747_v50 = vsub.s32 %v617_v48, %v5639_v20  ;;  %v697_v48 = vld [vmem:[%s5629_s18 + $0x360] sm:$0xff] }
  0x9e   : > { %v782_v51 = vsub.s32 %v652_v49, %v5639_v20 }
  0xa1   : > { %899 = vperm.xlu1 %5119, %v736_v53   ;;  %896 = vperm.xlu0 %5118, %v735_v54   ;;  %v618_v53 = vld [vmem:[%s5629_s18 + $0xe8] sm:$0xff]  ;;  %v779_v54 = vsub.s32 %v649_v52, %v5639_v20  ;;  %v827_v52 = vsub.s32 %v697_v48, %v5639_v20 }
  0xa2   : > { %v748_v55 = vsub.s32 %v618_v53, %v5639_v20  ;;  %v664_v53 = vld [vmem:[%s5629_s18 + $0x258] sm:$0xff]  ;;  %v690_v48 = vld [vmem:[%s5629_s18 + $0x328] sm:$0xff] }
  0xa5   : > { %905 = vperm.xlu1 %5119, %v738_v57   ;;  %902 = vperm.xlu0 %5118, %v737_v58   ;;  %v650_v57 = vld [vmem:[%s5629_s18 + $0x1e8] sm:$0xff]  ;;  %v746_v58 = vsub.s32 %v616_v56, %v5639_v20 }
  0xa6   : > { %v780_v59 = vsub.s32 %v650_v57, %v5639_v20  ;;  %v794_v57 = vsub.s32 %v664_v53, %v5639_v20 }
  0xa9   : > { %911 = vperm.xlu1 %5119, %v740_v61   ;;  %908 = vperm.xlu0 %5118, %v739_v62   ;;  %v647_v61 = vld [vmem:[%s5629_s18 + $0x1d0] sm:$0xff]  ;;  %v778_v62 = vsub.s32 %v648_v60, %v5639_v20  ;;  %v586_v60 = vlaneseq }
  0xaa   : > { %v777_v63 = vsub.s32 %v647_v61, %v5639_v20  ;;  %v695_v61 = vld [vmem:[%s5629_s18 + $0x350] sm:$0xff] }
  0xad   : > { %917 = vperm.xlu1 %5119, %v742_v1   ;;  %914 = vperm.xlu0 %5118, %v741_v2   ;;  %v645_v1 = vld [vmem:[%s5629_s18 + $0x1c0] sm:$0xff]  ;;  %v776_v2 = vsub.s32 %v646_v0, %v5639_v20 }
  0xae   : > { %v775_v3 = vsub.s32 %v645_v1, %v5639_v20  ;;  %v825_v1 = vsub.s32 %v695_v61, %v5639_v20 }
  0xb1   : > { %923 = vperm.xlu1 %5119, %v744_v5   ;;  %920 = vperm.xlu0 %5118, %v743_v6   ;;  %v643_v5 = vld [vmem:[%s5629_s18 + $0x1b0] sm:$0xff]  ;;  %v774_v6 = vsub.s32 %v644_v4, %v5639_v20  ;;  %v661_v4 = vld [vmem:[%s5629_s18 + $0x240] sm:$0xff] }
  0xb2   : > { %v773_v7 = vsub.s32 %v643_v5, %v5639_v20 }
  0xb5   : > { %986 = vperm.xlu1 %5119, %v765_v9   ;;  %926 = vperm.xlu0 %5118, %v745_v10   ;;  %v641_v9 = vld [vmem:[%s5629_s18 + $0x1a0] sm:$0xff]  ;;  %v772_v10 = vsub.s32 %v642_v8, %v5639_v20  ;;  %v694_v8 = vld [vmem:[%s5629_s18 + $0x348] sm:$0xff] }
  0xb6   : > { %v771_v11 = vsub.s32 %v641_v9, %v5639_v20  ;;  %v791_v9 = vsub.s32 %v661_v4, %v5639_v20  ;;  %v686_v4 = vld [vmem:[%s5629_s18 + $0x308] sm:$0xff] }
  0xb9   : > { %980 = vperm.xlu1 %5119, %v763_v13   ;;  %989 = vperm.xlu0 %5118, %v766_v14   ;;  %v639_v13 = vld [vmem:[%s5629_s18 + $0x190] sm:$0xff]  ;;  %v770_v14 = vsub.s32 %v640_v12, %v5639_v20 }
  0xba   : > { %v769_v15 = vsub.s32 %v639_v13, %v5639_v20 }
  0xbd   : > { %974 = vperm.xlu1 %5119, %v761_v17   ;;  %983 = vperm.xlu0 %5118, %v764_v18   ;;  %v637_v17 = vld [vmem:[%s5629_s18 + $0x180] sm:$0xff]  ;;  %v768_v18 = vsub.s32 %v638_v16, %v5639_v20  ;;  %v660_v16 = vld [vmem:[%s5629_s18 + $0x238] sm:$0xff] }
  0xbe   : > { %v767_v19 = vsub.s32 %v637_v17, %v5639_v20  ;;  %v5438_v17 = vmov 1.0|1.0  }
  0xc1   : > { %968 = vperm.xlu1 %5119, %v759_v22   ;;  %977 = vperm.xlu0 %5118, %v762_v23   ;;  %v667_v22 = vld [vmem:[%s5629_s18 + $0x270] sm:$0xff] }
  0xc5   : > { %962 = vperm.xlu1 %5119, %v757_v26   ;;  %971 = vperm.xlu0 %5118, %v760_v27   ;;  %v797_v26 = vsub.s32 %v667_v22, %v5639_v20  ;;  %v700_v27 = vld [vmem:[%s5629_s18 + $0x378] sm:$0xff]  ;;  %v790_v22 = vsub.s32 %v660_v16, %v5639_v20 }
  0xc6   : > { %v716_v16 = vld [vmem:[%s5629_s18 + $0x3f8] sm:$0xff] }
  0xc9   : > { %956 = vperm.xlu1 %5119, %v755_v30   ;;  %965 = vperm.xlu0 %5118, %v758_v31   ;;  %v5781_v30 = vld [vmem:[%s5631_s26 + $0x20] sm:$0xff] }
  0xca   : > { %v4516_v33 = vcombine.low %v5778_v29, %v5781_v30 }
  0xcd   : > { %950 = vperm.xlu1 %5119, %v753_v34   ;;  %959 = vperm.xlu0 %5118, %v756_v35   ;;  %v4517_v34 = vcombine.high %v5778_v29, %v5781_v30  ;;  %v830_v35 = vsub.s32 %v700_v27, %v5639_v20  ;;  %v691_v27 = vld [vmem:[%s5629_s18 + $0x330] sm:$0xff]  ;;  %v6360_v30 = vld [vmem:[%s5631_s26 + $0x18] sm:$0xff] }
  0xcf   : > { %2263 = vmatprep.mubr.bf16.mxu0 %v4517_v34 }
  0xd1   : > { %944 = vperm.xlu1 %5119, %v751_v38   ;;  %953 = vperm.xlu0 %5118, %v754_v39   ;;  %v665_v38 = vld [vmem:[%s5629_s18 + $0x260] sm:$0xff]  ;;  %v5796_v39 = vld [vmem:[%s5631_s26 + $0x8] sm:$0xff] }
  0xd2   : > { %v4519_v44 = vcombine.high %v5796_v39, %v5799_v40 }
  0xd4   : > { %2316 = vmatprep.mubr.bf16.mxu1 %v4519_v44 }
  0xd5   : > { %938 = vperm.xlu1 %5119, %v749_v42   ;;  %947 = vperm.xlu0 %5118, %v752_v43   ;;  %v4518_v43 = vcombine.low %v5796_v39, %v5799_v40 }
  0xd9   : > { %1034 = vperm.xlu1 %5119, %v781_v46   ;;  %941 = vperm.xlu0 %5118, %v750_v47   ;;  %v795_v46 = vsub.s32 %v665_v38, %v5639_v20  ;;  %v698_v47 = vld [vmem:[%s5629_s18 + $0x368] sm:$0xff]  ;;  %v657_v38 = vld [vmem:[%s5629_s18 + $0x220] sm:$0xff] }
  0xdd   : > { %932 = vperm.xlu1 %5119, %v747_v50   ;;  %1037 = vperm.xlu0 %5118, %v782_v51   ;;  %v828_v51 = vsub.s32 %v698_v47, %v5639_v20  ;;  %v787_v47 = vsub.s32 %v657_v38, %v5639_v20 }
  0xe1   : > { %1028 = vperm.xlu1 %5119, %v779_v54   ;;  %935 = vperm.xlu0 %5118, %v748_v55   ;;  %v663_v54 = vld [vmem:[%s5629_s18 + $0x250] sm:$0xff] }
  0xe5   : > { %929 = vperm.xlu1 %5119, %v746_v58   ;;  %1031 = vperm.xlu0 %5118, %v780_v59   ;;  %v793_v58 = vsub.s32 %v663_v54, %v5639_v20  ;;  %v696_v59 = vld [vmem:[%s5629_s18 + $0x358] sm:$0xff]  ;;  %v820_v54 = vsub.s32 %v690_v48, %v5639_v20  ;;  %v714_v48 = vld [vmem:[%s5629_s18 + $0x3e8] sm:$0xff] }
  0xe6   : > { %v826_v0 = vsub.s32 %v696_v59, %v5639_v20  ;;  %v688_v59 = vld [vmem:[%s5629_s18 + $0x318] sm:$0xff] }
  0xe9   : > { %1025 = vperm.xlu1 %5119, %v778_v62   ;;  %1022 = vperm.xlu0 %5118, %v777_v63  }
  0xed   : > { %1019 = vperm.xlu1 %5119, %v776_v2   ;;  %1016 = vperm.xlu0 %5118, %v775_v3   ;;  %v662_v2 = vld [vmem:[%s5629_s18 + $0x248] sm:$0xff]  ;;  %v5836_v3 = vand.u32 127, %v586_v60  ;;  %v687_v60 = vld [vmem:[%s5629_s18 + $0x310] sm:$0xff] }
  0xf1   : > { %1013 = vperm.xlu1 %5119, %v774_v6   ;;  %1010 = vperm.xlu0 %5118, %v773_v7   ;;  %v792_v7 = vsub.s32 %v662_v2, %v5639_v20 }
  0xf5   : > { %1007 = vperm.xlu1 %5119, %v772_v10   ;;  %1004 = vperm.xlu0 %5118, %v771_v11   ;;  %v5843_v10 = vadd.s32 128, %v5836_v3  ;;  %v693_v11 = vld [vmem:[%s5629_s18 + $0x340] sm:$0xff] }
  0xf9   : > { %1001 = vperm.xlu1 %5119, %v770_v14   ;;  %998 = vperm.xlu0 %5118, %v769_v15   ;;  %v824_v14 = vsub.s32 %v694_v8, %v5639_v20  ;;  %v823_v15 = vsub.s32 %v693_v11, %v5639_v20  ;;  %v683_v11 = vld [vmem:[%s5629_s18 + $0x2f0] sm:$0xff] }
  0xfc   : > { %v5769_v23 = vpop.permute.xlu1 %854  ;;  %v5771_v24 = vpop.permute.xlu0 %848 }
  0xfd   : > { %995 = vperm.xlu1 %5119, %v768_v18   ;;  %992 = vperm.xlu0 %5118, %v767_v19   ;;  %v659_v18 = vld [vmem:[%s5629_s18 + $0x230] sm:$0xff] }
 0x100   : > { %v5783_v31 = vpop.permute.xlu1 %857  ;;  %v5785_v32 = vpop.permute.xlu0 %851 }
 0x101   : > { %1085 = vperm.xlu1 %5119, %v798_v25   ;;  %1082 = vperm.xlu0 %5118, %v797_v26   ;;  %v789_v25 = vsub.s32 %v659_v18, %v5639_v20  ;;  %v692_v26 = vld [vmem:[%s5629_s18 + $0x338] sm:$0xff]  ;;  %v715_v18 = vld [vmem:[%s5629_s18 + $0x3f0] sm:$0xff] }
 0x104   : > { %v5801_v41 = vpop.permute.xlu1 %863  ;;  %v5803_v42 = vpop.permute.xlu0 %860 }
 0x105   : > { %1181 = vperm.xlu1 %5119, %v830_v35   ;;  %1178 = vperm.xlu0 %5118, %v829_v36   ;;  %v822_v35 = vsub.s32 %v692_v26, %v5639_v20  ;;  %v821_v36 = vsub.s32 %v691_v27, %v5639_v20  ;;  %v846_v26 = vsub.s32 %v716_v16, %v5639_v20  ;;  %v675_v16 = vld [vmem:[%s5629_s18 + $0x2b0] sm:$0xff] }
 0x106   : > { %v845_v27 = vsub.s32 %v715_v18, %v5639_v20 }
 0x108   : > { %v5813_v49 = vpop.permute.xlu1 %869  ;;  %v5815_v50 = vpop.permute.xlu0 %866 }
 0x109   : > { %1079 = vperm.xlu1 %5119, %v796_v45   ;;  %1076 = vperm.xlu0 %5118, %v795_v46   ;;  %v788_v46 = vsub.s32 %v658_v37, %v5639_v20 }
 0x10c   : > { %v5821_v55 = vpop.permute.xlu1 %875  ;;  %v5823_v56 = vpop.permute.xlu0 %872 }
 0x10d   : > { %1175 = vperm.xlu1 %5119, %v828_v51   ;;  %1172 = vperm.xlu0 %5118, %v827_v52   ;;  %v689_v51 = vld [vmem:[%s5629_s18 + $0x320] sm:$0xff] }
 0x110   : > { %v5829_v62 = vpop.permute.xlu1 %881  ;;  %v5831_v63 = vpop.permute.xlu0 %878 }
 0x111   : > { %1073 = vperm.xlu1 %5119, %v794_v57   ;;  %1070 = vperm.xlu0 %5118, %v793_v58   ;;  %vm1254_vm11 = vcmp.eq.s32.totalorder %v5843_v10, %v5829_v62  ;;  %vm1252_vm12 = vcmp.eq.s32.totalorder %v5843_v10, %v5831_v63  ;;  %vm1253_vm14 = vcmp.eq.s32.totalorder %v5836_v3, %v5829_v62 }
 0x112   : > { %vm1251_vm15 = vcmp.eq.s32.totalorder %v5836_v3, %v5831_v63  ;;  %v818_v62 = vsub.s32 %v688_v59, %v5639_v20  ;;  %v817_v63 = vsub.s32 %v687_v60, %v5639_v20 }
 0x114   : > { %v888_v5 = vpop.permute.xlu1 %887  ;;  %v885_v6 = vpop.permute.xlu0 %884 }
 0x115   : > { %1169 = vperm.xlu1 %5119, %v826_v0   ;;  %1166 = vperm.xlu0 %5118, %v825_v1   ;;  %vm1258_vm4 = vcmp.eq.s32.totalorder %v5843_v10, %v888_v5  ;;  %vm1256_vm5 = vcmp.eq.s32.totalorder %v5843_v10, %v885_v6  ;;  %vm1257_vm8 = vcmp.eq.s32.totalorder %v5836_v3, %v888_v5  ;;  %v654_v0 = vld [vmem:[%s5629_s18 + $0x208] sm:$0xff]  ;;  %v653_v1 = vld [vmem:[%s5629_s18 + $0x200] sm:$0xff] }
 0x116   : > { %vm1255_vm9 = vcmp.eq.s32.totalorder %v5836_v3, %v885_v6  ;;  %vm4536_vm10 = vmpackc.low %vm1258_vm4, %vm1256_vm5  ;;  %vm1249_vm4 = vcmp.eq.s32.totalorder %v5836_v3, %v5821_v55  ;;  %vm1247_vm5 = vcmp.eq.s32.totalorder %v5836_v3, %v5823_v56  ;;  %v685_v5 = vld [vmem:[%s5629_s18 + $0x300] sm:$0xff] }
 0x117   : > { %vm4538_vm13 = vmpackc.low %vm1257_vm8, %vm1255_vm9  ;;  %vm1244_vm8 = vcmp.eq.s32.totalorder %v5843_v10, %v5815_v50  ;;  %v815_v8 = vsub.s32 %v685_v5, %v5639_v20 }
 0x118   : > { %v894_v12 = vpop.permute.xlu1 %893  ;;  %v891_v13 = vpop.permute.xlu0 %890  ;;  %vm4546_vm9 = vmpackc.low %vm1249_vm4, %vm1247_vm5  ;;  %vm1236_vm4 = vcmp.eq.s32.totalorder %v5843_v10, %v5769_v23 }
 0x119   : > { %1067 = vperm.xlu1 %5119, %v792_v7   ;;  %vm1260_vm0 = vcmp.eq.s32.totalorder %v5843_v10, %v891_v13  ;;  %vm1262_vm1 = vcmp.eq.s32.totalorder %v5843_v10, %v894_v12  ;;  %vm1259_vm2 = vcmp.eq.s32.totalorder %v5836_v3, %v891_v13  ;;  %vm1261_vm3 = vcmp.eq.s32.totalorder %v5836_v3, %v894_v12 }
 0x11a   : > { %1064 = vperm.xlu0 %5118, %v791_v9   ;;  %vm4532_vm6 = vmpackc.low %vm1262_vm1, %vm1260_vm0  ;;  %vm1250_vm1 = vcmp.eq.s32.totalorder %v5843_v10, %v5821_v55  ;;  %v655_v55 = vld [vmem:[%s5629_s18 + $0x210] sm:$0xff]  ;;  %v816_v7 = vsub.s32 %v686_v4, %v5639_v20  ;;  %v684_v9 = vld [vmem:[%s5629_s18 + $0x2f8] sm:$0xff] }
 0x11b   : > { %4533 = vmatprep.subr.msk.bf16.mxu0 %vm4532_vm6, %v5438_v17  ;;  %vm4534_vm7 = vmpackc.low %vm1261_vm3, %vm1259_vm2  ;;  %vm1248_vm2 = vcmp.eq.s32.totalorder %v5843_v10, %v5823_v56  ;;  %v677_v4 = vld [vmem:[%s5629_s18 + $0x2c0] sm:$0xff] }
 0x11c   : > { %v5859_v19 = vpop.permute.xlu1 %899  ;;  %v5861_v21 = vpop.permute.xlu0 %896  ;;  %4535 = vmatpush1.bf16.msk.msra.mxu0 %vm4534_vm7, %v5438_v17  ;;  %vm4540_vm0 = vmpackc.low %vm1254_vm11, %vm1252_vm12  ;;  %vm1246_vm7 = vcmp.eq.s32.totalorder %v5843_v10, %v5813_v49  ;;  %vm1243_vm11 = vcmp.eq.s32.totalorder %v5836_v3, %v5815_v50  ;;  %v656_v50 = vld [vmem:[%s5629_s18 + $0x218] sm:$0xff] }
 0x11d   : > { %1163 = vperm.xlu1 %5119, %v824_v14   ;;  %4537 = vmatprep.subr.msk.bf16.mxu0 %vm4536_vm10, %v5438_v17  ;;  %vm4542_vm3 = vmpackc.low %vm1253_vm14, %vm1251_vm15  ;;  %vm1245_vm10 = vcmp.eq.s32.totalorder %v5836_v3, %v5813_v49  ;;  %vm1240_vm14 = vcmp.eq.s32.totalorder %v5843_v10, %v5803_v42  ;;  %v819_v49 = vsub.s32 %v689_v51, %v5639_v20  ;;  %v713_v51 = vld [vmem:[%s5629_s18 + $0x3e0] sm:$0xff] }
 0x11e   : > { %1160 = vperm.xlu0 %5118, %v823_v15   ;;  %vm4544_vm6 = vmpackc.low %vm1250_vm1, %vm1248_vm2  ;;  %vm1239_vm1 = vcmp.eq.s32.totalorder %v5836_v3, %v5803_v42  ;;  %vm1238_vm2 = vcmp.eq.s32.totalorder %v5843_v10, %v5783_v31  ;;  %v786_v58 = vsub.s32 %v656_v50, %v5639_v20  ;;  %v785_v42 = vsub.s32 %v655_v55, %v5639_v20 }
 0x11f   : > { %vm4548_vm12 = vmpackc.low %vm1246_vm7, %vm1244_vm8  ;;  %vm1234_vm8 = vcmp.eq.s32.totalorder %v5843_v10, %v5785_v32  ;;  %v814_v14 = vsub.s32 %v684_v9, %v5639_v20  ;;  %v813_v15 = vsub.s32 %v683_v11, %v5639_v20  ;;  %v844_v50 = vsub.s32 %v714_v48, %v5639_v20  ;;  %v709_v9 = vld [vmem:[%s5629_s18 + $0x3c0] sm:$0xff] }
 0x120   : > { %v5881_v28 = vpop.permute.xlu1 %905  ;;  %v5883_v34 = vpop.permute.xlu0 %902  ;;  %4539 = vmatpush1.bf16.msk.msra.mxu0 %vm4538_vm13, %v5438_v17  ;;  %vm1242_vm13 = vcmp.eq.s32.totalorder %v5843_v10, %v5801_v41  ;;  %vm4550_vm15 = vmpackc.low %vm1245_vm10, %vm1243_vm11  ;;  %vm1233_vm10 = vcmp.eq.s32.totalorder %v5836_v3, %v5785_v32  ;;  %vm1232_vm11 = vcmp.eq.s32.totalorder %v5843_v10, %v5771_v24  ;;  %v843_v55 = vsub.s32 %v713_v51, %v5639_v20  ;;  %v673_v51 = vld [vmem:[%s5629_s18 + $0x2a0] sm:$0xff] }
 0x121   : > { %1061 = vperm.xlu1 %5119, %v790_v22   ;;  %4541 = vmatprep.subr.msk.bf16.mxu0 %vm4540_vm0, %v5438_v17  ;;  %vm1241_vm0 = vcmp.eq.s32.totalorder %v5836_v3, %v5801_v41  ;;  %vm4556_vm7 = vmpackc.low %vm1238_vm2, %vm1236_vm4 }
 0x122   : > { %1058 = vperm.xlu0 %5118, %v789_v25   ;;  %vm4554_vm5 = vmpackc.low %vm1241_vm0, %vm1239_vm1 }
 0x124   : > { %v5899_v44 = vpop.permute.xlu1 %911  ;;  %v5901_v45 = vpop.permute.xlu0 %908  ;;  %4543 = vmatpush1.bf16.msk.msra.mxu0 %vm4542_vm3, %v5438_v17  ;;  %vm4552_vm3 = vmpackc.low %vm1242_vm13, %vm1240_vm14  ;;  %vm1231_vm13 = vcmp.eq.s32.totalorder %v5836_v3, %v5771_v24  ;;  %v784_v24 = vsub.s32 %v654_v0, %v5639_v20  ;;  %v711_v0 = vld [vmem:[%s5629_s18 + $0x3d0] sm:$0xff] }
 0x125   : > { %1157 = vperm.xlu1 %5119, %v822_v35   ;;  %4545 = vmatprep.subr.msk.bf16.mxu0 %vm4544_vm6, %v5438_v17  ;;  %vm1237_vm6 = vcmp.eq.s32.totalorder %v5836_v3, %v5783_v31  ;;  %vm4560_vm14 = vmpackc.low %vm1234_vm8, %vm1232_vm11  ;;  %v783_v31 = vsub.s32 %v653_v1, %v5639_v20  ;;  %v682_v35 = vld [vmem:[%s5629_s18 + $0x2e8] sm:$0xff] }
 0x126   : > { %1154 = vperm.xlu0 %5118, %v821_v36   ;;  %vm4562_vm1 = vmpackc.low %vm1233_vm10, %vm1231_vm13  ;;  %v681_v36 = vld [vmem:[%s5629_s18 + $0x2e0] sm:$0xff] }
 0x128   : > { %v5917_v52 = vpop.permute.xlu1 %917  ;;  %v5919_v53 = vpop.permute.xlu0 %914  ;;  %4547 = vmatpush1.bf16.msk.msra.mxu0 %vm4546_vm9, %v5438_v17  ;;  %vm1235_vm9 = vcmp.eq.s32.totalorder %v5836_v3, %v5769_v23 }
 0x129   : > { %1055 = vperm.xlu1 %5119, %v788_v46   ;;  %4549 = vmatprep.subr.msk.bf16.mxu0 %vm4548_vm12, %v5438_v17  ;;  %vm4558_vm12 = vmpackc.low %vm1237_vm6, %vm1235_vm9  ;;  %v812_v46 = vsub.s32 %v682_v35, %v5639_v20 }
 0x12a   : > { %1052 = vperm.xlu0 %5118, %v787_v47   ;;  %v811_v47 = vsub.s32 %v681_v36, %v5639_v20 }
 0x12c   : > { %v5935_v56 = vpop.permute.xlu1 %923  ;;  %v5937_v57 = vpop.permute.xlu0 %920  ;;  %4551 = vmatpush1.bf16.msk.msra.mxu0 %vm4550_vm15, %v5438_v17 }
 0x12d   : > { %1151 = vperm.xlu1 %5119, %v820_v54   ;;  %4553 = vmatprep.subr.msk.bf16.mxu0 %vm4552_vm3, %v5438_v17 }
 0x12e   : > { %1148 = vperm.xlu0 %5118, %v819_v49  }
 0x130   : > { %v987_v41 = vpop.permute.xlu1 %986  ;;  %v5954_v61 = vpop.permute.xlu0 %926  ;;  %4555 = vmatpush1.bf16.msk.msra.mxu0 %vm4554_vm5, %v5438_v17 }
 0x131   : > { %1049 = vperm.xlu1 %5119, %v786_v58   ;;  %4557 = vmatprep.subr.msk.bf16.mxu0 %vm4556_vm7, %v5438_v17  ;;  %vm1324_vm15 = vcmp.eq.s32.totalorder %v5843_v10, %v987_v41  ;;  %vm1323_vm3 = vcmp.eq.s32.totalorder %v5836_v3, %v987_v41  ;;  %v680_v58 = vld [vmem:[%s5629_s18 + $0x2d8] sm:$0xff] }
 0x132   : > { %1046 = vperm.xlu0 %5118, %v785_v42   ;;  %v679_v42 = vld [vmem:[%s5629_s18 + $0x2d0] sm:$0xff]  ;;  %v810_v41 = vsub.s32 %v680_v58, %v5639_v20 }
 0x134   : > { %v981_v23 = vpop.permute.xlu1 %980  ;;  %v990_v2 = vpop.permute.xlu0 %989  ;;  %4559 = vmatpush1.bf16.msk.msra.mxu0 %vm4558_vm12, %v5438_v17 }
 0x135   : > { %1145 = vperm.xlu1 %5119, %v818_v62   ;;  %4561 = vmatprep.subr.msk.bf16.mxu0 %vm4560_vm14, %v5438_v17  ;;  %vm1326_vm0 = vcmp.eq.s32.totalorder %v5843_v10, %v990_v2  ;;  %vm1325_vm4 = vcmp.eq.s32.totalorder %v5836_v3, %v990_v2  ;;  %vm1320_vm6 = vcmp.eq.s32.totalorder %v5843_v10, %v981_v23 }
 0x136   : > { %1142 = vperm.xlu0 %5118, %v817_v63   ;;  %vm4596_vm2 = vmpackc.low %vm1326_vm0, %vm1324_vm15  ;;  %vm1319_vm9 = vcmp.eq.s32.totalorder %v5836_v3, %v981_v23  ;;  %v809_v62 = vsub.s32 %v679_v42, %v5639_v20  ;;  %v712_v63 = vld [vmem:[%s5629_s18 + $0x3d8] sm:$0xff] }
 0x137   : > { %4597 = vmatprep.subr.msk.bf16.mxu1 %vm4596_vm2, %v5438_v17  ;;  %vm4598_vm5 = vmpackc.low %vm1325_vm4, %vm1323_vm3  ;;  %v842_v2 = vsub.s32 %v712_v63, %v5639_v20 }
 0x138   : > { %v975_v6 = vpop.permute.xlu1 %974  ;;  %v984_v32 = vpop.permute.xlu0 %983  ;;  %4563 = vmatpush1.bf16.msk.msra.mxu0 %vm4562_vm1, %v5438_v17  ;;  %4599 = vmatpush1.bf16.msk.msra.mxu1 %vm4598_vm5, %v5438_v17 }
 0x139   : > { %vm1321_vm7 = vcmp.eq.s32.totalorder %v5836_v3, %v984_v32  ;;  %vm1322_vm8 = vcmp.eq.s32.totalorder %v5843_v10, %v984_v32  ;;  %1043 = vperm.xlu1 %5119, %v784_v24   ;;  %vm1316_vm12 = vcmp.eq.s32.totalorder %v5843_v10, %v975_v6  ;;  %vm1315_vm15 = vcmp.eq.s32.totalorder %v5836_v3, %v975_v6 }
 0x13a   : > { %vm4600_vm10 = vmpackc.low %vm1322_vm8, %vm1320_vm6  ;;  %1040 = vperm.xlu0 %5118, %v783_v31   ;;  %v841_v24 = vsub.s32 %v711_v0, %v5639_v20  ;;  %v678_v31 = vld [vmem:[%s5629_s18 + $0x2c8] sm:$0xff] }
 0x13b   : > { %vm4602_vm11 = vmpackc.low %vm1321_vm7, %vm1319_vm9  ;;  %4601 = vmatprep.subr.msk.bf16.mxu1 %vm4600_vm10, %v5438_v17  ;;  %v808_v32 = vsub.s32 %v678_v31, %v5639_v20 }
 0x13c   : > { %v969_v12 = vpop.permute.xlu1 %968  ;;  %v978_v13 = vpop.permute.xlu0 %977  ;;  %4603 = vmatpush1.bf16.msk.msra.mxu1 %vm4602_vm11, %v5438_v17 }
 0x13d   : > { %vm1317_vm13 = vcmp.eq.s32.totalorder %v5836_v3, %v978_v13  ;;  %vm1318_vm14 = vcmp.eq.s32.totalorder %v5843_v10, %v978_v13  ;;  %1139 = vperm.xlu1 %5119, %v816_v7   ;;  %vm1312_vm2 = vcmp.eq.s32.totalorder %v5843_v10, %v969_v12  ;;  %vm1311_vm5 = vcmp.eq.s32.totalorder %v5836_v3, %v969_v12 }
 0x13e   : > { %vm4604_vm0 = vmpackc.low %vm1318_vm14, %vm1316_vm12  ;;  %1136 = vperm.xlu0 %5118, %v815_v8   ;;  %v807_v7 = vsub.s32 %v677_v4, %v5639_v20  ;;  %v710_v8 = vld [vmem:[%s5629_s18 + $0x3c8] sm:$0xff] }
 0x13f   : > { %vm4606_vm1 = vmpackc.low %vm1317_vm13, %vm1315_vm15  ;;  %4605 = vmatprep.subr.msk.bf16.mxu1 %vm4604_vm0, %v5438_v17  ;;  %v840_v13 = vsub.s32 %v710_v8, %v5639_v20 }
 0x140   : > { %v963_v22 = vpop.permute.xlu1 %962  ;;  %v972_v25 = vpop.permute.xlu0 %971  ;;  %4607 = vmatpush1.bf16.msk.msra.mxu1 %vm4606_vm1, %v5438_v17 }
 0x141   : > { %vm1313_vm3 = vcmp.eq.s32.totalorder %v5836_v3, %v972_v25  ;;  %vm1314_vm4 = vcmp.eq.s32.totalorder %v5843_v10, %v972_v25  ;;  %1133 = vperm.xlu1 %5119, %v814_v14   ;;  %vm1308_vm8 = vcmp.eq.s32.totalorder %v5843_v10, %v963_v22  ;;  %vm1307_vm11 = vcmp.eq.s32.totalorder %v5836_v3, %v963_v22  ;;  %v676_v14 = vld [vmem:[%s5629_s18 + $0x2b8] sm:$0xff] }
 0x142   : > { %vm4608_vm6 = vmpackc.low %vm1314_vm4, %vm1312_vm2  ;;  %1130 = vperm.xlu0 %5118, %v813_v15   ;;  %v839_v15 = vsub.s32 %v709_v9, %v5639_v20  ;;  %v806_v25 = vsub.s32 %v676_v14, %v5639_v20  ;;  %v669_v9 = vld [vmem:[%s5629_s18 + $0x280] sm:$0xff] }
 0x143   : > { %vm4610_vm7 = vmpackc.low %vm1313_vm3, %vm1311_vm5  ;;  %4609 = vmatprep.subr.msk.bf16.mxu1 %vm4608_vm6, %v5438_v17 }
 0x144   : > { %v957_v37 = vpop.permute.xlu1 %956  ;;  %v966_v38 = vpop.permute.xlu0 %965  ;;  %4611 = vmatpush1.bf16.msk.msra.mxu1 %vm4610_vm7, %v5438_v17 }
 0x145   : > { %vm1309_vm9 = vcmp.eq.s32.totalorder %v5836_v3, %v966_v38  ;;  %vm1310_vm10 = vcmp.eq.s32.totalorder %v5843_v10, %v966_v38  ;;  %1229 = vperm.xlu1 %5119, %v846_v26   ;;  %vm1304_vm14 = vcmp.eq.s32.totalorder %v5843_v10, %v957_v37  ;;  %vm1303_vm1 = vcmp.eq.s32.totalorder %v5836_v3, %v957_v37  ;;  %v707_v37 = vld [vmem:[%s5629_s18 + $0x3b0] sm:$0xff] }
 0x146   : > { %vm4612_vm12 = vmpackc.low %vm1310_vm10, %vm1308_vm8  ;;  %1226 = vperm.xlu0 %5118, %v845_v27   ;;  %v805_v26 = vsub.s32 %v675_v16, %v5639_v20  ;;  %v708_v27 = vld [vmem:[%s5629_s18 + $0x3b8] sm:$0xff] }
 0x147   : > { %vm4614_vm13 = vmpackc.low %vm1309_vm9, %vm1307_vm11  ;;  %4613 = vmatprep.subr.msk.bf16.mxu1 %vm4612_vm12, %v5438_v17 }
 0x148   : > { %v951_v54 = vpop.permute.xlu1 %950  ;;  %v960_v49 = vpop.permute.xlu0 %959  ;;  %4615 = vmatpush1.bf16.msk.msra.mxu1 %vm4614_vm13, %v5438_v17 }
 0x149   : > { %vm1305_vm15 = vcmp.eq.s32.totalorder %v5836_v3, %v960_v49  ;;  %vm1306_vm0 = vcmp.eq.s32.totalorder %v5843_v10, %v960_v49  ;;  %1127 = vperm.xlu1 %5119, %v812_v46   ;;  %vm1300_vm4 = vcmp.eq.s32.totalorder %v5843_v10, %v951_v54  ;;  %vm1299_vm7 = vcmp.eq.s32.totalorder %v5836_v3, %v951_v54 }
 0x14a   : > { %vm4616_vm2 = vmpackc.low %vm1306_vm0, %vm1304_vm14  ;;  %1124 = vperm.xlu0 %5118, %v811_v47   ;;  %v838_v47 = vsub.s32 %v708_v27, %v5639_v20 }
 0x14b   : > { %vm4618_vm3 = vmpackc.low %vm1305_vm15, %vm1303_vm1  ;;  %4617 = vmatprep.subr.msk.bf16.mxu1 %vm4616_vm2, %v5438_v17 }
 0x14c   : > { %v945_v59 = vpop.permute.xlu1 %944  ;;  %v954_v60 = vpop.permute.xlu0 %953  ;;  %4619 = vmatpush1.bf16.msk.msra.mxu1 %vm4618_vm3, %v5438_v17 }
 0x14d   : > { %vm1301_vm5 = vcmp.eq.s32.totalorder %v5836_v3, %v954_v60  ;;  %vm1302_vm6 = vcmp.eq.s32.totalorder %v5843_v10, %v954_v60  ;;  %1223 = vperm.xlu1 %5119, %v844_v50   ;;  %vm1296_vm10 = vcmp.eq.s32.totalorder %v5843_v10, %v945_v59  ;;  %vm1295_vm13 = vcmp.eq.s32.totalorder %v5836_v3, %v945_v59  ;;  %v705_v59 = vld [vmem:[%s5629_s18 + $0x3a0] sm:$0xff] }
 0x14e   : > { %vm4620_vm8 = vmpackc.low %vm1302_vm6, %vm1300_vm4  ;;  %1220 = vperm.xlu0 %5118, %v843_v55   ;;  %v803_v50 = vsub.s32 %v673_v51, %v5639_v20  ;;  %v706_v55 = vld [vmem:[%s5629_s18 + $0x3a8] sm:$0xff] }
 0x14f   : > { %vm4622_vm9 = vmpackc.low %vm1301_vm5, %vm1299_vm7  ;;  %4621 = vmatprep.subr.msk.bf16.mxu1 %vm4620_vm8, %v5438_v17 }
 0x150   : > { %v939_v1 = vpop.permute.xlu1 %938  ;;  %v948_v23 = vpop.permute.xlu0 %947  ;;  %4623 = vmatpush1.bf16.msk.msra.mxu1 %vm4622_vm9, %v5438_v17 }
 0x151   : > { %vm1297_vm11 = vcmp.eq.s32.totalorder %v5836_v3, %v948_v23  ;;  %vm1298_vm12 = vcmp.eq.s32.totalorder %v5843_v10, %v948_v23  ;;  %1121 = vperm.xlu1 %5119, %v810_v41   ;;  %vm1292_vm0 = vcmp.eq.s32.totalorder %v5843_v10, %v939_v1  ;;  %vm1291_vm3 = vcmp.eq.s32.totalorder %v5836_v3, %v939_v1  ;;  %v671_v1 = vld [vmem:[%s5629_s18 + $0x290] sm:$0xff] }
 0x152   : > { %vm4624_vm14 = vmpackc.low %vm1298_vm12, %vm1296_vm10  ;;  %1118 = vperm.xlu0 %5118, %v809_v62   ;;  %vm1282_vm12 = vcmp.eq.s32.totalorder %v5843_v10, %v5935_v56  ;;  %v835_v41 = vsub.s32 %v705_v59, %v5639_v20  ;;  %v672_v62 = vld [vmem:[%s5629_s18 + $0x298] sm:$0xff] }
 0x153   : > { %vm4626_vm15 = vmpackc.low %vm1297_vm11, %vm1295_vm13  ;;  %4625 = vmatprep.subr.msk.bf16.mxu1 %vm4624_vm14, %v5438_v17  ;;  %vm1280_vm13 = vcmp.eq.s32.totalorder %v5843_v10, %v5937_v57 }
 0x154   : > { %v1035_v5 = vpop.permute.xlu1 %1034  ;;  %v942_v6 = vpop.permute.xlu0 %941  ;;  %4627 = vmatpush1.bf16.msk.msra.mxu1 %vm4626_vm15, %v5438_v17 }
 0x155   : > { %vm1293_vm1 = vcmp.eq.s32.totalorder %v5836_v3, %v942_v6  ;;  %vm1294_vm2 = vcmp.eq.s32.totalorder %v5843_v10, %v942_v6  ;;  %1217 = vperm.xlu1 %5119, %v842_v2   ;;  %vm1356_vm6 = vcmp.eq.s32.totalorder %v5843_v10, %v1035_v5  ;;  %vm1355_vm9 = vcmp.eq.s32.totalorder %v5836_v3, %v1035_v5  ;;  %v703_v5 = vld [vmem:[%s5629_s18 + $0x390] sm:$0xff] }
 0x156   : > { %vm4564_vm4 = vmpackc.low %vm1294_vm2, %vm1292_vm0  ;;  %1214 = vperm.xlu0 %5118, %v841_v24   ;;  %vm1279_vm2 = vcmp.eq.s32.totalorder %v5836_v3, %v5937_v57  ;;  %v674_v57 = vld [vmem:[%s5629_s18 + $0x2a8] sm:$0xff]  ;;  %v801_v2 = vsub.s32 %v671_v1, %v5639_v20  ;;  %v704_v24 = vld [vmem:[%s5629_s18 + $0x398] sm:$0xff] }
 0x157   : > { %vm4566_vm5 = vmpackc.low %vm1293_vm1, %vm1291_vm3  ;;  %4565 = vmatprep.subr.msk.bf16.mxu0 %vm4564_vm4, %v5438_v17  ;;  %vm1281_vm1 = vcmp.eq.s32.totalorder %v5836_v3, %v5935_v56  ;;  %v837_v56 = vsub.s32 %v707_v37, %v5639_v20  ;;  %v804_v54 = vsub.s32 %v674_v57, %v5639_v20  ;;  %v834_v6 = vsub.s32 %v704_v24, %v5639_v20 }
 0x158   : > { %v933_v11 = vpop.permute.xlu1 %932  ;;  %v1038_v12 = vpop.permute.xlu0 %1037  ;;  %4567 = vmatpush2.bf16.msk.msra.mxu0 %vm4566_vm5, %v5438_v17 }
 0x159   : > { %vm1357_vm7 = vcmp.eq.s32.totalorder %v5836_v3, %v1038_v12  ;;  %vm1358_vm8 = vcmp.eq.s32.totalorder %v5843_v10, %v1038_v12  ;;  %1115 = vperm.xlu1 %5119, %v808_v32   ;;  %vm1288_vm14 = vcmp.eq.s32.totalorder %v5843_v10, %v933_v11  ;;  %vm1287_vm3 = vcmp.eq.s32.totalorder %v5836_v3, %v933_v11  ;;  %v670_v32 = vld [vmem:[%s5629_s18 + $0x288] sm:$0xff]  ;;  %v6318_v11 = vld [vmem:[%s5631_s26 + $0x40] sm:$0xff] }
 0x15a   : > { %vm4628_vm10 = vmpackc.low %vm1358_vm8, %vm1356_vm6  ;;  %1112 = vperm.xlu0 %5118, %v807_v7   ;;  %v2147_v12 = vld [vmem:[%s5631_s26 + $0x60] sm:$0xff] }
 0x15b   : > { %vm4630_vm11 = vmpackc.low %vm1357_vm7, %vm1355_vm9  ;;  %4629 = vmatprep.subr.msk.bf16.mxu1 %vm4628_vm10, %v5438_v17  ;;  %vm1284_vm7 = vcmp.eq.s32.totalorder %v5843_v10, %v5954_v61  ;;  %v4525_v16 = vcombine.high %v6318_v11, %v2147_v12  ;;  %v4524_v46 = vcombine.low %v6318_v11, %v2147_v12 }
 0x15c   : > { %v1029_v18 = vpop.permute.xlu1 %1028  ;;  %v936_v22 = vpop.permute.xlu0 %935  ;;  %4631 = vmatpush2.bf16.msk.msra.mxu1 %vm4630_vm11, %v5438_v17  ;;  %vm6111_vm6 = vmpackc.low %vm1282_vm12, %vm1280_vm13  ;;  %vm1283_vm12 = vcmp.eq.s32.totalorder %v5836_v3, %v5954_v61 }
 0x15d   : > { %vm1289_vm15 = vcmp.eq.s32.totalorder %v5836_v3, %v936_v22  ;;  %vm1290_vm0 = vcmp.eq.s32.totalorder %v5843_v10, %v936_v22  ;;  %1211 = vperm.xlu1 %5119, %v840_v13   ;;  %vm6126_vm11 = vmpackc.low %vm1281_vm1, %vm1279_vm2  ;;  %vm1278_vm1 = vcmp.eq.s32.totalorder %v5843_v10, %v5917_v52  ;;  %vm1276_vm2 = vcmp.eq.s32.totalorder %v5843_v10, %v5919_v53 }
 0x15e   : > { %vm4568_vm4 = vmpackc.low %vm1290_vm0, %vm1288_vm14  ;;  %1208 = vperm.xlu0 %5118, %v839_v15   ;;  %v800_v13 = vsub.s32 %v670_v32, %v5639_v20  ;;  %v701_v15 = vld [vmem:[%s5629_s18 + $0x380] sm:$0xff] }
 0x15f   : > { %vm4570_vm5 = vmpackc.low %vm1289_vm15, %vm1287_vm3  ;;  %4569 = vmatprep.subr.msk.bf16.mxu0 %vm4568_vm4, %v5438_v17  ;;  %vm1352_vm15 = vcmp.eq.s32.totalorder %v5843_v10, %v1029_v18  ;;  %vm1351_vm3 = vcmp.eq.s32.totalorder %v5836_v3, %v1029_v18  ;;  %v831_v27 = vsub.s32 %v701_v15, %v5639_v20 }
 0x160   : > { %v930_v35 = vpop.permute.xlu1 %929  ;;  %v1032_v36 = vpop.permute.xlu0 %1031  ;;  %4571 = vmatpush2.bf16.msk.msra.mxu0 %vm4570_vm5, %v5438_v17 }
 0x161   : > { %vm1285_vm8 = vcmp.eq.s32.totalorder %v5836_v3, %v930_v35  ;;  %vm1286_vm9 = vcmp.eq.s32.totalorder %v5843_v10, %v930_v35  ;;  %vm1354_vm10 = vcmp.eq.s32.totalorder %v5843_v10, %v1032_v36  ;;  %1109 = vperm.xlu1 %5119, %v806_v25   ;;  %vm1353_vm14 = vcmp.eq.s32.totalorder %v5836_v3, %v1032_v36  ;;  %v6338_v25 = vld [vmem:[%s5631_s26 + $0x10] sm:$0xff]  ;;  %v2144_v35 = vld [vmem:[%s5631_s26 + $0x48] sm:$0xff] }
 0x162   : > { %vm4572_vm13 = vmpackc.low %vm1286_vm9, %vm1284_vm7  ;;  %1106 = vperm.xlu0 %5118, %v805_v26   ;;  %v6341_v26 = vld [vmem:[%s5631_s26 + $0x30] sm:$0xff]  ;;  %v2148_v36 = vld [vmem:[%s5631_s26 + $0x68] sm:$0xff] }
 0x163   : > { %vm4574_vm0 = vmpackc.low %vm1285_vm8, %vm1283_vm12  ;;  %4573 = vmatprep.subr.msk.bf16.mxu0 %vm4572_vm13, %v5438_v17  ;;  %vm1275_vm13 = vcmp.eq.s32.totalorder %v5836_v3, %v5919_v53  ;;  %v836_v53 = vsub.s32 %v706_v55, %v5639_v20  ;;  %v4520_v38 = vcombine.low %v6338_v25, %v6341_v26  ;;  %v4527_v29 = vcombine.high %v2144_v35, %v2148_v36 }
 0x164   : > { %vm4632_vm4 = vmpackc.low %vm1354_vm10, %vm1352_vm15  ;;  %v1026_v61 = vpop.permute.xlu1 %1025  ;;  %v1023_v48 = vpop.permute.xlu0 %1022  ;;  %4575 = vmatpush2.bf16.msk.msra.mxu0 %vm4574_vm0, %v5438_v17  ;;  %vm1277_vm10 = vcmp.eq.s32.totalorder %v5836_v3, %v5917_v52  ;;  %vm1274_vm0 = vcmp.eq.s32.totalorder %v5843_v10, %v5899_v44  ;;  %v4521_v57 = vcombine.high %v6338_v25, %v6341_v26  ;;  %v4526_v39 = vcombine.low %v2144_v35, %v2148_v36 }
 0x165   : > { %vm4634_vm5 = vmpackc.low %vm1353_vm14, %vm1351_vm3  ;;  %4633 = vmatprep.subr.msk.bf16.mxu1 %vm4632_vm4, %v5438_v17  ;;  %vm1349_vm7 = vcmp.eq.s32.totalorder %v5836_v3, %v1026_v61  ;;  %vm1350_vm8 = vcmp.eq.s32.totalorder %v5843_v10, %v1026_v61  ;;  %vm1347_vm9 = vcmp.eq.s32.totalorder %v5836_v3, %v1023_v48  ;;  %vm1348_vm12 = vcmp.eq.s32.totalorder %v5843_v10, %v1023_v48 }
 0x166   : > { %vm4636_vm15 = vmpackc.low %vm1350_vm8, %vm1348_vm12  ;;  %4635 = vmatpush2.bf16.msk.msra.mxu1 %vm4634_vm5, %v5438_v17  ;;  %1205 = vperm.xlu1 %5119, %v838_v47   ;;  %vm1272_vm3 = vcmp.eq.s32.totalorder %v5843_v10, %v5901_v45 }
 0x167   : > { %vm6160_vm14 = vmpackc.low %vm1349_vm7, %vm1347_vm9  ;;  %1202 = vperm.xlu0 %5118, %v837_v56   ;;  %4577 = vmatprep.subr.msk.bf16.mxu0 %vm6111_vm6, %v5438_v17 }
 0x168   : > { %4637 = vmatprep.subr.msk.bf16.mxu1 %vm4636_vm15, %v5438_v17  ;;  %v1020_v58 = vpop.permute.xlu1 %1019  ;;  %v1017_v42 = vpop.permute.xlu0 %1016  ;;  %4579 = vmatpush2.bf16.msk.msra.mxu0 %vm6126_vm11, %v5438_v17  ;;  %vm4580_vm6 = vmpackc.low %vm1278_vm1, %vm1276_vm2  ;;  %vm1273_vm1 = vcmp.eq.s32.totalorder %v5836_v3, %v5899_v44  ;;  %vm1271_vm2 = vcmp.eq.s32.totalorder %v5836_v3, %v5901_v45  ;;  %v802_v45 = vsub.s32 %v672_v62, %v5639_v20 }
 0x169   : > { %vm1345_vm4 = vcmp.eq.s32.totalorder %v5836_v3, %v1020_v58  ;;  %vm1346_vm5 = vcmp.eq.s32.totalorder %v5843_v10, %v1020_v58  ;;  %vm1343_vm7 = vcmp.eq.s32.totalorder %v5836_v3, %v1017_v42  ;;  %vm1344_vm8 = vcmp.eq.s32.totalorder %v5843_v10, %v1017_v42  ;;  %4581 = vmatprep.subr.msk.bf16.mxu0 %vm4580_vm6, %v5438_v17  ;;  %vm6195_vm11 = vmpackc.low %vm1277_vm10, %vm1275_vm13 }
 0x16a   : > { %vm4640_vm9 = vmpackc.low %vm1346_vm5, %vm1344_vm8  ;;  %4639 = vmatpush2.bf16.msk.msra.mxu1 %vm6160_vm14, %v5438_v17  ;;  %1103 = vperm.xlu1 %5119, %v804_v54   ;;  %vm1270_vm10 = vcmp.eq.s32.totalorder %v5843_v10, %v5881_v28  ;;  %vm1268_vm13 = vcmp.eq.s32.totalorder %v5843_v10, %v5883_v34 }
 0x16b   : > { %vm6207_vm12 = vmpackc.low %vm1345_vm4, %vm1343_vm7  ;;  %1100 = vperm.xlu0 %5118, %v803_v50   ;;  %4641 = vmatprep.subr.msk.bf16.mxu1 %vm4640_vm9, %v5438_v17 }
 0x16c   : > { %v1014_v63 = vpop.permute.xlu1 %1013  ;;  %v1011_v0 = vpop.permute.xlu0 %1010  ;;  %4583 = vmatpush2.bf16.msk.msra.mxu0 %vm6195_vm11, %v5438_v17  ;;  %vm4584_vm15 = vmpackc.low %vm1274_vm0, %vm1272_vm3  ;;  %vm1269_vm0 = vcmp.eq.s32.totalorder %v5836_v3, %v5881_v28  ;;  %vm1267_vm3 = vcmp.eq.s32.totalorder %v5836_v3, %v5883_v34  ;;  %v833_v28 = vsub.s32 %v703_v5, %v5639_v20 }
 0x16d   : > { %vm1341_vm14 = vcmp.eq.s32.totalorder %v5836_v3, %v1014_v63  ;;  %vm1342_vm6 = vcmp.eq.s32.totalorder %v5843_v10, %v1014_v63  ;;  %vm1339_vm4 = vcmp.eq.s32.totalorder %v5836_v3, %v1011_v0  ;;  %vm1340_vm5 = vcmp.eq.s32.totalorder %v5843_v10, %v1011_v0  ;;  %4585 = vmatprep.subr.msk.bf16.mxu0 %vm4584_vm15, %v5438_v17  ;;  %vm6239_vm7 = vmpackc.low %vm1273_vm1, %vm1271_vm2 }
 0x16e   : > { %vm4644_vm8 = vmpackc.low %vm1342_vm6, %vm1340_vm5  ;;  %4643 = vmatpush2.bf16.msk.msra.mxu1 %vm6207_vm12, %v5438_v17  ;;  %1199 = vperm.xlu1 %5119, %v836_v53   ;;  %vm1266_vm1 = vcmp.eq.s32.totalorder %v5843_v10, %v5859_v19  ;;  %vm1264_vm2 = vcmp.eq.s32.totalorder %v5843_v10, %v5861_v21 }
 0x16f   : > { %vm6251_vm11 = vmpackc.low %vm1341_vm14, %vm1339_vm4  ;;  %1196 = vperm.xlu0 %5118, %v835_v41   ;;  %4645 = vmatprep.subr.msk.bf16.mxu1 %vm4644_vm8, %v5438_v17 }
 0x170   : > { %v1008_v31 = vpop.permute.xlu1 %1007  ;;  %v1005_v4 = vpop.permute.xlu0 %1004  ;;  %4587 = vmatpush2.bf16.msk.msra.mxu0 %vm6239_vm7, %v5438_v17  ;;  %vm4588_vm9 = vmpackc.low %vm1270_vm10, %vm1268_vm13  ;;  %vm1265_vm10 = vcmp.eq.s32.totalorder %v5836_v3, %v5859_v19  ;;  %vm1263_vm13 = vcmp.eq.s32.totalorder %v5836_v3, %v5861_v21  ;;  %v799_v19 = vsub.s32 %v669_v9, %v5639_v20  ;;  %v702_v21 = vld [vmem:[%s5629_s18 + $0x388] sm:$0xff] }
 0x171   : > { %vm1337_vm12 = vcmp.eq.s32.totalorder %v5836_v3, %v1008_v31  ;;  %vm1338_vm15 = vcmp.eq.s32.totalorder %v5843_v10, %v1008_v31  ;;  %vm1335_vm14 = vcmp.eq.s32.totalorder %v5836_v3, %v1005_v4  ;;  %vm1336_vm6 = vcmp.eq.s32.totalorder %v5843_v10, %v1005_v4  ;;  %4589 = vmatprep.subr.msk.bf16.mxu0 %vm4588_vm9, %v5438_v17  ;;  %vm4590_vm4 = vmpackc.low %vm1269_vm0, %vm1267_vm3 }
 0x172   : > { %vm4648_vm5 = vmpackc.low %vm1338_vm15, %vm1336_vm6  ;;  %4647 = vmatpush2.bf16.msk.msra.mxu1 %vm6251_vm11, %v5438_v17  ;;  %1097 = vperm.xlu1 %5119, %v802_v45   ;;  %v832_v22 = vsub.s32 %v702_v21, %v5639_v20 }
 0x173   : > { %vm6291_vm7 = vmpackc.low %vm1337_vm12, %vm1335_vm14  ;;  %1094 = vperm.xlu0 %5118, %v801_v2   ;;  %4649 = vmatprep.subr.msk.bf16.mxu1 %vm4648_vm5, %v5438_v17 }
 0x174   : > { %v1002_v7 = vpop.permute.xlu1 %1001  ;;  %v999_v8 = vpop.permute.xlu0 %998  ;;  %4591 = vmatpush2.bf16.msk.msra.mxu0 %vm4590_vm4, %v5438_v17  ;;  %vm4592_vm0 = vmpackc.low %vm1266_vm1, %vm1264_vm2 }
 0x175   : > { %vm1333_vm3 = vcmp.eq.s32.totalorder %v5836_v3, %v1002_v7  ;;  %vm1334_vm8 = vcmp.eq.s32.totalorder %v5843_v10, %v1002_v7  ;;  %vm1331_vm11 = vcmp.eq.s32.totalorder %v5836_v3, %v999_v8  ;;  %vm1332_vm9 = vcmp.eq.s32.totalorder %v5843_v10, %v999_v8  ;;  %4593 = vmatprep.subr.msk.bf16.mxu0 %vm4592_vm0, %v5438_v17  ;;  %vm4594_vm1 = vmpackc.low %vm1265_vm10, %vm1263_vm13 }
 0x176   : > { %vm4652_vm2 = vmpackc.low %vm1334_vm8, %vm1332_vm9  ;;  %4651 = vmatpush2.bf16.msk.msra.mxu1 %vm6291_vm7, %v5438_v17  ;;  %1193 = vperm.xlu1 %5119, %v834_v6  }
 0x177   : > { %vm4654_vm12 = vmpackc.low %vm1333_vm3, %vm1331_vm11  ;;  %1190 = vperm.xlu0 %5118, %v833_v28   ;;  %4653 = vmatprep.subr.msk.bf16.mxu1 %vm4652_vm2, %v5438_v17 }
 0x178   : > { %v996_v14 = vpop.permute.xlu1 %995  ;;  %4595 = vmatpush2.bf16.msk.msra.mxu0 %vm4594_vm1, %v5438_v17  ;;  %v993_v18 = vpop.permute.xlu0 %992 }
 0x179   : > { %vm1329_vm15 = vcmp.eq.s32.totalorder %v5836_v3, %v996_v14  ;;  %vm1330_vm14 = vcmp.eq.s32.totalorder %v5843_v10, %v996_v14  ;;  %vm1327_vm6 = vcmp.eq.s32.totalorder %v5836_v3, %v993_v18  ;;  %vm1328_vm4 = vcmp.eq.s32.totalorder %v5843_v10, %v993_v18 }
 0x17a   : > { %4655 = vmatpush2.bf16.msk.msra.mxu1 %vm4654_vm12, %v5438_v17  ;;  %1091 = vperm.xlu1 %5119, %v800_v13   ;;  %vm4656_vm10 = vmpackc.low %vm1330_vm14, %vm1328_vm4 }
 0x17b   : > { %1088 = vperm.xlu0 %5118, %v799_v19   ;;  %2264 = vmatmul.mubr.bf16.vlgmr.msra.gmra.mxu0 %v4516_v33  ;;  %vm4658_vm13 = vmpackc.low %vm1329_vm15, %vm1327_vm6  ;;  %v6363_v33 = vld [vmem:[%s5631_s26 + $0x38] sm:$0xff] }
 0x17c   : > { %4657 = vmatprep.subr.msk.bf16.mxu1 %vm4656_vm10, %v5438_v17  ;;  %v1086_v37 = vpop.permute.xlu1 %1085  ;;  %2273 = vmatprep.mubr.bf16.mxu0 %v4525_v16  ;;  %v1083_v20 = vpop.permute.xlu0 %1082  ;;  %v4522_v47 = vcombine.low %v6360_v30, %v6363_v33  ;;  %v4523_v40 = vcombine.high %v6360_v30, %v6363_v33 }
 0x17d   : > { %vm1389_vm5 = vcmp.eq.s32.totalorder %v5836_v3, %v1086_v37  ;;  %vm1390_vm7 = vcmp.eq.s32.totalorder %v5843_v10, %v1086_v37  ;;  %vm1387_vm0 = vcmp.eq.s32.totalorder %v5836_v3, %v1083_v20  ;;  %vm1388_vm3 = vcmp.eq.s32.totalorder %v5843_v10, %v1083_v20 }
 0x17e   : > { %4659 = vmatpush2.bf16.msk.msra.mxu1 %vm4658_vm13, %v5438_v17  ;;  %1187 = vperm.xlu1 %5119, %v832_v22   ;;  %vm4660_vm8 = vmpackc.low %vm1390_vm7, %vm1388_vm3 }
 0x17f   : > { %1184 = vperm.xlu0 %5118, %v831_v27   ;;  %vm4662_vm11 = vmpackc.low %vm1389_vm5, %vm1387_vm0  ;;  %4661 = vmatprep.subr.msk.bf16.mxu0 %vm4660_vm8, %v5438_v17 }
 0x180   : > { %v1182_v56 = vpop.permute.xlu1 %1181  ;;  %v1179_v61 = vpop.permute.xlu0 %1178  ;;  %4663 = vmatpush1.bf16.msk.msra.mxu0 %vm4662_vm11, %v5438_v17 }
 0x181   : > { %vm1453_vm9 = vcmp.eq.s32.totalorder %v5836_v3, %v1182_v56  ;;  %vm1454_vm1 = vcmp.eq.s32.totalorder %v5843_v10, %v1182_v56  ;;  %2317 = vmatmul.mubr.bf16.vlgmr.msra.gmra.mxu1 %v4518_v43  ;;  %vm1451_vm2 = vcmp.eq.s32.totalorder %v5836_v3, %v1179_v61  ;;  %vm1452_vm12 = vcmp.eq.s32.totalorder %v5843_v10, %v1179_v61 }
 0x182   : > { %2326 = vmatprep.mubr.bf16.mxu1 %v4527_v29  ;;  %vm4724_vm15 = vmpackc.low %vm1454_vm1, %vm1452_vm12 }
 0x183   : > { %2274 = vmatmul.mubr.bf16.gmra.mxu0 %v4524_v46  ;;  %vm4726_vm14 = vmpackc.low %vm1453_vm9, %vm1451_vm2  ;;  %4725 = vmatprep.subr.msk.bf16.mxu1 %vm4724_vm15, %v5438_v17 }
 0x184   : > { %v1080_v48 = vpop.permute.xlu1 %1079  ;;  %2369 = vmatprep.mubr.bf16.mxu0 %v4521_v57  ;;  %v1077_v51 = vpop.permute.xlu0 %1076  ;;  %4727 = vmatpush1.bf16.msk.msra.mxu1 %vm4726_vm14, %v5438_v17 }
 0x185   : > { %vm1385_vm6 = vcmp.eq.s32.totalorder %v5836_v3, %v1080_v48  ;;  %vm1386_vm4 = vcmp.eq.s32.totalorder %v5843_v10, %v1080_v48  ;;  %vm1383_vm10 = vcmp.eq.s32.totalorder %v5836_v3, %v1077_v51  ;;  %vm1384_vm13 = vcmp.eq.s32.totalorder %v5843_v10, %v1077_v51 }
 0x186   : > { %vm4664_vm5 = vmpackc.low %vm1386_vm4, %vm1384_vm13 }
 0x187   : > { %vm4666_vm7 = vmpackc.low %vm1385_vm6, %vm1383_vm10  ;;  %4665 = vmatprep.subr.msk.bf16.mxu0 %vm4664_vm5, %v5438_v17 }
 0x188   : > { %v1176_v43 = vpop.permute.xlu1 %1175  ;;  %v1173_v54 = vpop.permute.xlu0 %1172  ;;  %4667 = vmatpush1.bf16.msk.msra.mxu0 %vm4666_vm7, %v5438_v17 }
 0x189   : > { %vm1449_vm0 = vcmp.eq.s32.totalorder %v5836_v3, %v1176_v43  ;;  %vm1450_vm3 = vcmp.eq.s32.totalorder %v5843_v10, %v1176_v43  ;;  %2327 = vmatmul.mubr.bf16.gmra.mxu1 %v4526_v39  ;;  %vm1447_vm8 = vcmp.eq.s32.totalorder %v5836_v3, %v1173_v54  ;;  %vm1448_vm11 = vcmp.eq.s32.totalorder %v5843_v10, %v1173_v54  ;;  %v2145_v54 = vld [vmem:[%s5631_s26 + $0x50] sm:$0xff] }
 0x18a   : > { %2422 = vmatprep.mubr.bf16.mxu1 %v4523_v40  ;;  %vm4728_vm9 = vmpackc.low %vm1450_vm3, %vm1448_vm11 }
 0x18b   : > { %vm4730_vm1 = vmpackc.low %vm1449_vm0, %vm1447_vm8  ;;  %4729 = vmatprep.subr.msk.bf16.mxu1 %vm4728_vm9, %v5438_v17 }
 0x18c   : > { %v1074_v49 = vpop.permute.xlu1 %1073  ;;  %v1071_v50 = vpop.permute.xlu0 %1070  ;;  %4731 = vmatpush1.bf16.msk.msra.mxu1 %vm4730_vm1, %v5438_v17 }
 0x18d   : > { %vm1381_vm2 = vcmp.eq.s32.totalorder %v5836_v3, %v1074_v49  ;;  %vm1382_vm12 = vcmp.eq.s32.totalorder %v5843_v10, %v1074_v49  ;;  %vm1379_vm15 = vcmp.eq.s32.totalorder %v5836_v3, %v1071_v50  ;;  %vm1380_vm14 = vcmp.eq.s32.totalorder %v5843_v10, %v1071_v50  ;;  %v2149_v49 = vld [vmem:[%s5631_s26 + $0x70] sm:$0xff] }
 0x18e   : > { %vm4668_vm6 = vmpackc.low %vm1382_vm12, %vm1380_vm14 }
 0x18f   : > { %vm4670_vm4 = vmpackc.low %vm1381_vm2, %vm1379_vm15  ;;  %4669 = vmatprep.subr.msk.bf16.mxu0 %vm4668_vm6, %v5438_v17 }
 0x190   : > { %v1170_v55 = vpop.permute.xlu1 %1169  ;;  %v1167_v58 = vpop.permute.xlu0 %1166  ;;  %4671 = vmatpush1.bf16.msk.msra.mxu0 %vm4670_vm4, %v5438_v17 }
 0x191   : > { %vm1445_vm10 = vcmp.eq.s32.totalorder %v5836_v3, %v1170_v55  ;;  %vm1446_vm13 = vcmp.eq.s32.totalorder %v5843_v10, %v1170_v55  ;;  %vm1443_vm5 = vcmp.eq.s32.totalorder %v5836_v3, %v1167_v58  ;;  %vm1444_vm7 = vcmp.eq.s32.totalorder %v5843_v10, %v1167_v58 }
 0x192   : > { %vm4732_vm0 = vmpackc.low %vm1446_vm13, %vm1444_vm7  ;;  %v4529_v58 = vcombine.high %v2145_v54, %v2149_v49 }
 0x193   : > { %vm4734_vm3 = vmpackc.low %vm1445_vm10, %vm1443_vm5  ;;  %4733 = vmatprep.subr.msk.bf16.mxu1 %vm4732_vm0, %v5438_v17 }
 0x194   : > { %v1068_v42 = vpop.permute.xlu1 %1067  ;;  %4735 = vmatpush1.bf16.msk.msra.mxu1 %vm4734_vm3, %v5438_v17 }
 0x195   : > { %vm1377_vm8 = vcmp.eq.s32.totalorder %v5836_v3, %v1068_v42  ;;  %vm1378_vm11 = vcmp.eq.s32.totalorder %v5843_v10, %v1068_v42  ;;  %v1065_v59 = vpop.permute.xlu0 %1064  ;;  %v2146_v42 = vld [vmem:[%s5631_s26 + $0x58] sm:$0xff] }
 0x196   : > { %vm1375_vm9 = vcmp.eq.s32.totalorder %v5836_v3, %v1065_v59  ;;  %vm1376_vm1 = vcmp.eq.s32.totalorder %v5843_v10, %v1065_v59  ;;  %v2150_v59 = vld [vmem:[%s5631_s26 + $0x78] sm:$0xff] }
 0x197   : > { %vm4672_vm2 = vmpackc.low %vm1378_vm11, %vm1376_vm1 }
 0x198   : > { %vm4674_vm12 = vmpackc.low %vm1377_vm8, %vm1375_vm9  ;;  %4673 = vmatprep.subr.msk.bf16.mxu0 %vm4672_vm2, %v5438_v17  ;;  %v1164_v60 = vpop.permute.xlu1 %1163 }
 0x199   : > { %vm1441_vm15 = vcmp.eq.s32.totalorder %v5836_v3, %v1164_v60  ;;  %vm1442_vm14 = vcmp.eq.s32.totalorder %v5843_v10, %v1164_v60  ;;  %v1161_v53 = vpop.permute.xlu0 %1160  ;;  %4675 = vmatpush1.bf16.msk.msra.mxu0 %vm4674_vm12, %v5438_v17  ;;  %v4531_v60 = vcombine.high %v2146_v42, %v2150_v59 }
 0x19a   : > { %vm1439_vm6 = vcmp.eq.s32.totalorder %v5836_v3, %v1161_v53  ;;  %vm1440_vm4 = vcmp.eq.s32.totalorder %v5843_v10, %v1161_v53 }
 0x19b   : > { %vm4736_vm10 = vmpackc.low %vm1442_vm14, %vm1440_vm4 }
 0x19c   : > { %vm4738_vm13 = vmpackc.low %vm1441_vm15, %vm1439_vm6  ;;  %4737 = vmatprep.subr.msk.bf16.mxu1 %vm4736_vm10, %v5438_v17  ;;  %v1062_v52 = vpop.permute.xlu1 %1061 }
 0x19d   : > { %vm1373_vm5 = vcmp.eq.s32.totalorder %v5836_v3, %v1062_v52  ;;  %vm1374_vm7 = vcmp.eq.s32.totalorder %v5843_v10, %v1062_v52  ;;  %v1059_v41 = vpop.permute.xlu0 %1058  ;;  %4739 = vmatpush1.bf16.msk.msra.mxu1 %vm4738_vm13, %v5438_v17 }
 0x19e   : > { %vm1371_vm0 = vcmp.eq.s32.totalorder %v5836_v3, %v1059_v41  ;;  %vm1372_vm3 = vcmp.eq.s32.totalorder %v5843_v10, %v1059_v41 }
 0x19f   : > { %vm4676_vm8 = vmpackc.low %vm1374_vm7, %vm1372_vm3 }
 0x1a0   : > { %vm4678_vm11 = vmpackc.low %vm1373_vm5, %vm1371_vm0  ;;  %4677 = vmatprep.subr.msk.bf16.mxu0 %vm4676_vm8, %v5438_v17  ;;  %v1158_v62 = vpop.permute.xlu1 %1157 }
 0x1a1   : > { %vm1437_vm9 = vcmp.eq.s32.totalorder %v5836_v3, %v1158_v62  ;;  %vm1438_vm1 = vcmp.eq.s32.totalorder %v5843_v10, %v1158_v62  ;;  %v1155_v63 = vpop.permute.xlu0 %1154  ;;  %4679 = vmatpush1.bf16.msk.msra.mxu0 %vm4678_vm11, %v5438_v17 }
 0x1a2   : > { %vm1435_vm2 = vcmp.eq.s32.totalorder %v5836_v3, %v1155_v63  ;;  %vm1436_vm12 = vcmp.eq.s32.totalorder %v5843_v10, %v1155_v63 }
 0x1a3   : > { %vm4740_vm15 = vmpackc.low %vm1438_vm1, %vm1436_vm12 }
 0x1a4   : > { %vm4742_vm14 = vmpackc.low %vm1437_vm9, %vm1435_vm2  ;;  %4741 = vmatprep.subr.msk.bf16.mxu1 %vm4740_vm15, %v5438_v17  ;;  %v1056_v0 = vpop.permute.xlu1 %1055 }
 0x1a5   : > { %vm1369_vm6 = vcmp.eq.s32.totalorder %v5836_v3, %v1056_v0  ;;  %vm1370_vm4 = vcmp.eq.s32.totalorder %v5843_v10, %v1056_v0  ;;  %v1053_v1 = vpop.permute.xlu0 %1052  ;;  %4743 = vmatpush1.bf16.msk.msra.mxu1 %vm4742_vm14, %v5438_v17 }
 0x1a6   : > { %vm1367_vm10 = vcmp.eq.s32.totalorder %v5836_v3, %v1053_v1  ;;  %vm1368_vm13 = vcmp.eq.s32.totalorder %v5843_v10, %v1053_v1 }
 0x1a7   : > { %vm4680_vm5 = vmpackc.low %vm1370_vm4, %vm1368_vm13 }
 0x1a8   : > { %vm4682_vm7 = vmpackc.low %vm1369_vm6, %vm1367_vm10  ;;  %4681 = vmatprep.subr.msk.bf16.mxu0 %vm4680_vm5, %v5438_v17  ;;  %v1152_v23 = vpop.permute.xlu1 %1151 }
 0x1a9   : > { %vm1433_vm0 = vcmp.eq.s32.totalorder %v5836_v3, %v1152_v23  ;;  %vm1434_vm3 = vcmp.eq.s32.totalorder %v5843_v10, %v1152_v23  ;;  %v1149_v45 = vpop.permute.xlu0 %1148  ;;  %4683 = vmatpush1.bf16.msk.msra.mxu0 %vm4682_vm7, %v5438_v17 }
 0x1aa   : > { %vm1431_vm8 = vcmp.eq.s32.totalorder %v5836_v3, %v1149_v45  ;;  %vm1432_vm11 = vcmp.eq.s32.totalorder %v5843_v10, %v1149_v45 }
 0x1ab   : > { %vm4744_vm9 = vmpackc.low %vm1434_vm3, %vm1432_vm11 }
 0x1ac   : > { %vm4746_vm1 = vmpackc.low %vm1433_vm0, %vm1431_vm8  ;;  %4745 = vmatprep.subr.msk.bf16.mxu1 %vm4744_vm9, %v5438_v17  ;;  %v1050_v44 = vpop.permute.xlu1 %1049 }
 0x1ad   : > { %vm1365_vm2 = vcmp.eq.s32.totalorder %v5836_v3, %v1050_v44  ;;  %vm1366_vm12 = vcmp.eq.s32.totalorder %v5843_v10, %v1050_v44  ;;  %v1047_v2 = vpop.permute.xlu0 %1046  ;;  %4747 = vmatpush1.bf16.msk.msra.mxu1 %vm4746_vm1, %v5438_v17 }
 0x1ae   : > { %vm1363_vm15 = vcmp.eq.s32.totalorder %v5836_v3, %v1047_v2  ;;  %vm1364_vm14 = vcmp.eq.s32.totalorder %v5843_v10, %v1047_v2 }
 0x1af   : > { %vm4684_vm6 = vmpackc.low %vm1366_vm12, %vm1364_vm14 }
 0x1b0   : > { %vm4686_vm4 = vmpackc.low %vm1365_vm2, %vm1363_vm15  ;;  %4685 = vmatprep.subr.msk.bf16.mxu0 %vm4684_vm6, %v5438_v17  ;;  %v1146_v24 = vpop.permute.xlu1 %1145 }
 0x1b1   : > { %vm1429_vm10 = vcmp.eq.s32.totalorder %v5836_v3, %v1146_v24  ;;  %vm1430_vm13 = vcmp.eq.s32.totalorder %v5843_v10, %v1146_v24  ;;  %v1143_v31 = vpop.permute.xlu0 %1142  ;;  %4687 = vmatpush1.bf16.msk.msra.mxu0 %vm4686_vm4, %v5438_v17 }
 0x1b2   : > { %vm1427_vm5 = vcmp.eq.s32.totalorder %v5836_v3, %v1143_v31  ;;  %vm1428_vm7 = vcmp.eq.s32.totalorder %v5843_v10, %v1143_v31 }
 0x1b3   : > { %vm4748_vm0 = vmpackc.low %vm1430_vm13, %vm1428_vm7 }
 0x1b4   : > { %vm4750_vm3 = vmpackc.low %vm1429_vm10, %vm1427_vm5  ;;  %4749 = vmatprep.subr.msk.bf16.mxu1 %vm4748_vm0, %v5438_v17  ;;  %v1044_v4 = vpop.permute.xlu1 %1043 }
 0x1b5   : > { %vm1361_vm8 = vcmp.eq.s32.totalorder %v5836_v3, %v1044_v4  ;;  %vm1362_vm11 = vcmp.eq.s32.totalorder %v5843_v10, %v1044_v4  ;;  %v1041_v5 = vpop.permute.xlu0 %1040  ;;  %4751 = vmatpush1.bf16.msk.msra.mxu1 %vm4750_vm3, %v5438_v17 }
 0x1b6   : > { %vm1359_vm9 = vcmp.eq.s32.totalorder %v5836_v3, %v1041_v5  ;;  %vm1360_vm1 = vcmp.eq.s32.totalorder %v5843_v10, %v1041_v5 }
 0x1b7   : > { %vm4688_vm2 = vmpackc.low %vm1362_vm11, %vm1360_vm1 }
 0x1b8   : > { %vm4690_vm12 = vmpackc.low %vm1361_vm8, %vm1359_vm9  ;;  %4689 = vmatprep.subr.msk.bf16.mxu0 %vm4688_vm2, %v5438_v17  ;;  %v1140_v6 = vpop.permute.xlu1 %1139 }
 0x1b9   : > { %vm1425_vm15 = vcmp.eq.s32.totalorder %v5836_v3, %v1140_v6  ;;  %vm1426_vm14 = vcmp.eq.s32.totalorder %v5843_v10, %v1140_v6  ;;  %v1137_v34 = vpop.permute.xlu0 %1136  ;;  %4691 = vmatpush1.bf16.msk.msra.mxu0 %vm4690_vm12, %v5438_v17  ;;  %v2127_v6 = vld [vmem:[#allocation2 + $0x30] sm:$0xff] }
 0x1ba   : > { %vm1423_vm6 = vcmp.eq.s32.totalorder %v5836_v3, %v1137_v34  ;;  %vm1424_vm4 = vcmp.eq.s32.totalorder %v5843_v10, %v1137_v34 }
 0x1bb   : > { %vm4752_vm10 = vmpackc.low %vm1426_vm14, %vm1424_vm4 }
 0x1bc   : > { %vm4754_vm13 = vmpackc.low %vm1425_vm15, %vm1423_vm6  ;;  %4753 = vmatprep.subr.msk.bf16.mxu1 %vm4752_vm10, %v5438_v17  ;;  %v1134_v28 = vpop.permute.xlu1 %1133 }
 0x1bd   : > { %vm1421_vm5 = vcmp.eq.s32.totalorder %v5836_v3, %v1134_v28  ;;  %vm1422_vm7 = vcmp.eq.s32.totalorder %v5843_v10, %v1134_v28  ;;  %v1131_v32 = vpop.permute.xlu0 %1130  ;;  %4755 = vmatpush1.bf16.msk.msra.mxu1 %vm4754_vm13, %v5438_v17 }
 0x1be   : > { %vm1419_vm0 = vcmp.eq.s32.totalorder %v5836_v3, %v1131_v32  ;;  %vm1420_vm3 = vcmp.eq.s32.totalorder %v5843_v10, %v1131_v32 }
 0x1bf   : > { %vm4692_vm8 = vmpackc.low %vm1422_vm7, %vm1420_vm3 }
 0x1c0   : > { %vm4694_vm11 = vmpackc.low %vm1421_vm5, %vm1419_vm0  ;;  %4693 = vmatprep.subr.msk.bf16.mxu0 %vm4692_vm8, %v5438_v17  ;;  %v1230_v7 = vpop.permute.xlu1 %1229 }
 0x1c1   : > { %vm1485_vm9 = vcmp.eq.s32.totalorder %v5836_v3, %v1230_v7  ;;  %vm1486_vm1 = vcmp.eq.s32.totalorder %v5843_v10, %v1230_v7  ;;  %v1227_v8 = vpop.permute.xlu0 %1226  ;;  %4695 = vmatpush2.bf16.msk.msra.mxu0 %vm4694_vm11, %v5438_v17 }
 0x1c2   : > { %vm1483_vm2 = vcmp.eq.s32.totalorder %v5836_v3, %v1227_v8  ;;  %vm1484_vm12 = vcmp.eq.s32.totalorder %v5843_v10, %v1227_v8 }
 0x1c3   : > { %vm4756_vm15 = vmpackc.low %vm1486_vm1, %vm1484_vm12 }
 0x1c4   : > { %vm4758_vm14 = vmpackc.low %vm1485_vm9, %vm1483_vm2  ;;  %4757 = vmatprep.subr.msk.bf16.mxu1 %vm4756_vm15, %v5438_v17  ;;  %v1128_v9 = vpop.permute.xlu1 %1127 }
 0x1c5   : > { %vm1417_vm6 = vcmp.eq.s32.totalorder %v5836_v3, %v1128_v9  ;;  %vm1418_vm4 = vcmp.eq.s32.totalorder %v5843_v10, %v1128_v9  ;;  %v1125_v11 = vpop.permute.xlu0 %1124  ;;  %4759 = vmatpush2.bf16.msk.msra.mxu1 %vm4758_vm14, %v5438_v17  ;;  %v2128_v9 = vld [vmem:[#allocation2] sm:$0xff] }
 0x1c6   : > { %vm1415_vm10 = vcmp.eq.s32.totalorder %v5836_v3, %v1125_v11  ;;  %vm1416_vm13 = vcmp.eq.s32.totalorder %v5843_v10, %v1125_v11 }
 0x1c7   : > { %vm4696_vm5 = vmpackc.low %vm1418_vm4, %vm1416_vm13 }
 0x1c8   : > { %vm4698_vm7 = vmpackc.low %vm1417_vm6, %vm1415_vm10  ;;  %4697 = vmatprep.subr.msk.bf16.mxu0 %vm4696_vm5, %v5438_v17  ;;  %v1224_v12 = vpop.permute.xlu1 %1223 }
 0x1c9   : > { %vm1481_vm0 = vcmp.eq.s32.totalorder %v5836_v3, %v1224_v12  ;;  %vm1482_vm3 = vcmp.eq.s32.totalorder %v5843_v10, %v1224_v12  ;;  %v1221_v13 = vpop.permute.xlu0 %1220  ;;  %4699 = vmatpush2.bf16.msk.msra.mxu0 %vm4698_vm7, %v5438_v17 }
 0x1ca   : > { %vm1479_vm8 = vcmp.eq.s32.totalorder %v5836_v3, %v1221_v13  ;;  %vm1480_vm11 = vcmp.eq.s32.totalorder %v5843_v10, %v1221_v13 }
 0x1cb   : > { %vm4760_vm9 = vmpackc.low %vm1482_vm3, %vm1480_vm11 }
 0x1cc   : > { %vm4762_vm1 = vmpackc.low %vm1481_vm0, %vm1479_vm8  ;;  %4761 = vmatprep.subr.msk.bf16.mxu1 %vm4760_vm9, %v5438_v17  ;;  %v1122_v19 = vpop.permute.xlu1 %1121 }
 0x1cd   : > { %vm1413_vm2 = vcmp.eq.s32.totalorder %v5836_v3, %v1122_v19  ;;  %vm1414_vm12 = vcmp.eq.s32.totalorder %v5843_v10, %v1122_v19  ;;  %v1119_v21 = vpop.permute.xlu0 %1118  ;;  %4763 = vmatpush2.bf16.msk.msra.mxu1 %vm4762_vm1, %v5438_v17 }
 0x1ce   : > { %vm1411_vm15 = vcmp.eq.s32.totalorder %v5836_v3, %v1119_v21  ;;  %vm1412_vm14 = vcmp.eq.s32.totalorder %v5843_v10, %v1119_v21 }
 0x1cf   : > { %vm4700_vm6 = vmpackc.low %vm1414_vm12, %vm1412_vm14 }
 0x1d0   : > { %vm4702_vm4 = vmpackc.low %vm1413_vm2, %vm1411_vm15  ;;  %4701 = vmatprep.subr.msk.bf16.mxu0 %vm4700_vm6, %v5438_v17  ;;  %v1218_v14 = vpop.permute.xlu1 %1217 }
 0x1d1   : > { %vm1477_vm10 = vcmp.eq.s32.totalorder %v5836_v3, %v1218_v14  ;;  %vm1478_vm13 = vcmp.eq.s32.totalorder %v5843_v10, %v1218_v14  ;;  %v1215_v15 = vpop.permute.xlu0 %1214  ;;  %4703 = vmatpush2.bf16.msk.msra.mxu0 %vm4702_vm4, %v5438_v17 }
 0x1d2   : > { %vm1475_vm5 = vcmp.eq.s32.totalorder %v5836_v3, %v1215_v15  ;;  %vm1476_vm7 = vcmp.eq.s32.totalorder %v5843_v10, %v1215_v15  ;;  %v2129_v15 = vld [vmem:[#allocation2 + $0x18] sm:$0xff] }
 0x1d3   : > { %vm4764_vm0 = vmpackc.low %vm1478_vm13, %vm1476_vm7 }
 0x1d4   : > { %vm4766_vm3 = vmpackc.low %vm1477_vm10, %vm1475_vm5  ;;  %4765 = vmatprep.subr.msk.bf16.mxu1 %vm4764_vm0, %v5438_v17  ;;  %v1116_v16 = vpop.permute.xlu1 %1115 }
 0x1d5   : > { %vm1409_vm8 = vcmp.eq.s32.totalorder %v5836_v3, %v1116_v16  ;;  %vm1410_vm11 = vcmp.eq.s32.totalorder %v5843_v10, %v1116_v16  ;;  %v1113_v18 = vpop.permute.xlu0 %1112  ;;  %4767 = vmatpush2.bf16.msk.msra.mxu1 %vm4766_vm3, %v5438_v17 }
 0x1d6   : > { %vm1407_vm9 = vcmp.eq.s32.totalorder %v5836_v3, %v1113_v18  ;;  %vm1408_vm1 = vcmp.eq.s32.totalorder %v5843_v10, %v1113_v18 }
 0x1d7   : > { %vm4704_vm2 = vmpackc.low %vm1410_vm11, %vm1408_vm1 }
 0x1d8   : > { %vm4706_vm12 = vmpackc.low %vm1409_vm8, %vm1407_vm9  ;;  %4705 = vmatprep.subr.msk.bf16.mxu0 %vm4704_vm2, %v5438_v17  ;;  %v1212_v22 = vpop.permute.xlu1 %1211 }
 0x1d9   : > { %vm1473_vm15 = vcmp.eq.s32.totalorder %v5836_v3, %v1212_v22  ;;  %vm1474_vm14 = vcmp.eq.s32.totalorder %v5843_v10, %v1212_v22  ;;  %v1209_v27 = vpop.permute.xlu0 %1208  ;;  %4707 = vmatpush2.bf16.msk.msra.mxu0 %vm4706_vm12, %v5438_v17 }
 0x1da   : > { %vm1471_vm6 = vcmp.eq.s32.totalorder %v5836_v3, %v1209_v27  ;;  %vm1472_vm4 = vcmp.eq.s32.totalorder %v5843_v10, %v1209_v27 }
 0x1db   : > { %vm4768_vm10 = vmpackc.low %vm1474_vm14, %vm1472_vm4 }
 0x1dc   : > { %vm4770_vm13 = vmpackc.low %vm1473_vm15, %vm1471_vm6  ;;  %4769 = vmatprep.subr.msk.bf16.mxu1 %vm4768_vm10, %v5438_v17  ;;  %v1110_v35 = vpop.permute.xlu1 %1109 }
 0x1dd   : > { %vm1405_vm5 = vcmp.eq.s32.totalorder %v5836_v3, %v1110_v35  ;;  %vm1406_vm7 = vcmp.eq.s32.totalorder %v5843_v10, %v1110_v35  ;;  %v1107_v36 = vpop.permute.xlu0 %1106  ;;  %4771 = vmatpush2.bf16.msk.msra.mxu1 %vm4770_vm13, %v5438_v17 }
 0x1de   : > { %vm1403_vm0 = vcmp.eq.s32.totalorder %v5836_v3, %v1107_v36  ;;  %vm1404_vm3 = vcmp.eq.s32.totalorder %v5843_v10, %v1107_v36 }
 0x1df   : > { %vm4708_vm8 = vmpackc.low %vm1406_vm7, %vm1404_vm3 }
 0x1e0   : > { %vm4710_vm11 = vmpackc.low %vm1405_vm5, %vm1403_vm0  ;;  %4709 = vmatprep.subr.msk.bf16.mxu0 %vm4708_vm8, %v5438_v17 }
 0x1e1   : > { %v1206_v37 = vpop.permute.xlu1 %1205  ;;  %4711 = vmatpush2.bf16.msk.msra.mxu0 %vm4710_vm11, %v5438_v17 }
 0x1e2   : > { %vm1469_vm9 = vcmp.eq.s32.totalorder %v5836_v3, %v1206_v37  ;;  %vm1470_vm1 = vcmp.eq.s32.totalorder %v5843_v10, %v1206_v37  ;;  %v1203_v20 = vpop.permute.xlu0 %1202  ;;  %v2130_v37 = vld [vmem:[#allocation2 + $0x10] sm:$0xff] }
 0x1e3   : > { %vm1467_vm2 = vcmp.eq.s32.totalorder %v5836_v3, %v1203_v20  ;;  %vm1468_vm12 = vcmp.eq.s32.totalorder %v5843_v10, %v1203_v20 }
 0x1e4   : > { %vm4772_vm15 = vmpackc.low %vm1470_vm1, %vm1468_vm12 }
 0x1e5   : > { %vm4774_vm14 = vmpackc.low %vm1469_vm9, %vm1467_vm2  ;;  %4773 = vmatprep.subr.msk.bf16.mxu1 %vm4772_vm15, %v5438_v17  ;;  %v1104_v29 = vpop.permute.xlu1 %1103 }
 0x1e6   : > { %vm1401_vm6 = vcmp.eq.s32.totalorder %v5836_v3, %v1104_v29  ;;  %vm1402_vm4 = vcmp.eq.s32.totalorder %v5843_v10, %v1104_v29  ;;  %v1101_v46 = vpop.permute.xlu0 %1100  ;;  %4775 = vmatpush2.bf16.msk.msra.mxu1 %vm4774_vm14, %v5438_v17 }
 0x1e7   : > { %vm1399_vm10 = vcmp.eq.s32.totalorder %v5836_v3, %v1101_v46  ;;  %vm1400_vm13 = vcmp.eq.s32.totalorder %v5843_v10, %v1101_v46 }
 0x1e8   : > { %vm4712_vm5 = vmpackc.low %vm1402_vm4, %vm1400_vm13 }
 0x1e9   : > { %vm4714_vm7 = vmpackc.low %vm1401_vm6, %vm1399_vm10  ;;  %4713 = vmatprep.subr.msk.bf16.mxu0 %vm4712_vm5, %v5438_v17  ;;  %v1200_v56 = vpop.permute.xlu1 %1199 }
 0x1ea   : > { %vm1465_vm0 = vcmp.eq.s32.totalorder %v5836_v3, %v1200_v56  ;;  %vm1466_vm3 = vcmp.eq.s32.totalorder %v5843_v10, %v1200_v56  ;;  %v1197_v57 = vpop.permute.xlu0 %1196  ;;  %4715 = vmatpush2.bf16.msk.msra.mxu0 %vm4714_vm7, %v5438_v17 }
 0x1eb   : > { %vm1463_vm8 = vcmp.eq.s32.totalorder %v5836_v3, %v1197_v57  ;;  %vm1464_vm11 = vcmp.eq.s32.totalorder %v5843_v10, %v1197_v57 }
 0x1ec   : > { %vm4776_vm9 = vmpackc.low %vm1466_vm3, %vm1464_vm11 }
 0x1ed   : > { %vm4778_vm1 = vmpackc.low %vm1465_vm0, %vm1463_vm8  ;;  %4777 = vmatprep.subr.msk.bf16.mxu1 %vm4776_vm9, %v5438_v17  ;;  %v1098_v61 = vpop.permute.xlu1 %1097 }
 0x1ee   : > { %vm1397_vm2 = vcmp.eq.s32.totalorder %v5836_v3, %v1098_v61  ;;  %vm1398_vm12 = vcmp.eq.s32.totalorder %v5843_v10, %v1098_v61  ;;  %v1095_v48 = vpop.permute.xlu0 %1094  ;;  %4779 = vmatpush2.bf16.msk.msra.mxu1 %vm4778_vm1, %v5438_v17 }
 0x1ef   : > { %vm1395_vm15 = vcmp.eq.s32.totalorder %v5836_v3, %v1095_v48  ;;  %vm1396_vm14 = vcmp.eq.s32.totalorder %v5843_v10, %v1095_v48  ;;  %v2131_v48 = vld [vmem:[#allocation2 + $0x8] sm:$0xff] }
 0x1f0   : > { %vm4716_vm6 = vmpackc.low %vm1398_vm12, %vm1396_vm14 }
 0x1f1   : > { %vm4718_vm4 = vmpackc.low %vm1397_vm2, %vm1395_vm15  ;;  %4717 = vmatprep.subr.msk.bf16.mxu0 %vm4716_vm6, %v5438_v17  ;;  %v1194_v51 = vpop.permute.xlu1 %1193 }
 0x1f2   : > { %vm1461_vm10 = vcmp.eq.s32.totalorder %v5836_v3, %v1194_v51  ;;  %vm1462_vm13 = vcmp.eq.s32.totalorder %v5843_v10, %v1194_v51  ;;  %v1191_v39 = vpop.permute.xlu0 %1190  ;;  %4719 = vmatpush2.bf16.msk.msra.mxu0 %vm4718_vm4, %v5438_v17 }
 0x1f3   : > { %vm1459_vm5 = vcmp.eq.s32.totalorder %v5836_v3, %v1191_v39  ;;  %vm1460_vm7 = vcmp.eq.s32.totalorder %v5843_v10, %v1191_v39 }
 0x1f4   : > { %vm4780_vm0 = vmpackc.low %vm1462_vm13, %vm1460_vm7 }
 0x1f5   : > { %vm4782_vm3 = vmpackc.low %vm1461_vm10, %vm1459_vm5  ;;  %4781 = vmatprep.subr.msk.bf16.mxu1 %vm4780_vm0, %v5438_v17  ;;  %v1092_v40 = vpop.permute.xlu1 %1091 }
 0x1f6   : > { %vm1393_vm8 = vcmp.eq.s32.totalorder %v5836_v3, %v1092_v40  ;;  %vm1394_vm11 = vcmp.eq.s32.totalorder %v5843_v10, %v1092_v40  ;;  %v1089_v43 = vpop.permute.xlu0 %1088  ;;  %4783 = vmatpush2.bf16.msk.msra.mxu1 %vm4782_vm3, %v5438_v17 }
 0x1f7   : > { %vm1391_vm9 = vcmp.eq.s32.totalorder %v5836_v3, %v1089_v43  ;;  %vm1392_vm1 = vcmp.eq.s32.totalorder %v5843_v10, %v1089_v43 }
 0x1f8   : > { %vm4720_vm2 = vmpackc.low %vm1394_vm11, %vm1392_vm1 }
 0x1f9   : > { %vm4722_vm12 = vmpackc.low %vm1393_vm8, %vm1391_vm9  ;;  %4721 = vmatprep.subr.msk.bf16.mxu0 %vm4720_vm2, %v5438_v17  ;;  %v1188_v50 = vpop.permute.xlu1 %1187 }
 0x1fa   : > { %vm1457_vm15 = vcmp.eq.s32.totalorder %v5836_v3, %v1188_v50  ;;  %vm1458_vm14 = vcmp.eq.s32.totalorder %v5843_v10, %v1188_v50  ;;  %v1185_v55 = vpop.permute.xlu0 %1184  ;;  %4723 = vmatpush2.bf16.msk.msra.mxu0 %vm4722_vm12, %v5438_v17  ;;  %v2132_v50 = vld [vmem:[#allocation2 + $0x20] sm:$0xff] }
 0x1fb   : > { %vm1455_vm6 = vcmp.eq.s32.totalorder %v5836_v3, %v1185_v55  ;;  %vm1456_vm4 = vcmp.eq.s32.totalorder %v5843_v10, %v1185_v55  ;;  %v4528_v3 = vcombine.low %v2145_v54, %v2149_v49  ;;  %v4530_v10 = vcombine.low %v2146_v42, %v2150_v59 }
 0x1fc   : > { %vm4784_vm10 = vmpackc.low %vm1458_vm14, %vm1456_vm4 }
 0x1fd   : > { %vm4786_vm13 = vmpackc.low %vm1457_vm15, %vm1455_vm6  ;;  %2370 = vmatmul.mubr.bf16.vlgmr.msra.gmra.mxu0 %v4520_v38  ;;  %4785 = vmatprep.subr.msk.bf16.mxu1 %vm4784_vm10, %v5438_v17 }
 0x1fe   : > { %4787 = vmatpush2.bf16.msk.msra.mxu1 %vm4786_vm13, %v5438_v17  ;;  %2379 = vmatprep.mubr.bf16.mxu0 %v4529_v58 }
 0x201   : > { %2423 = vmatmul.mubr.bf16.vlgmr.msra.gmra.mxu1 %v4522_v47 }
 0x202   : > { %2432 = vmatprep.mubr.bf16.mxu1 %v4531_v60 }
 0x205   : > { %2380 = vmatmul.mubr.bf16.gmra.mxu0 %v4528_v3  ;;  %v2133_v3 = vld [vmem:[#allocation2 + $0x28] sm:$0xff] }
 0x209   : > { %2433 = vmatmul.mubr.bf16.gmra.mxu1 %v4530_v10 }
 0x23b   : > { %v2265_v53 = vpop.f32.mrf.mxu0 }
 0x23d   : > { %v2267_v41 = vpop.f32.mrf.mxu0 }
 0x23f   : > { %v2269_v26 = vpop.f32.mrf.mxu0 }
 0x241   : > { %v2318_v52 = vpop.f32.mrf.mxu1  ;;  %v2271_v62 = vpop.f32.mrf.mxu0 }
 0x242   : > { %v2319_v44 = vadd.f32 %v2318_v52, %v2265_v53 }
 0x243   : > { %v2320_v25 = vpop.f32.mrf.mxu1  ;;  %v2275_v63 = vpop.f32.mrf.mxu0 }
 0x244   : > { %v2321_v31 = vadd.f32 %v2320_v25, %v2267_v41  ;;  %v2134_v25 = vld [vmem:[#allocation2 + $0x38] sm:$0xff] }
 0x245   : > { %v2322_v38 = vpop.f32.mrf.mxu1  ;;  %v2277_v1 = vpop.f32.mrf.mxu0 }
 0x246   : > { %v2323_v28 = vadd.f32 %v2322_v38, %v2269_v26 }
 0x247   : > { %v2324_v17 = vpop.f32.mrf.mxu1  ;;  %v2279_v45 = vpop.f32.mrf.mxu0 }
 0x248   : > { %v2325_v12 = vadd.f32 %v2324_v17, %v2271_v62 }
 0x249   : > { %v2328_v0 = vpop.f32.mrf.mxu1  ;;  %v2281_v33 = vpop.f32.mrf.mxu0 }
 0x24a   : > { %v2329_v18 = vadd.f32 %v2328_v0, %v2275_v63 }
 0x24b   : > { %v2330_v23 = vpop.f32.mrf.mxu1 }
 0x24c   : > { %v2331_v29 = vadd.f32 %v2330_v23, %v2277_v1 }
 0x24d   : > { %v2332_v30 = vpop.f32.mrf.mxu1 }
 0x24e   : > { %v2333_v39 = vadd.f32 %v2332_v30, %v2279_v45 }
 0x24f   : > { %v2334_v2 = vpop.f32.mrf.mxu1 }
 0x250   : > { %v2335_v58 = vadd.f32 %v2334_v2, %v2281_v33 }
 0x2bd   : > { %v2371_v47 = vpop.f32.mrf.mxu0 }
 0x2be   : > { %v2372_v4 = vadd.f32 %v2371_v47, %v2319_v44 }
 0x2bf   : > { %v2373_v24 = vpop.f32.mrf.mxu0 }
 0x2c0   : > { %v2374_v32 = vadd.f32 %v2373_v24, %v2321_v31 }
 0x2c1   : > { %v2375_v5 = vpop.f32.mrf.mxu0  ;;  %v2424_v34 = vpop.f32.mrf.mxu1 }
 0x2c2   : > { %v2425_v7 = vadd.f32 %v2424_v34, %v2372_v4  ;;  %v2376_v13 = vadd.f32 %v2375_v5, %v2323_v28 }
 0x2c3   : > { %v2377_v8 = vpop.f32.mrf.mxu0  ;;  %v2426_v11 = vpop.f32.mrf.mxu1 }
 0x2c4   : > { %v2443_v19 = vadd.f32 %v2425_v7, %v2127_v6  ;;  %v2427_v21 = vadd.f32 %v2426_v11, %v2374_v32  ;;  %v2378_v22 = vadd.f32 %v2377_v8, %v2325_v12 }
 0x2c5   : > { %v2381_v14 = vpop.f32.mrf.mxu0  ;;  %v2428_v16 = vpop.f32.mrf.mxu1 }
 0x2c6   : > { %2451 = vst [vmem:[#allocation2 + $0x30] sm:$0xff] %v2443_v19  ;;  %v2444_v27 = vadd.f32 %v2427_v21, %v2128_v9  ;;  %v2429_v35 = vadd.f32 %v2428_v16, %v2376_v13  ;;  %v2382_v46 = vadd.f32 %v2381_v14, %v2329_v18 }
 0x2c7   : > { %v2383_v36 = vpop.f32.mrf.mxu0  ;;  %v2430_v20 = vpop.f32.mrf.mxu1 }
 0x2c8   : > { %2452 = vst [vmem:[#allocation2] sm:$0xff] %v2444_v27  ;;  %v2445_v56 = vadd.f32 %v2429_v35, %v2129_v15  ;;  %v2431_v57 = vadd.f32 %v2430_v20, %v2378_v22  ;;  %v2384_v40 = vadd.f32 %v2383_v36, %v2331_v29 }
 0x2c9   : > { %v2385_v61 = vpop.f32.mrf.mxu0  ;;  %v2434_v51 = vpop.f32.mrf.mxu1 }
 0x2ca   : > { %2453 = vst [vmem:[#allocation2 + $0x18] sm:$0xff] %v2445_v56  ;;  %v2446_v43 = vadd.f32 %v2431_v57, %v2130_v37  ;;  %v2435_v54 = vadd.f32 %v2434_v51, %v2382_v46  ;;  %v2386_v42 = vadd.f32 %v2385_v61, %v2333_v39 }
 0x2cb   : > { %v2387_v49 = vpop.f32.mrf.mxu0  ;;  %v2436_v55 = vpop.f32.mrf.mxu1 }
 0x2cc   : > { %2454 = vst [vmem:[#allocation2 + $0x10] sm:$0xff] %v2446_v43  ;;  %v2447_v59 = vadd.f32 %v2435_v54, %v2131_v48  ;;  %v2437_v60 = vadd.f32 %v2436_v55, %v2384_v40  ;;  %v2388_v53 = vadd.f32 %v2387_v49, %v2335_v58 }
 0x2cd   : > { %v2438_v10 = vpop.f32.mrf.mxu1 }
 0x2ce   : > { %2455 = vst [vmem:[#allocation2 + $0x8] sm:$0xff] %v2447_v59  ;;  %v2448_v52 = vadd.f32 %v2437_v60, %v2132_v50  ;;  %v2439_v41 = vadd.f32 %v2438_v10, %v2386_v42 }
 0x2cf   : > { %v2440_v26 = vpop.f32.mrf.mxu1 }
 0x2d0   : > { %2456 = vst [vmem:[#allocation2 + $0x20] sm:$0xff] %v2448_v52  ;;  %v2449_v38 = vadd.f32 %v2439_v41, %v2133_v3  ;;  %v2441_v62 = vadd.f32 %v2440_v26, %v2388_v53 }
 0x2d2   : > { %2457 = vst [vmem:[#allocation2 + $0x28] sm:$0xff] %v2449_v38  ;;  %v2450_v63 = vadd.f32 %v2441_v62, %v2134_v25 }
 0x2d4   : > { %2458 = vst [vmem:[#allocation2 + $0x38] sm:$0xff] %v2450_v63 }
 0x2d5 PF: > { %p4788_p4 = scmp.ne.s32.totalorder %s5416_s13, 4 }
 0x2d6   : > { %s7511_s25 = sld [smem:[#allocation11_spill]] (!%p4788_p4) }
 0x2d7   : > { %2462 = sbr.rel (%p4788_p4) target bundleno = 1711 (0x6af), region = 95  ;;  %s7512_s11 = sld [smem:[#allocation12_spill]] (!%p4788_p4) }
 0x2d8   : > { %s7513_s23 = sld [smem:[#allocation13_spill]] (!%p4788_p4) }
 0x2dc   : > { %v2463_v17 = vld [vmem:[#allocation2 + $0x30] sm:$0xff]  ;;  %v2464_v0 = vld [vmem:[#allocation2] sm:$0xff]  ;;  %v2465_v1 = vld [vmem:[#allocation2 + $0x18] sm:$0xff]  ;;  %vm2619_vm5 = vcmask 261120   ;;  %vm3368_vm7 = vcmask 523264  }
 0x2dd   : > { %2471 = vxpose.xlu0.b32.start [1/4] (short) %v2463_v17, 128  ;;  %2503 = vxpose.xlu1.b32.start [1/4] (short) %v2464_v0, 128  ;;  %v2466_v23 = vld [vmem:[#allocation2 + $0x10] sm:$0xff]  ;;  %v5120_v45 = vld [vmem:[%s7476_s6 + $0x8] sm:$0xff]   ;;  %v5121_v30 = vld [vmem:[%s7476_s6] sm:$0xff]  }
 0x2de   : > { %v2567_v33 = vld [vmem:[%s5617_s28 + $0x80] sm:$0xff]  ;;  %5052 = vmatprep.subr.bf16.mxu1 %v5120_v45  ;;  %v2568_v47 = vld [vmem:[%s5617_s28 + $0x88] sm:$0xff]  ;;  %v2569_v24 = vld [vmem:[%s5617_s28 + $0x90] sm:$0xff]  ;;  %4940 = vmatprep.subr.bf16.mxu0 %v5120_v45 }
 0x2df   : > { %v2467_v44 = vld [vmem:[#allocation2 + $0x8] sm:$0xff]  ;;  %5054 = vmatpush3.bf16.msra.mxu1 %v5120_v45  ;;  %v2595_v2 = vpack.c.bf16 %v2568_v47, %v2567_v33  ;;  %v2570_v31 = vld [vmem:[%s5617_s28 + $0x98] sm:$0xff]  ;;  %v2468_v4 = vld [vmem:[#allocation2 + $0x20] sm:$0xff]  ;;  %4941 = vmatpush3.bf16.msra.mxu0 %v5120_v45 }
 0x2e0   : > { %5053 = vmatprep.subr.bf16.mxu1 %v5121_v30  ;;  %v2571_v5 = vld [vmem:[%s5617_s28 + $0xa0] sm:$0xff]  ;;  %v2572_v6 = vld [vmem:[%s5617_s28 + $0xa8] sm:$0xff]  ;;  %v2470_v28 = vld [vmem:[#allocation2 + $0x38] sm:$0xff]  ;;  %v2596_v32 = vpack.c.bf16 %v2570_v31, %v2569_v24  ;;  %4942 = vmatprep.subr.bf16.mxu0 %v5121_v30 }
 0x2e1   : > { %2472 = vxpose.xlu0.b32.cont [2/4] (short) %v2465_v1, 128  ;;  %2504 = vxpose.xlu1.b32.cont [2/4] (short) %v2466_v23, 128  ;;  %v2469_v34 = vld [vmem:[#allocation2 + $0x28] sm:$0xff]  ;;  %v2597_v7 = vpack.c.bf16 %v2572_v6, %v2571_v5  ;;  %v5123_v9 = vld [vmem:[%s7475_s5] sm:$0xff]   ;;  %v2573_v11 = vld [vmem:[%s5617_s28 + $0xb0] sm:$0xff] }
 0x2e2   : > { %4960 = vmatprep.mubr.msk.bf16.mxu1 %vm2619_vm5, %v2595_v2  ;;  %v5122_v8 = vld [vmem:[%s7475_s5 + $0x8] sm:$0xff]   ;;  %v2574_v12 = vld [vmem:[%s5617_s28 + $0xb8] sm:$0xff]  ;;  %v2551_v13 = vld [vmem:[%s5617_s28] sm:$0xff] }
 0x2e3   : > { %5055 = vmatpush3.bf16.msra.mxu1 %v5121_v30  ;;  %4943 = vmatpush3.bf16.msra.mxu0 %v5121_v30  ;;  %v2552_v19 = vld [vmem:[%s5617_s28 + $0x8] sm:$0xff]  ;;  %v2553_v21 = vld [vmem:[%s5617_s28 + $0x10] sm:$0xff]  ;;  %v2575_v14 = vld [vmem:[%s5617_s28 + $0xc0] sm:$0xff]  ;;  %v2598_v27 = vpack.c.bf16 %v2574_v12, %v2573_v11 }
 0x2e4   : > { %4976 = vmatprep.subr.bf16.mxu1 %v5122_v8  ;;  %v2576_v15 = vld [vmem:[%s5617_s28 + $0xc8] sm:$0xff]  ;;  %v2587_v16 = vpack.c.bf16 %v2552_v19, %v2551_v13  ;;  %v2554_v18 = vld [vmem:[%s5617_s28 + $0x18] sm:$0xff]  ;;  %v2577_v36 = vld [vmem:[%s5617_s28 + $0xd0] sm:$0xff] }
 0x2e5   : > { %2473 = vxpose.xlu0.b32.cont [3/4] (short) %v2467_v44, 128  ;;  %2505 = vxpose.xlu1.b32.cont [3/4] (short) %v2468_v4, 128  ;;  %v2588_v22 = vpack.c.bf16 %v2554_v18, %v2553_v21  ;;  %v2599_v35 = vpack.c.bf16 %v2576_v15, %v2575_v14  ;;  %v2578_v37 = vld [vmem:[%s5617_s28 + $0xd8] sm:$0xff]  ;;  %v2579_v20 = vld [vmem:[%s5617_s28 + $0xe0] sm:$0xff]  ;;  %v2580_v29 = vld [vmem:[%s5617_s28 + $0xe8] sm:$0xff] }
 0x2e6   : > { %4961 = vmatmul.mubr.msk.bf16.vlgmr.msra.gmra.mxu1 %vm2619_vm5, %v2596_v32  ;;  %4944 = vmatprep.mubr.msk.bf16.mxu0 %vm2619_vm5, %v2587_v16  ;;  %v2555_v46 = vld [vmem:[%s5617_s28 + $0x20] sm:$0xff]  ;;  %v2556_v56 = vld [vmem:[%s5617_s28 + $0x28] sm:$0xff]  ;;  %v2600_v57 = vpack.c.bf16 %v2578_v37, %v2577_v36  ;;  %v2557_v48 = vld [vmem:[%s5617_s28 + $0x30] sm:$0xff]  ;;  %v2601_v39 = vpack.c.bf16 %v2580_v29, %v2579_v20 }
 0x2e7   : > { %4964 = vmatprep.mubr.msk.bf16.mxu1 %vm2619_vm5, %v2597_v7  ;;  %4977 = vmatpush3.bf16.msra.mxu1 %v5122_v8  ;;  %v2589_v61 = vpack.c.bf16 %v2556_v56, %v2555_v46  ;;  %v2558_v51 = vld [vmem:[%s5617_s28 + $0x38] sm:$0xff]  ;;  %v2581_v43 = vld [vmem:[%s5617_s28 + $0xf0] sm:$0xff]  ;;  %v2559_v50 = vld [vmem:[%s5617_s28 + $0x40] sm:$0xff] }
 0x2e8   : > { %4978 = vmatprep.subr.bf16.mxu1 %v5123_v9  ;;  %4945 = vmatmul.mubr.msk.bf16.vlgmr.msra.gmra.mxu0 %vm2619_vm5, %v2588_v22  ;;  %v2590_v40 = vpack.c.bf16 %v2558_v51, %v2557_v48  ;;  %v2582_v54 = vld [vmem:[%s5617_s28 + $0xf8] sm:$0xff]  ;;  %v2560_v55 = vld [vmem:[%s5617_s28 + $0x48] sm:$0xff]  ;;  %v2561_v42 = vld [vmem:[%s5617_s28 + $0x50] sm:$0xff] }
 0x2e9   : > { %2474 = vxpose.xlu0.b32.end [4/4] (short) %v2469_v34, 128  ;;  %2506 = vxpose.xlu1.b32.end [4/4] (short) %v2470_v28, 128  ;;  %v2602_v49 = vpack.c.bf16 %v2582_v54, %v2581_v43  ;;  %v2591_v58 = vpack.c.bf16 %v2560_v55, %v2559_v50  ;;  %v2562_v59 = vld [vmem:[%s5617_s28 + $0x58] sm:$0xff]  ;;  %v2563_v3 = vld [vmem:[%s5617_s28 + $0x60] sm:$0xff]  ;;  %v2564_v10 = vld [vmem:[%s5617_s28 + $0x68] sm:$0xff] }
 0x2ea   : > { %4948 = vmatprep.mubr.msk.bf16.mxu0 %vm2619_vm5, %v2589_v61  ;;  %v2592_v60 = vpack.c.bf16 %v2562_v59, %v2561_v42  ;;  %v2593_v53 = vpack.c.bf16 %v2564_v10, %v2563_v3  ;;  %v2565_v52 = vld [vmem:[%s5617_s28 + $0x70] sm:$0xff]  ;;  %v2566_v41 = vld [vmem:[%s5617_s28 + $0x78] sm:$0xff]  ;;  %v5126_v54 = vld [vmem:[%s7478_s8 + $0x8] sm:$0xff]  }
 0x2eb   : > { %4979 = vmatpush3.bf16.msra.mxu1 %v5123_v9  ;;  %v2594_v25 = vpack.c.bf16 %v2566_v41, %v2565_v52  ;;  %v5125_v43 = vld [vmem:[%s7478_s8 + $0x10] sm:$0xff]  }
 0x2ee   : > { %4965 = vmatmul.mubr.msk.bf16.gmra.mxu1 %vm2619_vm5, %v2598_v27 }
 0x2ef   : > { %4968 = vmatprep.mubr.msk.bf16.mxu1 %vm2619_vm5, %v2599_v35 }
 0x2f0   : > { %4949 = vmatmul.mubr.msk.bf16.gmra.mxu0 %vm2619_vm5, %v2590_v40  ;;  %v5124_v40 = vld [vmem:[%s7478_s8 + $0x18] sm:$0xff]  }
 0x2f1   : > { %4952 = vmatprep.mubr.msk.bf16.mxu0 %vm2619_vm5, %v2591_v58  ;;  %5012 = vmatprep.subr.bf16.mxu0 %v5124_v40 }
 0x2f2   : > { %5013 = vmatpush3.bf16.msra.mxu0 %v5124_v40 }
 0x2f3   : > { %5014 = vmatprep.subr.bf16.mxu0 %v5125_v43 }
 0x2f6   : > { %4969 = vmatmul.mubr.msk.bf16.gmra.mxu1 %vm2619_vm5, %v2600_v57  ;;  %5015 = vmatpush3.bf16.msra.mxu0 %v5125_v43 }
 0x2f7   : > { %4972 = vmatprep.mubr.msk.bf16.mxu1 %vm2619_vm5, %v2601_v39  ;;  %5016 = vmatprep.subr.bf16.mxu0 %v5126_v54 }
 0x2f8   : > { %4953 = vmatmul.mubr.msk.bf16.gmra.mxu0 %vm2619_vm5, %v2592_v60 }
 0x2f9   : > { %4956 = vmatprep.mubr.msk.bf16.mxu0 %vm2619_vm5, %v2593_v53 }
 0x2fa   : > { %5017 = vmatpush3.bf16.msra.mxu0 %v5126_v54 }
 0x2fe   : > { %4973 = vmatmul.mubr.msk.bf16.gmra.mxu1 %vm2619_vm5, %v2602_v49  ;;  %v5127_v49 = vld [vmem:[%s7478_s8] sm:$0xff]  }
 0x2ff   : > { %5018 = vmatprep.subr.bf16.mxu0 %v5127_v49 }
 0x300   : > { %4957 = vmatmul.mubr.msk.bf16.gmra.mxu0 %vm2619_vm5, %v2594_v25 }
 0x301   : > { %5019 = vmatpush3.bf16.msra.mxu0 %v5127_v49 }
 0x359   : > { %v2487_v26 = vpop.trf.xlu0  ;;  %v2519_v38 = vpop.trf.xlu1 }
 0x35d   : > { %v2488_v62 = vpop.trf.xlu0  ;;  %v2520_v17 = vpop.trf.xlu1 }
 0x35e   : > { %v2535_v63 = vpack.c.bf16 %v2488_v62, %v2487_v26  ;;  %v2543_v27 = vpack.c.bf16 %v2520_v17, %v2519_v38 }
 0x360   : > { %4980 = vmatprep.mubr.msk.bf16.mxu1 %vm2619_vm5, %v2535_v63 }
 0x361   : > { %v2489_v0 = vpop.trf.xlu0  ;;  %v2521_v23 = vpop.trf.xlu1 }
 0x365   : > { %v2490_v1 = vpop.trf.xlu0  ;;  %v2522_v33 = vpop.trf.xlu1 }
 0x366   : > { %v2536_v45 = vpack.c.bf16 %v2490_v1, %v2489_v0  ;;  %v2544_v36 = vpack.c.bf16 %v2522_v33, %v2521_v23  ;;  %v6697_v23 = vld [vmem:[%s7477_s7] ss:$0 sm:$0xff] }
 0x368   : > { %4981 = vmatmul.mubr.msk.bf16.vlgmr.msra.gmra.mxu1 %vm2619_vm5, %v2536_v45 }
 0x369   : > { %v2491_v30 = vpop.trf.xlu0  ;;  %v2523_v24 = vpop.trf.xlu1 }
 0x36d   : > { %v2492_v47 = vpop.trf.xlu0  ;;  %v2524_v5 = vpop.trf.xlu1 }
 0x36e   : > { %v2537_v44 = vpack.c.bf16 %v2492_v47, %v2491_v30  ;;  %v2545_v37 = vpack.c.bf16 %v2524_v5, %v2523_v24 }
 0x370   : > { %4984 = vmatprep.mubr.msk.bf16.mxu1 %vm2619_vm5, %v2537_v44 }
 0x371   : > { %v2493_v2 = vpop.trf.xlu0  ;;  %v2525_v28 = vpop.trf.xlu1 }
 0x375   : > { %v2494_v31 = vpop.trf.xlu0  ;;  %v2526_v8 = vpop.trf.xlu1 }
 0x376   : > { %v2538_v4 = vpack.c.bf16 %v2494_v31, %v2493_v2  ;;  %v2546_v29 = vpack.c.bf16 %v2526_v8, %v2525_v28 }
 0x378   : > { %4985 = vmatmul.mubr.msk.bf16.gmra.mxu1 %vm2619_vm5, %v2538_v4 }
 0x379   : > { %v2495_v6 = vpop.trf.xlu0  ;;  %v2527_v13 = vpop.trf.xlu1 }
 0x37d   : > { %v2496_v34 = vpop.trf.xlu0  ;;  %v2528_v14 = vpop.trf.xlu1 }
 0x37e   : > { %v2539_v32 = vpack.c.bf16 %v2496_v34, %v2495_v6  ;;  %v2547_v46 = vpack.c.bf16 %v2528_v14, %v2527_v13 }
 0x380   : > { %4988 = vmatprep.mubr.msk.bf16.mxu1 %vm2619_vm5, %v2539_v32 }
 0x381   : > { %v2497_v7 = vpop.trf.xlu0  ;;  %v2529_v18 = vpop.trf.xlu1 }
 0x385   : > { %v2498_v9 = vpop.trf.xlu0  ;;  %v2530_v35 = vpop.trf.xlu1 }
 0x386   : > { %v2540_v11 = vpack.c.bf16 %v2498_v9, %v2497_v7  ;;  %v2548_v61 = vpack.c.bf16 %v2530_v35, %v2529_v18 }
 0x388   : > { %4989 = vmatmul.mubr.msk.bf16.gmra.mxu1 %vm2619_vm5, %v2540_v11 }
 0x389   : > { %v2499_v12 = vpop.trf.xlu0  ;;  %v2531_v20 = vpop.trf.xlu1 }
 0x38d   : > { %v2500_v19 = vpop.trf.xlu0  ;;  %v2532_v56 = vpop.trf.xlu1 }
 0x38e   : > { %v2541_v21 = vpack.c.bf16 %v2500_v19, %v2499_v12  ;;  %v2549_v48 = vpack.c.bf16 %v2532_v56, %v2531_v20 }
 0x390   : > { %4992 = vmatprep.mubr.msk.bf16.mxu1 %vm2619_vm5, %v2541_v21 }
 0x391   : > { %v2501_v15 = vpop.trf.xlu0  ;;  %v2533_v57 = vpop.trf.xlu1 }
 0x395   : > { %v2502_v16 = vpop.trf.xlu0  ;;  %v2534_v51 = vpop.trf.xlu1 }
 0x396   : > { %v2542_v22 = vpack.c.bf16 %v2502_v16, %v2501_v15  ;;  %v2550_v39 = vpack.c.bf16 %v2534_v51, %v2533_v57 }
 0x398   : > { %4993 = vmatmul.mubr.msk.bf16.gmra.mxu1 %vm2619_vm5, %v2542_v22 }
 0x399   : > { %4996 = vmatprep.mubr.msk.bf16.mxu1 %vm2619_vm5, %v2543_v27 }
 0x3a0   : > { %4997 = vmatmul.mubr.msk.bf16.gmra.mxu1 %vm2619_vm5, %v2544_v36 }
 0x3a1   : > { %5000 = vmatprep.mubr.msk.bf16.mxu1 %vm2619_vm5, %v2545_v37 }
 0x3a6   : > { %v6662_v50 = vpop.f32.mrf.mxu1 }
 0x3a8   : > { %5001 = vmatmul.mubr.msk.bf16.gmra.mxu1 %vm2619_vm5, %v2546_v29  ;;  %v6664_v55 = vpop.f32.mrf.mxu1  ;;  %v4946_v63 = vpop.f32.mrf.mxu0 }
 0x3a9   : > { %5004 = vmatprep.mubr.msk.bf16.mxu1 %vm2619_vm5, %v2547_v46 }
 0x3aa   : > { %v6666_v58 = vpop.f32.mrf.mxu1  ;;  %v2702_v0 = vpop.f32.mrf.mxu0 }
 0x3ac   : > { %v6668_v42 = vpop.f32.mrf.mxu1  ;;  %v4947_v45 = vpop.f32.mrf.mxu0 }
 0x3ae   : > { %v6670_v59 = vpop.f32.mrf.mxu1  ;;  %v2705_v24 = vpop.f32.mrf.mxu0 }
 0x3b0   : > { %5005 = vmatmul.mubr.msk.bf16.gmra.mxu1 %vm2619_vm5, %v2548_v61  ;;  %v6672_v60 = vpop.f32.mrf.mxu1  ;;  %v4950_v9 = vpop.f32.mrf.mxu0 }
 0x3b1   : > { %5008 = vmatprep.mubr.msk.bf16.mxu1 %vm2619_vm5, %v2549_v48 }
 0x3b2   : > { %v6674_v3 = vpop.f32.mrf.mxu1  ;;  %v2718_v12 = vpop.f32.mrf.mxu0 }
 0x3b4   : > { %v6676_v10 = vpop.f32.mrf.mxu1  ;;  %v4951_v21 = vpop.f32.mrf.mxu0 }
 0x3b6   : > { %v6678_v53 = vpop.f32.mrf.mxu1  ;;  %v2721_v20 = vpop.f32.mrf.mxu0 }
 0x3b8   : > { %5009 = vmatmul.mubr.msk.bf16.gmra.mxu1 %vm2619_vm5, %v2550_v39  ;;  %v6680_v52 = vpop.f32.mrf.mxu1  ;;  %v4954_v43 = vpop.f32.mrf.mxu0 }
 0x3ba   : > { %v6682_v41 = vpop.f32.mrf.mxu1 }
 0x3bc   : > { %v6684_v25 = vpop.f32.mrf.mxu1 }
 0x3be   : > { %v6686_v26 = vpop.f32.mrf.mxu1 }
 0x3c0   : > { %v6688_v38 = vpop.f32.mrf.mxu1 }
 0x3c2   : > { %v6690_v62 = vpop.f32.mrf.mxu1 }
 0x3c4   : > { %v6692_v17 = vpop.f32.mrf.mxu1 }
 0x428   : > { %v4982_v1 = vpop.f32.mrf.mxu1 }
 0x429   : > { %v2932_v30 = vadd.f32 %v4982_v1, %v4946_v63  ;;  %v2734_v1 = vpop.f32.mrf.mxu0 }
 0x42a   : > { %v2923_v33 = vpop.f32.mrf.mxu1 }
 0x42b   : > { %v6700_v47 = vadd.f32 %v6697_v23, %v2932_v30  ;;  %v2924_v44 = vadd.f32 %v2923_v33, %v2702_v0  ;;  %v4955_v33 = vpop.f32.mrf.mxu0 }
 0x42c   : > { %v4983_v2 = vpop.f32.mrf.mxu1 }
 0x42d   : > { %v4828_v31 = vmul.f32 -1.442695, %v6700_v47  ;;  %v6704_v4 = vadd.f32 %v6697_v23, %v2924_v44  ;;  %v2935_v5 = vadd.f32 %v4983_v2, %v4947_v45 }
 0x42e   : > { %v2926_v6 = vpop.f32.mrf.mxu1 }
 0x42f   : > { %5128 = vpow2.f32 %v4828_v31  ;;  %v4826_v34 = vmul.f32 -1.442695, %v6704_v4  ;;  %v6708_v28 = vadd.f32 %v6697_v23, %v2935_v5  ;;  %v2927_v32 = vadd.f32 %v2926_v6, %v2705_v24 }
 0x431   : > { %5130 = vpow2.f32 %v4826_v34  ;;  %v4829_v7 = vmul.f32 -1.442695, %v6708_v28  ;;  %v6712_v8 = vadd.f32 %v6697_v23, %v2927_v32 }
 0x433   : > { %5132 = vpow2.f32 %v4829_v7  ;;  %v4827_v11 = vmul.f32 -1.442695, %v6712_v8 }
 0x435   : > { %5134 = vpow2.f32 %v4827_v11 }
 0x438   : > { %v4986_v13 = vpop.f32.mrf.mxu1 }
 0x439   : > { %v2948_v19 = vadd.f32 %v4986_v13, %v4950_v9  ;;  %v2737_v9 = vpop.f32.mrf.mxu0 }
 0x43a   : > { %v2939_v14 = vpop.f32.mrf.mxu1 }
 0x43b   : > { %v6716_v15 = vadd.f32 %v6697_v23, %v2948_v19  ;;  %v2940_v16 = vadd.f32 %v2939_v14, %v2718_v12 }
 0x43c   : > { %v5129_v18 = vpop.eup %5128  ;;  %v4987_v22 = vpop.f32.mrf.mxu1 }
 0x43d   : > { %v3187_v27 = vadd.f32 1.0, %v5129_v18  ;;  %v4832_v35 = vmul.f32 -1.442695, %v6716_v15  ;;  %v6720_v36 = vadd.f32 %v6697_v23, %v2940_v16  ;;  %v2951_v37 = vadd.f32 %v4987_v22, %v4951_v21 }
 0x43e   : > { %v5131_v29 = vpop.eup %5130  ;;  %v2942_v46 = vpop.f32.mrf.mxu1 }
 0x43f   : > { %5136 = vrcp.f32 %v3187_v27  ;;  %v3185_v56 = vadd.f32 1.0, %v5131_v29  ;;  %v4830_v57 = vmul.f32 -1.442695, %v6720_v36  ;;  %v6724_v61 = vadd.f32 %v6697_v23, %v2951_v37 }
 0x440   : > { %v5133_v48 = vpop.eup %5132  ;;  %5138 = vpow2.f32 %v4832_v35  ;;  %v2943_v51 = vadd.f32 %v2942_v46, %v2721_v20 }
 0x441   : > { %5140 = vrcp.f32 %v3185_v56  ;;  %v3188_v39 = vadd.f32 1.0, %v5133_v48  ;;  %v4833_v40 = vmul.f32 -1.442695, %v6724_v61 }
 0x442   : > { %v5135_v54 = vpop.eup %5134  ;;  %5142 = vpow2.f32 %v4830_v57  ;;  %v6728_v49 = vadd.f32 %v6697_v23, %v2943_v51  ;;  %v4958_v51 = vpop.f32.mrf.mxu0 }
 0x443   : > { %5144 = vrcp.f32 %v3188_v39  ;;  %v3186_v63 = vadd.f32 1.0, %v5135_v54 }
 0x444   : > { %5146 = vpow2.f32 %v4833_v40  ;;  %v4831_v0 = vmul.f32 -1.442695, %v6728_v49 }
 0x445   : > { %5148 = vrcp.f32 %v3186_v63  ;;  %v2750_v63 = vpop.f32.mrf.mxu0 }
 0x446   : > { %5150 = vpow2.f32 %v4831_v0 }
 0x448   : > { %v4990_v45 = vpop.f32.mrf.mxu1 }
 0x449   : > { %v2964_v30 = vadd.f32 %v4990_v45, %v4954_v43 }
 0x44a   : > { %v2955_v44 = vpop.f32.mrf.mxu1 }
 0x44b   : > { %v6732_v2 = vadd.f32 %v6697_v23, %v2964_v30  ;;  %v2956_v24 = vadd.f32 %v2955_v44, %v2734_v1  ;;  %v4959_v1 = vpop.f32.mrf.mxu0 }
 0x44c   : > { %v5137_v31 = vpop.eup %5136  ;;  %v4991_v5 = vpop.f32.mrf.mxu1 }
 0x44d   : > { %v5139_v6 = vpop.eup %5138  ;;  %v4836_v34 = vmul.f32 -1.442695, %v6732_v2  ;;  %v6736_v32 = vadd.f32 %v6697_v23, %v2956_v24  ;;  %v2967_v7 = vadd.f32 %v4991_v5, %v4955_v33  ;;  %v3283_v39 = vmul.f32 %v5137_v31, %v6700_v47 }
 0x44e   : > { %v5141_v11 = vpop.eup %5140  ;;  %v3191_v12 = vadd.f32 1.0, %v5139_v6  ;;  %v2958_v13 = vpop.f32.mrf.mxu1 }
 0x44f   : > { %v5143_v19 = vpop.eup %5142  ;;  %5152 = vpow2.f32 %v4836_v34  ;;  %v4834_v21 = vmul.f32 -1.442695, %v6736_v32  ;;  %v6740_v14 = vadd.f32 %v6697_v23, %v2967_v7  ;;  %v2959_v22 = vadd.f32 %v2958_v13, %v2737_v9 }
 0x450   : > { %v5145_v16 = vpop.eup %5144  ;;  %5154 = vrcp.f32 %v3191_v12  ;;  %v3189_v18 = vadd.f32 1.0, %v5143_v19  ;;  %v3281_v57 = vmul.f32 %v5141_v11, %v6704_v4  ;;  %v2753_v12 = vpop.f32.mrf.mxu0 }
 0x451   : > { %v5147_v27 = vpop.eup %5146  ;;  %5156 = vpow2.f32 %v4834_v21  ;;  %v4837_v35 = vmul.f32 -1.442695, %v6740_v14  ;;  %v3284_v20 = vmul.f32 %v5145_v16, %v6708_v28  ;;  %v6745_v46 = vadd.f32 %v6697_v23, %v2959_v22 }
 0x452   : > { %v5149_v37 = vpop.eup %5148  ;;  %5158 = vrcp.f32 %v3189_v18  ;;  %v3192_v29 = vadd.f32 1.0, %v5147_v27 }
 0x453   : > { %v5151_v56 = vpop.eup %5150  ;;  %v3282_v48 = vmul.f32 %v5149_v37, %v6712_v8  ;;  %5160 = vpow2.f32 %v4837_v35  ;;  %v4835_v43 = vmul.f32 -1.442695, %v6745_v46  ;;  %v3314_v54 = vpack.c.bf16 %v3284_v20, %v3283_v39 }
 0x454   : > { %5162 = vrcp.f32 %v3192_v29  ;;  %v3190_v40 = vadd.f32 1.0, %v5151_v56 }
 0x455   : > { %v3313_v28 = vpack.c.bf16 %v3282_v48, %v3281_v57 }
 0x456   : > { %5164 = vrcp.f32 %v3190_v40 }
 0x457   : > { %5166 = vpow2.f32 %v4835_v43  ;;  %5020 = vmatprep.mubr.msk.bf16.mxu0 %vm3368_vm7, %v3313_v28 }
 0x458   : > { %v4994_v0 = vpop.f32.mrf.mxu1  ;;  %5021 = vmatmul.mubr.msk.bf16.vlgmr.msra.gmra.mxu0 %vm3368_vm7, %v3314_v54 }
 0x459   : > { %v2980_v4 = vadd.f32 %v4994_v0, %v4958_v51 }
 0x45a   : > { %v2971_v8 = vpop.f32.mrf.mxu1 }
 0x45b   : > { %v6754_v45 = vadd.f32 %v6697_v23, %v2980_v4  ;;  %v2972_v47 = vadd.f32 %v2971_v8, %v2750_v63 }
 0x45c   : > { %v5153_v30 = vpop.eup %5152  ;;  %v4995_v33 = vpop.f32.mrf.mxu1 }
 0x45d   : > { %v5155_v44 = vpop.eup %5154  ;;  %v3195_v24 = vadd.f32 1.0, %v5153_v30  ;;  %v4840_v31 = vmul.f32 -1.442695, %v6754_v45  ;;  %v6758_v5 = vadd.f32 %v6697_v23, %v2972_v47  ;;  %v2983_v6 = vadd.f32 %v4995_v33, %v4959_v1 }
 0x45e   : > { %v5157_v34 = vpop.eup %5156  ;;  %v2974_v7 = vpop.f32.mrf.mxu1  ;;  %v3287_v48 = vmul.f32 %v5155_v44, %v6716_v15 }
 0x45f   : > { %v5159_v9 = vpop.eup %5158  ;;  %5168 = vrcp.f32 %v3195_v24  ;;  %v3193_v11 = vadd.f32 1.0, %v5157_v34  ;;  %v4838_v13 = vmul.f32 -1.442695, %v6758_v5  ;;  %v6762_v19 = vadd.f32 %v6697_v23, %v2983_v6 }
 0x460   : > { %v5161_v21 = vpop.eup %5160  ;;  %5170 = vpow2.f32 %v4840_v31  ;;  %v2975_v16 = vadd.f32 %v2974_v7, %v2753_v12  ;;  %v4998_v18 = vpop.f32.mrf.mxu1  ;;  %v3285_v43 = vmul.f32 %v5159_v9, %v6720_v36 }
 0x461   : > { %v5163_v22 = vpop.eup %5162  ;;  %5172 = vrcp.f32 %v3193_v11  ;;  %v3196_v27 = vadd.f32 1.0, %v5161_v21  ;;  %v4841_v35 = vmul.f32 -1.442695, %v6762_v19  ;;  %v2996_v37 = vadd.f32 %v4998_v18, %v6662_v50 }
 0x462   : > { %v3288_v20 = vmul.f32 %v5163_v22, %v6724_v61  ;;  %5174 = vpow2.f32 %v4838_v13  ;;  %v6768_v29 = vadd.f32 %v6697_v23, %v2975_v16  ;;  %v2987_v56 = vpop.f32.mrf.mxu1 }
 0x463   : > { %v5165_v57 = vpop.eup %5164  ;;  %5176 = vrcp.f32 %v3196_v27  ;;  %v6772_v51 = vadd.f32 %v6697_v23, %v2996_v37  ;;  %v2988_v39 = vadd.f32 %v2987_v56, %v6664_v55 }
 0x464   : > { %v5167_v40 = vpop.eup %5166  ;;  %v3286_v50 = vmul.f32 %v5165_v57, %v6728_v49  ;;  %5178 = vpow2.f32 %v4841_v35  ;;  %v4839_v61 = vmul.f32 -1.442695, %v6768_v29  ;;  %v4999_v28 = vpop.f32.mrf.mxu1  ;;  %v3316_v4 = vpack.c.bf16 %v3288_v20, %v3287_v48 }
 0x465   : > { %v3194_v54 = vadd.f32 1.0, %v5167_v40  ;;  %v4844_v63 = vmul.f32 -1.442695, %v6772_v51  ;;  %v6780_v15 = vadd.f32 %v6697_v23, %v2988_v39  ;;  %v2999_v0 = vadd.f32 %v4999_v28, %v6666_v58 }
 0x466   : > { %v3315_v8 = vpack.c.bf16 %v3286_v50, %v3285_v43  ;;  %5180 = vpow2.f32 %v4839_v61  ;;  %v2990_v55 = vpop.f32.mrf.mxu1 }
 0x467   : > { %5182 = vrcp.f32 %v3194_v54  ;;  %v4842_v36 = vmul.f32 -1.442695, %v6780_v15  ;;  %v6785_v49 = vadd.f32 %v6697_v23, %v2999_v0  ;;  %v2991_v1 = vadd.f32 %v2990_v55, %v6668_v42 }
 0x468   : > { %5184 = vpow2.f32 %v4844_v63  ;;  %5024 = vmatprep.mubr.msk.bf16.mxu0 %vm3368_vm7, %v3315_v8  ;;  %v5002_v47 = vpop.f32.mrf.mxu1 }
 0x469   : > { %5186 = vpow2.f32 %v4842_v36  ;;  %v4845_v30 = vmul.f32 -1.442695, %v6785_v49  ;;  %v6791_v58 = vadd.f32 %v6697_v23, %v2991_v1  ;;  %v3012_v33 = vadd.f32 %v5002_v47, %v6670_v59  ;;  %5025 = vmatmul.mubr.msk.bf16.gmra.mxu0 %vm3368_vm7, %v3316_v4 }
 0x46a   : > { %v3003_v44 = vpop.f32.mrf.mxu1 }
 0x46b   : > { %5188 = vpow2.f32 %v4845_v30  ;;  %v4843_v24 = vmul.f32 -1.442695, %v6791_v58  ;;  %v6797_v42 = vadd.f32 %v6697_v23, %v3012_v33  ;;  %v3004_v31 = vadd.f32 %v3003_v44, %v6672_v60 }
 0x46c   : > { %v5169_v6 = vpop.eup %5168  ;;  %v5003_v34 = vpop.f32.mrf.mxu1 }
 0x46d   : > { %v5171_v7 = vpop.eup %5170  ;;  %5190 = vpow2.f32 %v4843_v24  ;;  %v4848_v9 = vmul.f32 -1.442695, %v6797_v42  ;;  %v6802_v11 = vadd.f32 %v6697_v23, %v3004_v31  ;;  %v3015_v13 = vadd.f32 %v5003_v34, %v6674_v3 }
 0x46e   : > { %v5173_v59 = vpop.eup %5172  ;;  %v3199_v12 = vadd.f32 1.0, %v5171_v7  ;;  %v3006_v21 = vpop.f32.mrf.mxu1  ;;  %v3291_v54 = vmul.f32 %v5169_v6, %v6732_v2 }
 0x46f   : > { %v5175_v16 = vpop.eup %5174  ;;  %5192 = vpow2.f32 %v4848_v9  ;;  %v4846_v18 = vmul.f32 -1.442695, %v6802_v11  ;;  %v3007_v60 = vadd.f32 %v3006_v21, %v6676_v10  ;;  %v6808_v35 = vadd.f32 %v6697_v23, %v3015_v13 }
 0x470   : > { %v5177_v22 = vpop.eup %5176  ;;  %v3197_v27 = vadd.f32 1.0, %v5175_v16  ;;  %v5006_v37 = vpop.f32.mrf.mxu1  ;;  %v3289_v0 = vmul.f32 %v5173_v59, %v6736_v32 }
 0x471   : > { %v5179_v20 = vpop.eup %5178  ;;  %5194 = vpow2.f32 %v4846_v18  ;;  %v6811_v56 = vadd.f32 %v6697_v23, %v3007_v60  ;;  %v3028_v3 = vadd.f32 %v5006_v37, %v6678_v53  ;;  %v3292_v57 = vmul.f32 %v5177_v22, %v6740_v14 }
 0x472   : > { %5196 = vrcp.f32 %v3199_v12  ;;  %v3200_v48 = vadd.f32 1.0, %v5179_v20  ;;  %v4849_v39 = vmul.f32 -1.442695, %v6808_v35  ;;  %v3019_v10 = vpop.f32.mrf.mxu1 }
 0x473   : > { %v5181_v40 = vpop.eup %5180  ;;  %5198 = vrcp.f32 %v3197_v27  ;;  %v4847_v43 = vmul.f32 -1.442695, %v6811_v56  ;;  %v6818_v50 = vadd.f32 %v6697_v23, %v3028_v3  ;;  %v3020_v61 = vadd.f32 %v3019_v10, %v6680_v52 }
 0x474   : > { %v5183_v28 = vpop.eup %5182  ;;  %5200 = vrcp.f32 %v3200_v48  ;;  %v3198_v53 = vadd.f32 1.0, %v5181_v40  ;;  %v5007_v14 = vpop.f32.mrf.mxu1  ;;  %v3318_v47 = vpack.c.bf16 %v3292_v57, %v3291_v54 }
 0x475   : > { %v5185_v63 = vpop.eup %5184  ;;  %v3290_v4 = vmul.f32 %v5183_v28, %v6745_v46  ;;  %5202 = vpow2.f32 %v4849_v39  ;;  %v6825_v8 = vadd.f32 %v6697_v23, %v3020_v61  ;;  %v4852_v52 = vmul.f32 -1.442695, %v6818_v50 }
 0x476   : > { %v5187_v55 = vpop.eup %5186  ;;  %5204 = vrcp.f32 %v3198_v53  ;;  %v3203_v36 = vadd.f32 1.0, %v5185_v63  ;;  %v3031_v1 = vadd.f32 %v5007_v14, %v6682_v41  ;;  %v3022_v2 = vpop.f32.mrf.mxu1 }
 0x477   : > { %v3317_v30 = vpack.c.bf16 %v3290_v4, %v3289_v0  ;;  %v3201_v33 = vadd.f32 1.0, %v5187_v55  ;;  %5206 = vpow2.f32 %v4847_v43  ;;  %v4850_v32 = vmul.f32 -1.442695, %v6825_v8 }
 0x478   : > { %v5189_v44 = vpop.eup %5188  ;;  %5208 = vrcp.f32 %v3203_v36  ;;  %v6831_v46 = vadd.f32 %v6697_v23, %v3031_v1  ;;  %v3023_v24 = vadd.f32 %v3022_v2, %v6684_v25  ;;  %v5010_v31 = vpop.f32.mrf.mxu1 }
 0x479   : > { %5210 = vrcp.f32 %v3201_v33  ;;  %v3204_v6 = vadd.f32 1.0, %v5189_v44  ;;  %5028 = vmatprep.mubr.msk.bf16.mxu0 %vm3368_vm7, %v3317_v30  ;;  %v3044_v41 = vadd.f32 %v5010_v31, %v6686_v26 }
 0x47a   : > { %v5191_v34 = vpop.eup %5190  ;;  %5212 = vpow2.f32 %v4852_v52  ;;  %v4853_v7 = vmul.f32 -1.442695, %v6831_v46  ;;  %v6838_v9 = vadd.f32 %v6697_v23, %v3023_v24  ;;  %5029 = vmatmul.mubr.msk.bf16.gmra.mxu0 %vm3368_vm7, %v3318_v47  ;;  %v3035_v59 = vpop.f32.mrf.mxu1 }
 0x47b   : > { %5214 = vrcp.f32 %v3204_v6  ;;  %v3202_v12 = vadd.f32 1.0, %v5191_v34  ;;  %v6842_v25 = vadd.f32 %v6697_v23, %v3044_v41  ;;  %v3036_v13 = vadd.f32 %v3035_v59, %v6688_v38 }
 0x47c   : > { %v5193_v21 = vpop.eup %5192  ;;  %5216 = vpow2.f32 %v4850_v32  ;;  %v4851_v26 = vmul.f32 -1.442695, %v6838_v9  ;;  %v5011_v16 = vpop.f32.mrf.mxu1 }
 0x47d   : > { %5218 = vrcp.f32 %v3202_v12  ;;  %v3207_v18 = vadd.f32 1.0, %v5193_v21  ;;  %v6847_v60 = vadd.f32 %v6697_v23, %v3036_v13  ;;  %v4856_v27 = vmul.f32 -1.442695, %v6842_v25 }
 0x47e   : > { %v5195_v22 = vpop.eup %5194  ;;  %5220 = vpow2.f32 %v4853_v7  ;;  %v3047_v37 = vadd.f32 %v5011_v16, %v6690_v62  ;;  %v3038_v20 = vpop.f32.mrf.mxu1 }
 0x47f   : > { %v5197_v3 = vpop.eup %5196  ;;  %5222 = vrcp.f32 %v3207_v18  ;;  %v3205_v38 = vadd.f32 1.0, %v5195_v22  ;;  %v4854_v57 = vmul.f32 -1.442695, %v6847_v60  ;;  %v3039_v48 = vadd.f32 %v3038_v20, %v6692_v17 }
 0x480   : > { %v5199_v39 = vpop.eup %5198  ;;  %5224 = vpow2.f32 %v4851_v26  ;;  %v6854_v10 = vadd.f32 %v6697_v23, %v3047_v37 }
 0x481   : > { %v5201_v40 = vpop.eup %5200  ;;  %5226 = vrcp.f32 %v3205_v38  ;;  %v6857_v43 = vadd.f32 %v6697_v23, %v3039_v48  ;;  %v3293_v63 = vmul.f32 %v5199_v39, %v6758_v5  ;;  %v3295_v23 = vmul.f32 %v5197_v3, %v6754_v45 }
 0x482   : > { %v5203_v61 = vpop.eup %5202  ;;  %5228 = vpow2.f32 %v4856_v27  ;;  %v4857_v62 = vmul.f32 -1.442695, %v6854_v10  ;;  %v3296_v54 = vmul.f32 %v5201_v40, %v6762_v19 }
 0x483   : > { %v5205_v28 = vpop.eup %5204  ;;  %v3208_v53 = vadd.f32 1.0, %v5203_v61  ;;  %5230 = vpow2.f32 %v4854_v57  ;;  %v4855_v17 = vmul.f32 -1.442695, %v6857_v43 }
 0x484   : > { %v5207_v14 = vpop.eup %5206  ;;  %v3294_v0 = vmul.f32 %v5205_v28, %v6768_v29  ;;  %5232 = vpow2.f32 %v4857_v62  ;;  %v3320_v19 = vpack.c.bf16 %v3296_v54, %v3295_v23 }
 0x485   : > { %v5209_v4 = vpop.eup %5208  ;;  %5234 = vrcp.f32 %v3208_v53  ;;  %v3206_v55 = vadd.f32 1.0, %v5207_v14 }
 0x486   : > { %v5211_v36 = vpop.eup %5210  ;;  %v3319_v52 = vpack.c.bf16 %v3294_v0, %v3293_v63  ;;  %5236 = vpow2.f32 %v4855_v17  ;;  %v3299_v41 = vmul.f32 %v5209_v4, %v6772_v51  ;;  %v6894_v4 = vld [vmem:[%s7511_s25] ss:$0 sm:$0xff] }
 0x487   : > { %v5213_v1 = vpop.eup %5212  ;;  %5238 = vrcp.f32 %v3206_v55  ;;  %v3297_v33 = vmul.f32 %v5211_v36, %v6780_v15 }
 0x488   : > { %v5215_v2 = vpop.eup %5214  ;;  %5032 = vmatprep.mubr.msk.bf16.mxu0 %vm3368_vm7, %v3319_v52  ;;  %v3211_v32 = vadd.f32 1.0, %v5213_v1 }
 0x489   : > { %v5217_v47 = vpop.eup %5216  ;;  %5033 = vmatmul.mubr.msk.bf16.gmra.mxu0 %vm3368_vm7, %v3320_v19  ;;  %v3300_v45 = vmul.f32 %v5215_v2, %v6785_v49 }
 0x48a   : > { %v5219_v5 = vpop.eup %5218  ;;  %v3209_v29 = vadd.f32 1.0, %v5217_v47 }
 0x48b   : > { %v5221_v30 = vpop.eup %5220  ;;  %v3298_v44 = vmul.f32 %v5219_v5, %v6791_v58  ;;  %v3322_v13 = vpack.c.bf16 %v3300_v45, %v3299_v41 }
 0x48c   : > { %v5223_v24 = vpop.eup %5222  ;;  %v3212_v31 = vadd.f32 1.0, %v5221_v30  ;;  %5240 = vrcp.f32 %v3209_v29 }
 0x48d   : > { %v5225_v6 = vpop.eup %5224  ;;  %v3321_v34 = vpack.c.bf16 %v3298_v44, %v3297_v33  ;;  %v3303_v3 = vmul.f32 %v5223_v24, %v6797_v42 }
 0x48e   : > { %v5227_v7 = vpop.eup %5226  ;;  %5242 = vrcp.f32 %v3212_v31  ;;  %v3210_v59 = vadd.f32 1.0, %v5225_v6 }
 0x48f   : > { %v5229_v12 = vpop.eup %5228  ;;  %5244 = vrcp.f32 %v3211_v32  ;;  %5036 = vmatprep.mubr.msk.bf16.mxu0 %vm3368_vm7, %v3321_v34  ;;  %v3301_v37 = vmul.f32 %v5227_v7, %v6802_v11 }
 0x490   : > { %v5231_v15 = vpop.eup %5230  ;;  %5246 = vrcp.f32 %v3210_v59  ;;  %v3215_v51 = vadd.f32 1.0, %v5229_v12 }
 0x491   : > { %v5233_v49 = vpop.eup %5232  ;;  %v3213_v58 = vadd.f32 1.0, %v5231_v15  ;;  %5037 = vmatmul.mubr.msk.bf16.gmra.mxu0 %vm3368_vm7, %v3322_v13 }
 0x492   : > { %v5235_v21 = vpop.eup %5234  ;;  %v3216_v26 = vadd.f32 1.0, %v5233_v49 }
 0x493   : > { %v5237_v16 = vpop.eup %5236  ;;  %v3304_v22 = vmul.f32 %v5235_v21, %v6808_v35  ;;  %5248 = vrcp.f32 %v3213_v58 }
 0x494   : > { %v5239_v18 = vpop.eup %5238  ;;  %v3214_v27 = vadd.f32 1.0, %v5237_v16  ;;  %5250 = vrcp.f32 %v3216_v26 }
 0x495   : > { %v3302_v20 = vmul.f32 %v5239_v18, %v6811_v56  ;;  %v3324_v57 = vpack.c.bf16 %v3304_v22, %v3303_v3 }
 0x496   : > { %5252 = vrcp.f32 %v3214_v27 }
 0x497   : > { %v3323_v38 = vpack.c.bf16 %v3302_v20, %v3301_v37  ;;  %5254 = vrcp.f32 %v3215_v51 }
 0x499   : > { %5040 = vmatprep.mubr.msk.bf16.mxu0 %vm3368_vm7, %v3323_v38  ;;  %v5241_v48 = vpop.eup %5240 }
 0x49a   : > { %5041 = vmatmul.mubr.msk.bf16.gmra.mxu0 %vm3368_vm7, %v3324_v57  ;;  %v3305_v11 = vmul.f32 %v5241_v48, %v6825_v8 }
 0x49b   : > { %v5243_v39 = vpop.eup %5242 }
 0x49c   : > { %v5245_v35 = vpop.eup %5244  ;;  %v3308_v61 = vmul.f32 %v5243_v39, %v6831_v46 }
 0x49d   : > { %v5247_v40 = vpop.eup %5246  ;;  %v3307_v42 = vmul.f32 %v5245_v35, %v6818_v50 }
 0x49e   : > { %v3306_v56 = vmul.f32 %v5247_v40, %v6838_v9 }
 0x49f   : > { %v3326_v54 = vpack.c.bf16 %v3308_v61, %v3307_v42 }
 0x4a0   : > { %v3325_v62 = vpack.c.bf16 %v3306_v56, %v3305_v11  ;;  %v5249_v28 = vpop.eup %5248 }
 0x4a1   : > { %v5251_v53 = vpop.eup %5250  ;;  %v3309_v63 = vmul.f32 %v5249_v28, %v6847_v60 }
 0x4a2   : > { %5044 = vmatprep.mubr.msk.bf16.mxu0 %vm3368_vm7, %v3325_v62  ;;  %v3312_v8 = vmul.f32 %v5251_v53, %v6854_v10 }
 0x4a3   : > { %v5253_v17 = vpop.eup %5252  ;;  %5045 = vmatmul.mubr.msk.bf16.gmra.mxu0 %vm3368_vm7, %v3326_v54 }
 0x4a4   : > { %v5255_v14 = vpop.eup %5254  ;;  %v3310_v46 = vmul.f32 %v5253_v17, %v6857_v43 }
 0x4a5   : > { %v3311_v9 = vmul.f32 %v5255_v14, %v6842_v25 }
 0x4a6   : > { %v3327_v0 = vpack.c.bf16 %v3310_v46, %v3309_v63 }
 0x4a7   : > { %v3328_v50 = vpack.c.bf16 %v3312_v8, %v3311_v9 }
 0x4a8   : > { %5048 = vmatprep.mubr.msk.bf16.mxu0 %vm3368_vm7, %v3327_v0 }
 0x4ab   : > { %5049 = vmatmul.mubr.msk.bf16.gmra.mxu0 %vm3368_vm7, %v3328_v50 }
 0x518   : > { %v5022_v23 = vpop.f32.mrf.mxu0 }
 0x519   : > { %v6897_v60 = vadd.f32 %v5022_v23, %v6894_v4 }
 0x51a   : > { %v3451_v43 = vpop.f32.mrf.mxu0 }
 0x51b   : > { %v6900_v10 = vadd.f32 %v6894_v4, %v3451_v43  ;;  %v3584_v25 = vsel %vm2619_vm5, %v6897_v60, 0.0 }
 0x51c   : > { %3585 = vadd.xlane.f32.xlu1 %v3584_v25  ;;  %v5023_v55 = vpop.f32.mrf.mxu0 }
 0x51d   : > { %v6905_v36 = vadd.f32 %v5023_v55, %v6894_v4  ;;  %v3578_v52 = vsel %vm2619_vm5, %v6900_v10, 0.0 }
 0x51e   : > { %v3454_v1 = vpop.f32.mrf.mxu0  ;;  %3579 = vadd.xlane.f32.xlu0 %v3578_v52 }
 0x51f   : > { %v6910_v19 = vadd.f32 %v6894_v4, %v3454_v1  ;;  %v3587_v2 = vsel %vm2619_vm5, %v6905_v36, 0.0 }
 0x520   : > { %3588 = vadd.xlane.f32.xlu1 %v3587_v2 }
 0x521   : > { %v3581_v47 = vsel %vm2619_vm5, %v6910_v19, 0.0 }
 0x524   : > { %3582 = vadd.xlane.f32.xlu1 %v3581_v47 }
 0x529   : > { %v5026_v5 = vpop.f32.mrf.mxu0 }
 0x52a   : > { %v6917_v29 = vadd.f32 %v5026_v5, %v6894_v4 }
 0x52b   : > { %v3467_v30 = vpop.f32.mrf.mxu0 }
 0x52c   : > { %v6920_v33 = vadd.f32 %v6894_v4, %v3467_v30  ;;  %v3596_v45 = vsel %vm2619_vm5, %v6917_v29, 0.0 }
 0x52d   : > { %3597 = vadd.xlane.f32.xlu0 %v3596_v45  ;;  %v5027_v44 = vpop.f32.mrf.mxu0 }
 0x52e   : > { %v6925_v32 = vadd.f32 %v5027_v44, %v6894_v4  ;;  %v3590_v41 = vsel %vm2619_vm5, %v6920_v33, 0.0 }
 0x52f   : > { %v3470_v24 = vpop.f32.mrf.mxu0 }
 0x530   : > { %v6928_v31 = vadd.f32 %v6894_v4, %v3470_v24  ;;  %v3599_v6 = vsel %vm2619_vm5, %v6925_v32, 0.0 }
 0x531   : > { %3600 = vadd.xlane.f32.xlu1 %v3599_v6  ;;  %3591 = vadd.xlane.f32.xlu0 %v3590_v41 }
 0x532   : > { %v3593_v34 = vsel %vm2619_vm5, %v6928_v31, 0.0 }
 0x535   : > { %3594 = vadd.xlane.f32.xlu1 %v3593_v34 }
 0x53a   : > { %v5030_v7 = vpop.f32.mrf.mxu0 }
 0x53b   : > { %v6937_v59 = vadd.f32 %v5030_v7, %v6894_v4 }
 0x53c   : > { %v3483_v12 = vpop.f32.mrf.mxu0 }
 0x53d   : > { %v6940_v13 = vadd.f32 %v6894_v4, %v3483_v12  ;;  %v3608_v15 = vsel %vm2619_vm5, %v6937_v59, 0.0 }
 0x53e   : > { %3609 = vadd.xlane.f32.xlu0 %v3608_v15  ;;  %v5031_v49 = vpop.f32.mrf.mxu0 }
 0x53f   : > { %v6945_v58 = vadd.f32 %v5031_v49, %v6894_v4  ;;  %v3602_v51 = vsel %vm2619_vm5, %v6940_v13, 0.0 }
 0x540   : > { %v3486_v21 = vpop.f32.mrf.mxu0 }
 0x541   : > { %v6948_v26 = vadd.f32 %v6894_v4, %v3486_v21  ;;  %v3611_v16 = vsel %vm2619_vm5, %v6945_v58, 0.0 }
 0x542   : > { %3612 = vadd.xlane.f32.xlu1 %v3611_v16  ;;  %3603 = vadd.xlane.f32.xlu0 %v3602_v51 }
 0x543   : > { %v3605_v18 = vsel %vm2619_vm5, %v6948_v26, 0.0 }
 0x546   : > { %3606 = vadd.xlane.f32.xlu1 %v3605_v18 }
 0x549   : > { %v5034_v22 = vpop.f32.mrf.mxu0 }
 0x54a   : > { %v6957_v27 = vadd.f32 %v5034_v22, %v6894_v4 }
 0x54b   : > { %v3499_v37 = vpop.f32.mrf.mxu0 }
 0x54c   : > { %v6960_v20 = vadd.f32 %v6894_v4, %v3499_v37  ;;  %v3620_v3 = vsel %vm2619_vm5, %v6957_v27, 0.0 }
 0x54d   : > { %3621 = vadd.xlane.f32.xlu0 %v3620_v3  ;;  %v5035_v38 = vpop.f32.mrf.mxu0 }
 0x54e   : > { %v6965_v57 = vadd.f32 %v5035_v38, %v6894_v4  ;;  %v3614_v40 = vsel %vm2619_vm5, %v6960_v20, 0.0 }
 0x54f   : > { %v3502_v48 = vpop.f32.mrf.mxu0 }
 0x550   : > { %v6968_v39 = vadd.f32 %v6894_v4, %v3502_v48  ;;  %v3623_v35 = vsel %vm2619_vm5, %v6965_v57, 0.0 }
 0x551   : > { %3624 = vadd.xlane.f32.xlu1 %v3623_v35  ;;  %v5038_v61 = vpop.f32.mrf.mxu0  ;;  %3615 = vadd.xlane.f32.xlu0 %v3614_v40 }
 0x552   : > { %v6975_v11 = vadd.f32 %v5038_v61, %v6894_v4  ;;  %v3617_v62 = vsel %vm2619_vm5, %v6968_v39, 0.0 }
 0x553   : > { %v3515_v56 = vpop.f32.mrf.mxu0 }
 0x554   : > { %v6978_v42 = vadd.f32 %v6894_v4, %v3515_v56  ;;  %v3632_v28 = vsel %vm2619_vm5, %v6975_v11, 0.0 }
 0x555   : > { %v5039_v54 = vpop.f32.mrf.mxu0  ;;  %3618 = vadd.xlane.f32.xlu1 %v3617_v62  ;;  %3633 = vadd.xlane.f32.xlu0 %v3632_v28 }
 0x556   : > { %v6985_v53 = vadd.f32 %v5039_v54, %v6894_v4  ;;  %v3626_v46 = vsel %vm2619_vm5, %v6978_v42, 0.0 }
 0x557   : > { %v3518_v17 = vpop.f32.mrf.mxu0 }
 0x558   : > { %v6988_v14 = vadd.f32 %v6894_v4, %v3518_v17  ;;  %v3635_v63 = vsel %vm2619_vm5, %v6985_v53, 0.0 }
 0x559   : > { %3636 = vadd.xlane.f32.xlu1 %v3635_v63  ;;  %3627 = vadd.xlane.f32.xlu0 %v3626_v46 }
 0x55a   : > { %v5042_v8 = vpop.f32.mrf.mxu0  ;;  %v3629_v50 = vsel %vm2619_vm5, %v6988_v14, 0.0 }
 0x55b   : > { %v6995_v0 = vadd.f32 %v5042_v8, %v6894_v4 }
 0x55c   : > { %v3531_v9 = vpop.f32.mrf.mxu0 }
 0x55d   : > { %v7000_v23 = vadd.f32 %v6894_v4, %v3531_v9  ;;  %3630 = vadd.xlane.f32.xlu1 %v3629_v50  ;;  %v3644_v43 = vsel %vm2619_vm5, %v6995_v0, 0.0 }
 0x55e   : > { %v5043_v25 = vpop.f32.mrf.mxu0  ;;  %3645 = vadd.xlane.f32.xlu0 %v3644_v43 }
 0x55f   : > { %v7005_v55 = vadd.f32 %v5043_v25, %v6894_v4  ;;  %v3638_v47 = vsel %vm2619_vm5, %v7000_v23, 0.0 }
 0x560   : > { %v3534_v52 = vpop.f32.mrf.mxu0 }
 0x561   : > { %v7008_v1 = vadd.f32 %v6894_v4, %v3534_v52  ;;  %v3647_v2 = vsel %vm2619_vm5, %v7005_v55, 0.0 }
 0x562   : > { %3648 = vadd.xlane.f32.xlu1 %v3647_v2  ;;  %3639 = vadd.xlane.f32.xlu0 %v3638_v47 }
 0x563   : > { %v5046_v5 = vpop.f32.mrf.mxu0  ;;  %v3641_v44 = vsel %vm2619_vm5, %v7008_v1, 0.0 }
 0x564   : > { %v7015_v30 = vadd.f32 %v5046_v5, %v6894_v4 }
 0x565   : > { %v3547_v45 = vpop.f32.mrf.mxu0 }
 0x566   : > { %v7020_v24 = vadd.f32 %v6894_v4, %v3547_v45  ;;  %3642 = vadd.xlane.f32.xlu1 %v3641_v44  ;;  %v3656_v6 = vsel %vm2619_vm5, %v7015_v30, 0.0 }
 0x567   : > { %v5047_v41 = vpop.f32.mrf.mxu0  ;;  %3657 = vadd.xlane.f32.xlu0 %v3656_v6 }
 0x568   : > { %v7025_v34 = vadd.f32 %v5047_v41, %v6894_v4  ;;  %v3650_v49 = vsel %vm2619_vm5, %v7020_v24, 0.0 }
 0x569   : > { %v3550_v7 = vpop.f32.mrf.mxu0 }
 0x56a   : > { %v7028_v12 = vadd.f32 %v6894_v4, %v3550_v7  ;;  %v3659_v15 = vsel %vm2619_vm5, %v7025_v34, 0.0 }
 0x56b   : > { %v5050_v21 = vpop.f32.mrf.mxu0  ;;  %3660 = vadd.xlane.f32.xlu1 %v3659_v15  ;;  %3651 = vadd.xlane.f32.xlu0 %v3650_v49 }
 0x56c   : > { %v3653_v18 = vsel %vm2619_vm5, %v7028_v12, 0.0  ;;  %v7040_v37 = vadd.f32 %v5050_v21, %v6894_v4 }
 0x56d   : > { %v3563_v16 = vpop.f32.mrf.mxu0 }
 0x56e   : > { %v7035_v51 = vadd.f32 %v6894_v4, %v3563_v16  ;;  %v3668_v61 = vsel %vm2619_vm5, %v7040_v37, 0.0 }
 0x56f   : > { %v5051_v22 = vpop.f32.mrf.mxu0  ;;  %3654 = vadd.xlane.f32.xlu1 %v3653_v18 }
 0x570   : > { %v3662_v3 = vsel %vm2619_vm5, %v7035_v51, 0.0  ;;  %v7048_v35 = vadd.f32 %v5051_v22, %v6894_v4 }
 0x571   : > { %v3566_v38 = vpop.f32.mrf.mxu0  ;;  %3663 = vadd.xlane.f32.xlu0 %v3662_v3 }
 0x572   : > { %v7045_v48 = vadd.f32 %v6894_v4, %v3566_v38  ;;  %v3671_v56 = vsel %vm2619_vm5, %v7048_v35, 0.0 }
 0x574   : > { %v3665_v40 = vsel %vm2619_vm5, %v7045_v48, 0.0 }
 0x575   : > { %3666 = vadd.xlane.f32.xlu1 %v3665_v40  ;;  %3669 = vadd.xlane.f32.xlu0 %v3668_v61 }
 0x579   : > { %3672 = vadd.xlane.f32.xlu1 %v3671_v56 }
 0x5a5   : > { %v3586_v62 = vpop.xlane.xlu1 %3585 }
 0x5a6   : > { %v3677_v28 = vmul.f32 0.03125, %v3586_v62 }
 0x5a7   : > { %v3580_v54 = vpop.xlane.xlu0 %3579 }
 0x5a8   : > { %v7057_v17 = vsub.f32 %v6897_v60, %v3677_v28  ;;  %v3675_v4 = vmul.f32 0.03125, %v3580_v54 }
 0x5a9   : > { %v3589_v63 = vpop.xlane.xlu1 %3588 }
 0x5aa   : > { %v7060_v46 = vsub.f32 %v6900_v10, %v3675_v4  ;;  %v3678_v8 = vmul.f32 0.03125, %v3589_v63  ;;  %v3741_v9 = vmul.f32 %v7057_v17, %v7057_v17 }
 0x5ac   : > { %v7065_v50 = vsub.f32 %v6905_v36, %v3678_v8  ;;  %v3777_v43 = vsel %vm2619_vm5, %v3741_v9, 0.0  ;;  %v3739_v25 = vmul.f32 %v7060_v46, %v7060_v46 }
 0x5ad   : > { %v3583_v52 = vpop.xlane.xlu1 %3582  ;;  %3778 = vadd.xlane.f32.xlu0 %v3777_v43 }
 0x5ae   : > { %v3676_v60 = vmul.f32 0.03125, %v3583_v52  ;;  %v3742_v2 = vmul.f32 %v7065_v50, %v7065_v50  ;;  %v3771_v5 = vsel %vm2619_vm5, %v3739_v25, 0.0 }
 0x5b0   : > { %v7073_v10 = vsub.f32 %v6910_v19, %v3676_v60  ;;  %v3780_v47 = vsel %vm2619_vm5, %v3742_v2, 0.0 }
 0x5b1   : > { %3781 = vadd.xlane.f32.xlu1 %v3780_v47  ;;  %3772 = vadd.xlane.f32.xlu0 %v3771_v5 }
 0x5b2   : > { %v3740_v36 = vmul.f32 %v7073_v10, %v7073_v10 }
 0x5b4   : > { %v3774_v45 = vsel %vm2619_vm5, %v3740_v36, 0.0 }
 0x5b5   : > { %3775 = vadd.xlane.f32.xlu1 %v3774_v45 }
 0x5b6   : > { %v3598_v44 = vpop.xlane.xlu0 %3597 }
 0x5b7   : > { %v3681_v6 = vmul.f32 0.03125, %v3598_v44 }
 0x5b9   : > { %v7081_v41 = vsub.f32 %v6917_v29, %v3681_v6 }
 0x5ba   : > { %v3601_v7 = vpop.xlane.xlu1 %3600  ;;  %v3592_v19 = vpop.xlane.xlu0 %3591 }
 0x5bb   : > { %v3682_v15 = vmul.f32 0.03125, %v3601_v7  ;;  %v3679_v49 = vmul.f32 0.03125, %v3592_v19  ;;  %v3745_v21 = vmul.f32 %v7081_v41, %v7081_v41 }
 0x5bd   : > { %v7086_v16 = vsub.f32 %v6925_v32, %v3682_v15  ;;  %v7089_v18 = vsub.f32 %v6920_v33, %v3679_v49  ;;  %v3789_v22 = vsel %vm2619_vm5, %v3745_v21, 0.0 }
 0x5be   : > { %v3595_v3 = vpop.xlane.xlu1 %3594  ;;  %3790 = vadd.xlane.f32.xlu0 %v3789_v22 }
 0x5bf   : > { %v3680_v38 = vmul.f32 0.03125, %v3595_v3  ;;  %v3746_v29 = vmul.f32 %v7086_v16, %v7086_v16  ;;  %v3743_v40 = vmul.f32 %v7089_v18, %v7089_v18 }
 0x5c1   : > { %v7097_v61 = vsub.f32 %v6928_v31, %v3680_v38  ;;  %v3792_v32 = vsel %vm2619_vm5, %v3746_v29, 0.0  ;;  %v3783_v56 = vsel %vm2619_vm5, %v3743_v40, 0.0 }
 0x5c2   : > { %3793 = vadd.xlane.f32.xlu1 %v3792_v32  ;;  %3784 = vadd.xlane.f32.xlu0 %v3783_v56 }
 0x5c3   : > { %v3744_v33 = vmul.f32 %v7097_v61, %v7097_v61 }
 0x5c5   : > { %v3786_v62 = vsel %vm2619_vm5, %v3744_v33, 0.0 }
 0x5c6   : > { %3787 = vadd.xlane.f32.xlu1 %v3786_v62 }
 0x5c7   : > { %v3610_v28 = vpop.xlane.xlu0 %3609 }
 0x5c8   : > { %v3685_v54 = vmul.f32 0.03125, %v3610_v28 }
 0x5ca   : > { %v7105_v4 = vsub.f32 %v6937_v59, %v3685_v54 }
 0x5cb   : > { %v3613_v63 = vpop.xlane.xlu1 %3612  ;;  %v3604_v31 = vpop.xlane.xlu0 %3603 }
 0x5cc   : > { %v3686_v8 = vmul.f32 0.03125, %v3613_v63  ;;  %v3683_v9 = vmul.f32 0.03125, %v3604_v31  ;;  %v3749_v43 = vmul.f32 %v7105_v4, %v7105_v4 }
 0x5ce   : > { %v7110_v25 = vsub.f32 %v6945_v58, %v3686_v8  ;;  %v7113_v52 = vsub.f32 %v6940_v13, %v3683_v9  ;;  %v3801_v60 = vsel %vm2619_vm5, %v3749_v43, 0.0 }
 0x5cf   : > { %v3607_v2 = vpop.xlane.xlu1 %3606  ;;  %3802 = vadd.xlane.f32.xlu0 %v3801_v60 }
 0x5d0   : > { %v3684_v47 = vmul.f32 0.03125, %v3607_v2  ;;  %v3750_v59 = vmul.f32 %v7110_v25, %v7110_v25  ;;  %v3747_v5 = vmul.f32 %v7113_v52, %v7113_v52 }
 0x5d2   : > { %v7121_v36 = vsub.f32 %v6948_v26, %v3684_v47  ;;  %v3804_v58 = vsel %vm2619_vm5, %v3750_v59, 0.0  ;;  %v3795_v45 = vsel %vm2619_vm5, %v3747_v5, 0.0 }
 0x5d3   : > { %3805 = vadd.xlane.f32.xlu1 %v3804_v58  ;;  %3796 = vadd.xlane.f32.xlu0 %v3795_v45 }
 0x5d4   : > { %v3748_v13 = vmul.f32 %v7121_v36, %v7121_v36 }
 0x5d6   : > { %v3798_v44 = vsel %vm2619_vm5, %v3748_v13, 0.0  ;;  %v3622_v6 = vpop.xlane.xlu0 %3621 }
 0x5d7   : > { %3799 = vadd.xlane.f32.xlu1 %v3798_v44  ;;  %v3689_v7 = vmul.f32 0.03125, %v3622_v6 }
 0x5d9   : > { %v7129_v19 = vsub.f32 %v6957_v27, %v3689_v7 }
 0x5da   : > { %v3625_v15 = vpop.xlane.xlu1 %3624  ;;  %v3616_v26 = vpop.xlane.xlu0 %3615 }
 0x5db   : > { %v3690_v49 = vmul.f32 0.03125, %v3625_v15  ;;  %v3687_v21 = vmul.f32 0.03125, %v3616_v26  ;;  %v3753_v22 = vmul.f32 %v7129_v19, %v7129_v19 }
 0x5dd   : > { %v7134_v3 = vsub.f32 %v6965_v57, %v3690_v49  ;;  %v7137_v38 = vsub.f32 %v6960_v20, %v3687_v21  ;;  %v3813_v29 = vsel %vm2619_vm5, %v3753_v22, 0.0 }
 0x5de   : > { %v3619_v40 = vpop.xlane.xlu1 %3618  ;;  %3814 = vadd.xlane.f32.xlu0 %v3813_v29  ;;  %v3634_v32 = vpop.xlane.xlu0 %3633 }
 0x5df   : > { %v3688_v27 = vmul.f32 0.03125, %v3619_v40  ;;  %v3693_v56 = vmul.f32 0.03125, %v3634_v32  ;;  %v3754_v33 = vmul.f32 %v7134_v3, %v7134_v3  ;;  %v3751_v62 = vmul.f32 %v7137_v38, %v7137_v38 }
 0x5e1   : > { %v7145_v28 = vsub.f32 %v6968_v39, %v3688_v27  ;;  %v7148_v57 = vsub.f32 %v6975_v11, %v3693_v56  ;;  %v3816_v20 = vsel %vm2619_vm5, %v3754_v33, 0.0  ;;  %v3807_v54 = vsel %vm2619_vm5, %v3751_v62, 0.0 }
 0x5e2   : > { %3817 = vadd.xlane.f32.xlu1 %v3816_v20  ;;  %v3637_v63 = vpop.xlane.xlu1 %3636  ;;  %3808 = vadd.xlane.f32.xlu0 %v3807_v54  ;;  %v3628_v31 = vpop.xlane.xlu0 %3627 }
 0x5e3   : > { %v3694_v8 = vmul.f32 0.03125, %v3637_v63  ;;  %v3691_v9 = vmul.f32 0.03125, %v3628_v31  ;;  %v3752_v43 = vmul.f32 %v7145_v28, %v7145_v28  ;;  %v3757_v39 = vmul.f32 %v7148_v57, %v7148_v57 }
 0x5e5   : > { %v7157_v60 = vsub.f32 %v6985_v53, %v3694_v8  ;;  %v7160_v11 = vsub.f32 %v6978_v42, %v3691_v9  ;;  %v3810_v2 = vsel %vm2619_vm5, %v3752_v43, 0.0  ;;  %v3825_v47 = vsel %vm2619_vm5, %v3757_v39, 0.0 }
 0x5e6   : > { %3811 = vadd.xlane.f32.xlu1 %v3810_v2  ;;  %v3631_v59 = vpop.xlane.xlu1 %3630  ;;  %3826 = vadd.xlane.f32.xlu0 %v3825_v47 }
 0x5e7   : > { %v3692_v5 = vmul.f32 0.03125, %v3631_v59  ;;  %v3646_v58 = vpop.xlane.xlu0 %3645  ;;  %v3758_v45 = vmul.f32 %v7157_v60, %v7157_v60  ;;  %v3755_v13 = vmul.f32 %v7160_v11, %v7160_v11 }
 0x5e8   : > { %v3697_v53 = vmul.f32 0.03125, %v3646_v58 }
 0x5e9   : > { %v7169_v44 = vsub.f32 %v6988_v14, %v3692_v5  ;;  %v3828_v42 = vsel %vm2619_vm5, %v3758_v45, 0.0  ;;  %v3819_v6 = vsel %vm2619_vm5, %v3755_v13, 0.0 }
 0x5ea   : > { %v7174_v7 = vsub.f32 %v6995_v0, %v3697_v53  ;;  %3829 = vadd.xlane.f32.xlu1 %v3828_v42  ;;  %3820 = vadd.xlane.f32.xlu0 %v3819_v6 }
 0x5eb   : > { %v3649_v15 = vpop.xlane.xlu1 %3648  ;;  %v3640_v26 = vpop.xlane.xlu0 %3639  ;;  %v3756_v49 = vmul.f32 %v7169_v44, %v7169_v44 }
 0x5ec   : > { %v3698_v21 = vmul.f32 0.03125, %v3649_v15  ;;  %v3695_v22 = vmul.f32 0.03125, %v3640_v26  ;;  %v3761_v14 = vmul.f32 %v7174_v7, %v7174_v7 }
 0x5ed   : > { %v3822_v29 = vsel %vm2619_vm5, %v3756_v49, 0.0 }
 0x5ee   : > { %v7182_v40 = vsub.f32 %v7005_v55, %v3698_v21  ;;  %v7185_v0 = vsub.f32 %v7000_v23, %v3695_v22  ;;  %3823 = vadd.xlane.f32.xlu1 %v3822_v29  ;;  %v3837_v32 = vsel %vm2619_vm5, %v3761_v14, 0.0 }
 0x5ef   : > { %v3643_v27 = vpop.xlane.xlu1 %3642  ;;  %3838 = vadd.xlane.f32.xlu0 %v3837_v32 }
 0x5f0   : > { %v3696_v56 = vmul.f32 0.03125, %v3643_v27  ;;  %v3658_v33 = vpop.xlane.xlu0 %3657  ;;  %v3762_v62 = vmul.f32 %v7182_v40, %v7182_v40  ;;  %v3759_v20 = vmul.f32 %v7185_v0, %v7185_v0 }
 0x5f1   : > { %v3701_v54 = vmul.f32 0.03125, %v3658_v33 }
 0x5f2   : > { %v7193_v55 = vsub.f32 %v7008_v1, %v3696_v56  ;;  %v3840_v23 = vsel %vm2619_vm5, %v3762_v62, 0.0  ;;  %v3831_v63 = vsel %vm2619_vm5, %v3759_v20, 0.0 }
 0x5f3   : > { %v7198_v31 = vsub.f32 %v7015_v30, %v3701_v54  ;;  %3841 = vadd.xlane.f32.xlu1 %v3840_v23  ;;  %3832 = vadd.xlane.f32.xlu0 %v3831_v63 }
 0x5f4   : > { %v3661_v8 = vpop.xlane.xlu1 %3660  ;;  %v3652_v9 = vpop.xlane.xlu0 %3651  ;;  %v3760_v43 = vmul.f32 %v7193_v55, %v7193_v55 }
 0x5f5   : > { %v3702_v39 = vmul.f32 0.03125, %v3661_v8  ;;  %v3699_v2 = vmul.f32 0.03125, %v3652_v9  ;;  %v3765_v1 = vmul.f32 %v7198_v31, %v7198_v31 }
 0x5f6   : > { %v3834_v47 = vsel %vm2619_vm5, %v3760_v43, 0.0 }
 0x5f7   : > { %v7206_v59 = vsub.f32 %v7025_v34, %v3702_v39  ;;  %v7209_v30 = vsub.f32 %v7020_v24, %v3699_v2  ;;  %3835 = vadd.xlane.f32.xlu1 %v3834_v47  ;;  %v3849_v5 = vsel %vm2619_vm5, %v3765_v1, 0.0 }
 0x5f8   : > { %v3655_v58 = vpop.xlane.xlu1 %3654  ;;  %3850 = vadd.xlane.f32.xlu0 %v3849_v5 }
 0x5f9   : > { %v3700_v45 = vmul.f32 0.03125, %v3655_v58  ;;  %v3766_v13 = vmul.f32 %v7206_v59, %v7206_v59  ;;  %v3763_v53 = vmul.f32 %v7209_v30, %v7209_v30 }
 0x5fa   : > { %v3664_v42 = vpop.xlane.xlu0 %3663 }
 0x5fb   : > { %v7217_v6 = vsub.f32 %v7028_v12, %v3700_v45  ;;  %v3703_v34 = vmul.f32 0.03125, %v3664_v42  ;;  %v3852_v24 = vsel %vm2619_vm5, %v3766_v13, 0.0  ;;  %v3843_v15 = vsel %vm2619_vm5, %v3763_v53, 0.0 }
 0x5fc   : > { %3853 = vadd.xlane.f32.xlu1 %v3852_v24  ;;  %3844 = vadd.xlane.f32.xlu0 %v3843_v15  ;;  %v7251_v24 = vld [vmem:[%s7512_s11] ss:$0 sm:$0xff] }
 0x5fd   : > { %v7222_v26 = vsub.f32 %v7035_v51, %v3703_v34  ;;  %v3764_v49 = vmul.f32 %v7217_v6, %v7217_v6 }
 0x5fe   : > { %v3667_v21 = vpop.xlane.xlu1 %3666  ;;  %v3670_v22 = vpop.xlane.xlu0 %3669 }
 0x5ff   : > { %v3704_v14 = vmul.f32 0.03125, %v3667_v21  ;;  %v3705_v29 = vmul.f32 0.03125, %v3670_v22  ;;  %v3846_v12 = vsel %vm2619_vm5, %v3764_v49, 0.0  ;;  %v3767_v32 = vmul.f32 %v7222_v26, %v7222_v26  ;;  %v7257_v21 = vld [vmem:[%s7513_s23] ss:$0 sm:$0xff] }
 0x600   : > { %3847 = vadd.xlane.f32.xlu1 %v3846_v12 }
 0x601   : > { %v7230_v27 = vsub.f32 %v7045_v48, %v3704_v14  ;;  %v7233_v56 = vsub.f32 %v7040_v37, %v3705_v29  ;;  %v3855_v51 = vsel %vm2619_vm5, %v3767_v32, 0.0 }
 0x602   : > { %v3673_v33 = vpop.xlane.xlu1 %3672  ;;  %3856 = vadd.xlane.f32.xlu0 %v3855_v51 }
 0x603   : > { %v3706_v62 = vmul.f32 0.03125, %v3673_v33  ;;  %v3768_v20 = vmul.f32 %v7230_v27, %v7230_v27  ;;  %v3769_v54 = vmul.f32 %v7233_v56, %v7233_v56 }
 0x605   : > { %v7241_v23 = vsub.f32 %v7048_v35, %v3706_v62  ;;  %v3858_v48 = vsel %vm2619_vm5, %v3768_v20, 0.0  ;;  %v3861_v63 = vsel %vm2619_vm5, %v3769_v54, 0.0 }
 0x606   : > { %3859 = vadd.xlane.f32.xlu1 %v3858_v48  ;;  %3862 = vadd.xlane.f32.xlu0 %v3861_v63 }
 0x607   : > { %v3770_v37 = vmul.f32 %v7241_v23, %v7241_v23 }
 0x609   : > { %v3864_v8 = vsel %vm2619_vm5, %v3770_v37, 0.0  ;;  %v5320_v37 = vld [vmem:[%s5617_s28 + $0x10] sm:$0xff] }
 0x60a   : > { %3865 = vadd.xlane.f32.xlu1 %v3864_v8 }
 0x636   : > { %v3779_v9 = vpop.xlane.xlu0 %3778 }
 0x637   : > { %v3869_v43 = vmul.f32 0.03125, %v3779_v9 }
 0x639   : > { %v3901_v39 = vadd.f32 1e-05, %v3869_v43 }
 0x63a   : > { %v3782_v2 = vpop.xlane.xlu1 %3781  ;;  %v3773_v1 = vpop.xlane.xlu0 %3772 }
 0x63b   : > { %5256 = vrsqrt.f32 %v3901_v39  ;;  %v3870_v35 = vmul.f32 0.03125, %v3782_v2  ;;  %v3867_v47 = vmul.f32 0.03125, %v3773_v1 }
 0x63d   : > { %v3902_v5 = vadd.f32 1e-05, %v3870_v35  ;;  %v3899_v58 = vadd.f32 1e-05, %v3867_v47 }
 0x63e   : > { %v3776_v45 = vpop.xlane.xlu1 %3775 }
 0x63f   : > { %5258 = vrsqrt.f32 %v3902_v5  ;;  %v3868_v13 = vmul.f32 0.03125, %v3776_v45  ;;  %v5321_v5 = vld [vmem:[%s5617_s28 + $0x18] sm:$0xff] }
 0x640   : > { %5260 = vrsqrt.f32 %v3899_v58 }
 0x641   : > { %v3900_v53 = vadd.f32 1e-05, %v3868_v13  ;;  %v5322_v13 = vld [vmem:[%s5617_s28] sm:$0xff] }
 0x643   : > { %5262 = vrsqrt.f32 %v3900_v53 }
 0x647   : > { %v3791_v42 = vpop.xlane.xlu0 %3790 }
 0x648   : > { %v5257_v34 = vpop.eup %5256  ;;  %v3873_v15 = vmul.f32 0.03125, %v3791_v42 }
 0x649   : > { %v3965_v49 = vmul.f32 %v5257_v34, %v7057_v17  ;;  %v5323_v34 = vld [vmem:[%s5617_s28 + $0x8] sm:$0xff] }
 0x64a   : > { %v3905_v22 = vadd.f32 1e-05, %v3873_v15 }
 0x64b   : > { %v4004_v14 = vmul.f32 %v7251_v24, %v3965_v49  ;;  %v3794_v29 = vpop.xlane.xlu1 %3793  ;;  %v3785_v12 = vpop.xlane.xlu0 %3784 }
 0x64c   : > { %v5259_v32 = vpop.eup %5258  ;;  %5264 = vrsqrt.f32 %v3905_v22  ;;  %v3874_v51 = vmul.f32 0.03125, %v3794_v29  ;;  %v3871_v33 = vmul.f32 0.03125, %v3785_v12 }
 0x64d   : > { %v5261_v62 = vpop.eup %5260  ;;  %v4043_v20 = vadd.f32 %v7257_v21, %v4004_v14  ;;  %v3966_v17 = vmul.f32 %v5259_v32, %v7065_v50 }
 0x64e   : > { %v3963_v54 = vmul.f32 %v5261_v62, %v7060_v46  ;;  %v3906_v48 = vadd.f32 1e-05, %v3874_v51  ;;  %v3903_v63 = vadd.f32 1e-05, %v3871_v33 }
 0x64f   : > { %v4075_v8 = vadd.f32 %v5320_v37, %v4043_v20  ;;  %v4005_v9 = vmul.f32 %v7251_v24, %v3966_v17  ;;  %v3788_v43 = vpop.xlane.xlu1 %3787 }
 0x650   : > { %v5263_v39 = vpop.eup %5262  ;;  %v4002_v2 = vmul.f32 %v7251_v24, %v3963_v54  ;;  %5266 = vrsqrt.f32 %v3906_v48  ;;  %v3872_v1 = vmul.f32 0.03125, %v3788_v43 }
 0x651   : > { %4107 = vst.msk [vmem:[%s5622_s0 + $0x10] sm:$0xff] %vm2619_vm5, %v4075_v8  ;;  %v4044_v46 = vadd.f32 %v7257_v21, %v4005_v9  ;;  %v3964_v50 = vmul.f32 %v5263_v39, %v7073_v10  ;;  %5268 = vrsqrt.f32 %v3903_v63  ;;  %v5324_v8 = vld [vmem:[%s5617_s28 + $0x30] sm:$0xff] }
 0x652   : > { %v4041_v35 = vadd.f32 %v7257_v21, %v4002_v2  ;;  %v3904_v47 = vadd.f32 1e-05, %v3872_v1 }
 0x653   : > { %v4076_v58 = vadd.f32 %v5321_v5, %v4044_v46  ;;  %v4003_v45 = vmul.f32 %v7251_v24, %v3964_v50 }
 0x654   : > { %v4073_v53 = vadd.f32 %v5322_v13, %v4041_v35  ;;  %5270 = vrsqrt.f32 %v3904_v47  ;;  %v5325_v47 = vld [vmem:[%s5617_s28 + $0x38] sm:$0xff] }
 0x655   : > { %4108 = vst.msk [vmem:[%s5622_s0 + $0x18] sm:$0xff] %vm2619_vm5, %v4076_v58  ;;  %v4042_v42 = vadd.f32 %v7257_v21, %v4003_v45  ;;  %v5326_v45 = vld [vmem:[%s5617_s28 + $0x20] sm:$0xff] }
 0x656   : > { %4105 = vst.msk [vmem:[%s5622_s0] sm:$0xff] %vm2619_vm5, %v4073_v53 }
 0x657   : > { %v4074_v10 = vadd.f32 %v5323_v34, %v4042_v42 }
 0x658   : > { %v3803_v15 = vpop.xlane.xlu0 %3802 }
 0x659   : > { %v5265_v49 = vpop.eup %5264  ;;  %4106 = vst.msk [vmem:[%s5622_s0 + $0x8] sm:$0xff] %vm2619_vm5, %v4074_v10  ;;  %v3877_v22 = vmul.f32 0.03125, %v3803_v15 }
 0x65a   : > { %v3969_v14 = vmul.f32 %v5265_v49, %v7081_v41 }
 0x65b   : > { %v3909_v29 = vadd.f32 1e-05, %v3877_v22 }
 0x65c   : > { %v4008_v12 = vmul.f32 %v7251_v24, %v3969_v14  ;;  %v3806_v32 = vpop.xlane.xlu1 %3805  ;;  %v3797_v51 = vpop.xlane.xlu0 %3796 }
 0x65d   : > { %v5267_v33 = vpop.eup %5266  ;;  %5272 = vrsqrt.f32 %v3909_v29  ;;  %v3878_v62 = vmul.f32 0.03125, %v3806_v32  ;;  %v3875_v20 = vmul.f32 0.03125, %v3797_v51 }
 0x65e   : > { %v5269_v17 = vpop.eup %5268  ;;  %v4047_v54 = vadd.f32 %v7257_v21, %v4008_v12  ;;  %v3970_v48 = vmul.f32 %v5267_v33, %v7086_v16 }
 0x65f   : > { %v3967_v63 = vmul.f32 %v5269_v17, %v7089_v18  ;;  %v3910_v37 = vadd.f32 1e-05, %v3878_v62  ;;  %v3907_v41 = vadd.f32 1e-05, %v3875_v20 }
 0x660   : > { %v4079_v9 = vadd.f32 %v5324_v8, %v4047_v54  ;;  %v4009_v43 = vmul.f32 %v7251_v24, %v3970_v48  ;;  %v3800_v39 = vpop.xlane.xlu1 %3799 }
 0x661   : > { %v5271_v2 = vpop.eup %5270  ;;  %v4006_v1 = vmul.f32 %v7251_v24, %v3967_v63  ;;  %5274 = vrsqrt.f32 %v3910_v37  ;;  %v3876_v46 = vmul.f32 0.03125, %v3800_v39 }
 0x662   : > { %4111 = vst.msk [vmem:[%s5622_s0 + $0x30] sm:$0xff] %vm2619_vm5, %v4079_v9  ;;  %v4048_v16 = vadd.f32 %v7257_v21, %v4009_v43  ;;  %v3968_v18 = vmul.f32 %v5271_v2, %v7097_v61  ;;  %5276 = vrsqrt.f32 %v3907_v41  ;;  %v5327_v61 = vld [vmem:[%s5617_s28 + $0x28] sm:$0xff]  ;;  %v5328_v9 = vld [vmem:[%s5617_s28 + $0x50] sm:$0xff] }
 0x663   : > { %v4045_v50 = vadd.f32 %v7257_v21, %v4006_v1  ;;  %v3908_v35 = vadd.f32 1e-05, %v3876_v46 }
 0x664   : > { %v4080_v5 = vadd.f32 %v5325_v47, %v4048_v16  ;;  %v4007_v58 = vmul.f32 %v7251_v24, %v3968_v18 }
 0x665   : > { %v4077_v13 = vadd.f32 %v5326_v45, %v4045_v50  ;;  %5278 = vrsqrt.f32 %v3908_v35 }
 0x666   : > { %4112 = vst.msk [vmem:[%s5622_s0 + $0x38] sm:$0xff] %vm2619_vm5, %v4080_v5  ;;  %v4046_v53 = vadd.f32 %v7257_v21, %v4007_v58  ;;  %v5329_v58 = vld [vmem:[%s5617_s28 + $0x58] sm:$0xff] }
 0x667   : > { %4109 = vst.msk [vmem:[%s5622_s0 + $0x20] sm:$0xff] %vm2619_vm5, %v4077_v13  ;;  %v3815_v42 = vpop.xlane.xlu0 %3814 }
 0x668   : > { %v4078_v34 = vadd.f32 %v5327_v61, %v4046_v53  ;;  %v3881_v10 = vmul.f32 0.03125, %v3815_v42  ;;  %v5330_v53 = vld [vmem:[%s5617_s28 + $0x40] sm:$0xff] }
 0x66a   : > { %v5273_v15 = vpop.eup %5272  ;;  %4110 = vst.msk [vmem:[%s5622_s0 + $0x28] sm:$0xff] %vm2619_vm5, %v4078_v34  ;;  %v3913_v49 = vadd.f32 1e-05, %v3881_v10 }
 0x66b   : > { %v3973_v22 = vmul.f32 %v5273_v15, %v7105_v4  ;;  %v3818_v14 = vpop.xlane.xlu1 %3817  ;;  %v3809_v29 = vpop.xlane.xlu0 %3808 }
 0x66c   : > { %5280 = vrsqrt.f32 %v3913_v49  ;;  %v3882_v12 = vmul.f32 0.03125, %v3818_v14  ;;  %v3879_v32 = vmul.f32 0.03125, %v3809_v29  ;;  %v5331_v14 = vld [vmem:[%s5617_s28 + $0x48] sm:$0xff] }
 0x66d   : > { %v4012_v51 = vmul.f32 %v7251_v24, %v3973_v22 }
 0x66e   : > { %v5275_v33 = vpop.eup %5274  ;;  %v3914_v62 = vadd.f32 1e-05, %v3882_v12  ;;  %v3911_v20 = vadd.f32 1e-05, %v3879_v32 }
 0x66f   : > { %v5277_v17 = vpop.eup %5276  ;;  %v4051_v54 = vadd.f32 %v7257_v21, %v4012_v51  ;;  %v3974_v48 = vmul.f32 %v5275_v33, %v7110_v25  ;;  %v3812_v63 = vpop.xlane.xlu1 %3811 }
 0x670   : > { %v3827_v37 = vpop.xlane.xlu0 %3826  ;;  %v3971_v4 = vmul.f32 %v5277_v17, %v7113_v52  ;;  %5282 = vrsqrt.f32 %v3914_v62  ;;  %v3880_v41 = vmul.f32 0.03125, %v3812_v63 }
 0x671   : > { %v3885_v8 = vmul.f32 0.03125, %v3827_v37  ;;  %v4083_v43 = vadd.f32 %v5328_v9, %v4051_v54  ;;  %v4013_v39 = vmul.f32 %v7251_v24, %v3974_v48  ;;  %5284 = vrsqrt.f32 %v3911_v20 }
 0x672   : > { %v5279_v2 = vpop.eup %5278  ;;  %v4010_v1 = vmul.f32 %v7251_v24, %v3971_v4  ;;  %v3912_v46 = vadd.f32 1e-05, %v3880_v41 }
 0x673   : > { %v3917_v16 = vadd.f32 1e-05, %v3885_v8  ;;  %4115 = vst.msk [vmem:[%s5622_s0 + $0x50] sm:$0xff] %vm2619_vm5, %v4083_v43  ;;  %v4052_v25 = vadd.f32 %v7257_v21, %v4013_v39  ;;  %v3972_v52 = vmul.f32 %v5279_v2, %v7121_v36  ;;  %v3830_v18 = vpop.xlane.xlu1 %3829  ;;  %v5332_v43 = vld [vmem:[%s5617_s28 + $0x70] sm:$0xff] }
 0x674   : > { %v3821_v50 = vpop.xlane.xlu0 %3820  ;;  %v4049_v35 = vadd.f32 %v7257_v21, %v4010_v1  ;;  %5286 = vrsqrt.f32 %v3912_v46  ;;  %v3886_v47 = vmul.f32 0.03125, %v3830_v18 }
 0x675   : > { %v3883_v5 = vmul.f32 0.03125, %v3821_v50  ;;  %v4084_v45 = vadd.f32 %v5329_v58, %v4052_v25  ;;  %v4011_v13 = vmul.f32 %v7251_v24, %v3972_v52  ;;  %5288 = vrsqrt.f32 %v3917_v16  ;;  %v5333_v58 = vld [vmem:[%s5617_s28 + $0x78] sm:$0xff] }
 0x676   : > { %v4081_v42 = vadd.f32 %v5330_v53, %v4049_v35  ;;  %v3918_v61 = vadd.f32 1e-05, %v3886_v47 }
 0x677   : > { %v3915_v34 = vadd.f32 1e-05, %v3883_v5  ;;  %4116 = vst.msk [vmem:[%s5622_s0 + $0x58] sm:$0xff] %vm2619_vm5, %v4084_v45  ;;  %v4050_v36 = vadd.f32 %v7257_v21, %v4011_v13  ;;  %v3824_v10 = vpop.xlane.xlu1 %3823 }
 0x678   : > { %4113 = vst.msk [vmem:[%s5622_s0 + $0x40] sm:$0xff] %vm2619_vm5, %v4081_v42  ;;  %5290 = vrsqrt.f32 %v3918_v61  ;;  %v3884_v15 = vmul.f32 0.03125, %v3824_v10  ;;  %v3839_v49 = vpop.xlane.xlu0 %3838  ;;  %v5334_v61 = vld [vmem:[%s5617_s28 + $0x60] sm:$0xff] }
 0x679   : > { %v5281_v22 = vpop.eup %5280  ;;  %v4082_v29 = vadd.f32 %v5331_v14, %v4050_v36  ;;  %5292 = vrsqrt.f32 %v3915_v34  ;;  %v3889_v12 = vmul.f32 0.03125, %v3839_v49 }
 0x67a   : > { %v3977_v32 = vmul.f32 %v5281_v22, %v7129_v19  ;;  %v3916_v51 = vadd.f32 1e-05, %v3884_v15 }
 0x67b   : > { %4114 = vst.msk [vmem:[%s5622_s0 + $0x48] sm:$0xff] %vm2619_vm5, %v4082_v29  ;;  %v3921_v33 = vadd.f32 1e-05, %v3889_v12 }
 0x67c   : > { %v4016_v62 = vmul.f32 %v7251_v24, %v3977_v32  ;;  %5294 = vrsqrt.f32 %v3916_v51  ;;  %v3842_v20 = vpop.xlane.xlu1 %3841  ;;  %v3833_v17 = vpop.xlane.xlu0 %3832  ;;  %v5335_v32 = vld [vmem:[%s5617_s28 + $0x68] sm:$0xff] }
 0x67d   : > { %v5283_v54 = vpop.eup %5282  ;;  %5296 = vrsqrt.f32 %v3921_v33  ;;  %v3890_v48 = vmul.f32 0.03125, %v3842_v20  ;;  %v3887_v63 = vmul.f32 0.03125, %v3833_v17  ;;  %v5336_v17 = vld [vmem:[%s5617_s28 + $0x90] sm:$0xff] }
 0x67e   : > { %v5285_v37 = vpop.eup %5284  ;;  %v4055_v4 = vadd.f32 %v7257_v21, %v4016_v62  ;;  %v3978_v19 = vmul.f32 %v5283_v54, %v7134_v3 }
 0x67f   : > { %v3975_v41 = vmul.f32 %v5285_v37, %v7137_v38  ;;  %v3922_v8 = vadd.f32 1e-05, %v3890_v48  ;;  %v3919_v9 = vadd.f32 1e-05, %v3887_v63 }
 0x680   : > { %v4087_v39 = vadd.f32 %v5332_v43, %v4055_v4  ;;  %v4017_v2 = vmul.f32 %v7251_v24, %v3978_v19  ;;  %v3836_v1 = vpop.xlane.xlu1 %3835  ;;  %v5337_v43 = vld [vmem:[%s5617_s28 + $0x98] sm:$0xff] }
 0x681   : > { %v5287_v46 = vpop.eup %5286  ;;  %v4014_v16 = vmul.f32 %v7251_v24, %v3975_v41  ;;  %5298 = vrsqrt.f32 %v3922_v8  ;;  %v3888_v25 = vmul.f32 0.03125, %v3836_v1  ;;  %v3851_v52 = vpop.xlane.xlu0 %3850 }
 0x682   : > { %v5289_v18 = vpop.eup %5288  ;;  %4119 = vst.msk [vmem:[%s5622_s0 + $0x70] sm:$0xff] %vm2619_vm5, %v4087_v39  ;;  %v4056_v3 = vadd.f32 %v7257_v21, %v4017_v2  ;;  %v3976_v38 = vmul.f32 %v5287_v46, %v7145_v28  ;;  %5300 = vrsqrt.f32 %v3919_v9  ;;  %v3893_v50 = vmul.f32 0.03125, %v3851_v52 }
 0x683   : > { %v4053_v35 = vadd.f32 %v7257_v21, %v4014_v16  ;;  %v3981_v47 = vmul.f32 %v5289_v18, %v7148_v57  ;;  %v3920_v5 = vadd.f32 1e-05, %v3888_v25 }
 0x684   : > { %v4088_v45 = vadd.f32 %v5333_v58, %v4056_v3  ;;  %v4015_v13 = vmul.f32 %v7251_v24, %v3976_v38  ;;  %v3925_v53 = vadd.f32 1e-05, %v3893_v50 }
 0x685   : > { %v5291_v42 = vpop.eup %5290  ;;  %v4085_v34 = vadd.f32 %v5334_v61, %v4053_v35  ;;  %v4020_v28 = vmul.f32 %v7251_v24, %v3981_v47  ;;  %5302 = vrsqrt.f32 %v3920_v5  ;;  %v3854_v36 = vpop.xlane.xlu1 %3853  ;;  %v5339_v5 = vld [vmem:[%s5617_s28 + $0x88] sm:$0xff] }
 0x686   : > { %v3845_v10 = vpop.xlane.xlu0 %3844  ;;  %v5293_v15 = vpop.eup %5292  ;;  %4120 = vst.msk [vmem:[%s5622_s0 + $0x78] sm:$0xff] %vm2619_vm5, %v4088_v45  ;;  %v4054_v57 = vadd.f32 %v7257_v21, %v4015_v13  ;;  %v3982_v49 = vmul.f32 %v5291_v42, %v7157_v60  ;;  %5304 = vrsqrt.f32 %v3925_v53  ;;  %v3894_v22 = vmul.f32 0.03125, %v3854_v36  ;;  %v5340_v53 = vld [vmem:[%s5617_s28 + $0xb0] sm:$0xff] }
 0x687   : > { %4117 = vst.msk [vmem:[%s5622_s0 + $0x60] sm:$0xff] %vm2619_vm5, %v4085_v34  ;;  %v4059_v14 = vadd.f32 %v7257_v21, %v4020_v28  ;;  %v3979_v29 = vmul.f32 %v5293_v15, %v7160_v11  ;;  %v3891_v12 = vmul.f32 0.03125, %v3845_v10 }
 0x688   : > { %v4086_v51 = vadd.f32 %v5335_v32, %v4054_v57  ;;  %v4021_v33 = vmul.f32 %v7251_v24, %v3982_v49  ;;  %v3926_v62 = vadd.f32 1e-05, %v3894_v22 }
 0x689   : > { %v5295_v20 = vpop.eup %5294  ;;  %v4091_v60 = vadd.f32 %v5336_v17, %v4059_v14  ;;  %v4018_v54 = vmul.f32 %v7251_v24, %v3979_v29  ;;  %v3923_v48 = vadd.f32 1e-05, %v3891_v12  ;;  %v3848_v63 = vpop.xlane.xlu1 %3847  ;;  %v5341_v12 = vld [vmem:[%s5617_s28 + $0xb8] sm:$0xff] }
 0x68a   : > { %v5297_v37 = vpop.eup %5296  ;;  %4118 = vst.msk [vmem:[%s5622_s0 + $0x68] sm:$0xff] %vm2619_vm5, %v4086_v51  ;;  %v4060_v11 = vadd.f32 %v7257_v21, %v4021_v33  ;;  %v3980_v4 = vmul.f32 %v5295_v20, %v7169_v44  ;;  %5306 = vrsqrt.f32 %v3926_v62  ;;  %v3892_v19 = vmul.f32 0.03125, %v3848_v63  ;;  %v5338_v44 = vld [vmem:[%s5617_s28 + $0x80] sm:$0xff]  ;;  %v5343_v63 = vld [vmem:[%s5617_s28 + $0xa8] sm:$0xff] }
 0x68b   : > { %4123 = vst.msk [vmem:[%s5622_s0 + $0x90] sm:$0xff] %vm2619_vm5, %v4091_v60  ;;  %v4057_v41 = vadd.f32 %v7257_v21, %v4018_v54  ;;  %v3985_v8 = vmul.f32 %v5297_v37, %v7174_v7  ;;  %5308 = vrsqrt.f32 %v3923_v48  ;;  %v3857_v9 = vpop.xlane.xlu0 %3856  ;;  %v5342_v33 = vld [vmem:[%s5617_s28 + $0xa0] sm:$0xff] }
 0x68c   : > { %v4092_v39 = vadd.f32 %v5337_v43, %v4060_v11  ;;  %v4019_v2 = vmul.f32 %v7251_v24, %v3980_v4  ;;  %v3924_v1 = vadd.f32 1e-05, %v3892_v19  ;;  %v3895_v46 = vmul.f32 0.03125, %v3857_v9  ;;  %v5344_v4 = vld [vmem:[%s5617_s28 + $0xd0] sm:$0xff] }
 0x68d   : > { %v4089_v16 = vadd.f32 %v5338_v44, %v4057_v41  ;;  %v4024_v25 = vmul.f32 %v7251_v24, %v3985_v8 }
 0x68e   : > { %v5299_v52 = vpop.eup %5298  ;;  %4124 = vst.msk [vmem:[%s5622_s0 + $0x98] sm:$0xff] %vm2619_vm5, %v4092_v39  ;;  %v4058_v7 = vadd.f32 %v7257_v21, %v4019_v2  ;;  %5310 = vrsqrt.f32 %v3924_v1  ;;  %v3927_v18 = vadd.f32 1e-05, %v3895_v46  ;;  %v5345_v2 = vld [vmem:[%s5617_s28 + $0xd8] sm:$0xff] }
 0x68f   : > { %v5301_v3 = vpop.eup %5300  ;;  %4121 = vst.msk [vmem:[%s5622_s0 + $0x80] sm:$0xff] %vm2619_vm5, %v4089_v16  ;;  %v4063_v38 = vadd.f32 %v7257_v21, %v4024_v25  ;;  %v3986_v50 = vmul.f32 %v5299_v52, %v7182_v40  ;;  %v3860_v35 = vpop.xlane.xlu1 %3859  ;;  %v5346_v16 = vld [vmem:[%s5617_s28 + $0xc0] sm:$0xff] }
 0x690   : > { %v3863_v47 = vpop.xlane.xlu0 %3862  ;;  %v4090_v58 = vadd.f32 %v5339_v5, %v4058_v7  ;;  %v3983_v45 = vmul.f32 %v5301_v3, %v7185_v0  ;;  %5312 = vrsqrt.f32 %v3927_v18  ;;  %v3896_v13 = vmul.f32 0.03125, %v3860_v35  ;;  %v5347_v3 = vld [vmem:[%s5617_s28 + $0xc8] sm:$0xff] }
 0x691   : > { %v4095_v42 = vadd.f32 %v5340_v53, %v4063_v38  ;;  %v4025_v61 = vmul.f32 %v7251_v24, %v3986_v50  ;;  %v3897_v34 = vmul.f32 0.03125, %v3863_v47  ;;  %v5348_v47 = vld [vmem:[%s5617_s28 + $0xe0] sm:$0xff] }
 0x692   : > { %v5303_v28 = vpop.eup %5302  ;;  %4122 = vst.msk [vmem:[%s5622_s0 + $0x88] sm:$0xff] %vm2619_vm5, %v4090_v58  ;;  %v4022_v40 = vmul.f32 %v7251_v24, %v3983_v45  ;;  %v3928_v36 = vadd.f32 1e-05, %v3896_v13 }
 0x693   : > { %v5305_v10 = vpop.eup %5304  ;;  %4127 = vst.msk [vmem:[%s5622_s0 + $0xb0] sm:$0xff] %vm2619_vm5, %v4095_v42  ;;  %v4064_v0 = vadd.f32 %v7257_v21, %v4025_v61  ;;  %v3984_v15 = vmul.f32 %v5303_v28, %v7193_v55  ;;  %v3929_v57 = vadd.f32 1e-05, %v3897_v34  ;;  %v3866_v49 = vpop.xlane.xlu1 %3865  ;;  %v5349_v42 = vld [vmem:[%s5617_s28 + $0xe8] sm:$0xff]  ;;  %v5350_v28 = vld [vmem:[%s5617_s28 + $0xf0] sm:$0xff] }
 0x694   : > { %v4061_v22 = vadd.f32 %v7257_v21, %v4022_v40  ;;  %v3989_v14 = vmul.f32 %v5305_v10, %v7198_v31  ;;  %5314 = vrsqrt.f32 %v3928_v36  ;;  %v3898_v29 = vmul.f32 0.03125, %v3866_v49  ;;  %v5351_v10 = vld [vmem:[%s5617_s28 + $0xf8] sm:$0xff] }
 0x695   : > { %v4096_v32 = vadd.f32 %v5341_v12, %v4064_v0  ;;  %v4023_v51 = vmul.f32 %v7251_v24, %v3984_v15  ;;  %5316 = vrsqrt.f32 %v3929_v57 }
 0x696   : > { %v4093_v62 = vadd.f32 %v5342_v33, %v4061_v22  ;;  %v4028_v55 = vmul.f32 %v7251_v24, %v3989_v14  ;;  %v3930_v20 = vadd.f32 1e-05, %v3898_v29 }
 0x697   : > { %v5307_v17 = vpop.eup %5306  ;;  %4128 = vst.msk [vmem:[%s5622_s0 + $0xb8] sm:$0xff] %vm2619_vm5, %v4096_v32  ;;  %v4062_v31 = vadd.f32 %v7257_v21, %v4023_v51 }
 0x698   : > { %v5309_v60 = vpop.eup %5308  ;;  %4125 = vst.msk [vmem:[%s5622_s0 + $0xa0] sm:$0xff] %vm2619_vm5, %v4093_v62  ;;  %v4067_v54 = vadd.f32 %v7257_v21, %v4028_v55  ;;  %v3990_v48 = vmul.f32 %v5307_v17, %v7206_v59  ;;  %5318 = vrsqrt.f32 %v3930_v20 }
 0x699   : > { %v4094_v37 = vadd.f32 %v5343_v63, %v4062_v31  ;;  %v3987_v11 = vmul.f32 %v5309_v60, %v7209_v30 }
 0x69a   : > { %v4099_v19 = vadd.f32 %v5344_v4, %v4067_v54  ;;  %v4029_v41 = vmul.f32 %v7251_v24, %v3990_v48 }
 0x69b   : > { %v5311_v8 = vpop.eup %5310  ;;  %4126 = vst.msk [vmem:[%s5622_s0 + $0xa8] sm:$0xff] %vm2619_vm5, %v4094_v37  ;;  %v4026_v9 = vmul.f32 %v7251_v24, %v3987_v11 }
 0x69c   : > { %4131 = vst.msk [vmem:[%s5622_s0 + $0xd0] sm:$0xff] %vm2619_vm5, %v4099_v19  ;;  %v4068_v59 = vadd.f32 %v7257_v21, %v4029_v41  ;;  %v3988_v43 = vmul.f32 %v5311_v8, %v7217_v6 }
 0x69d   : > { %v5313_v30 = vpop.eup %5312  ;;  %v4065_v39 = vadd.f32 %v7257_v21, %v4026_v9 }
 0x69e   : > { %v4100_v1 = vadd.f32 %v5345_v2, %v4068_v59  ;;  %v4027_v46 = vmul.f32 %v7251_v24, %v3988_v43  ;;  %v3991_v44 = vmul.f32 %v5313_v30, %v7222_v26 }
 0x69f   : > { %v4097_v25 = vadd.f32 %v5346_v16, %v4065_v39 }
 0x6a0   : > { %4132 = vst.msk [vmem:[%s5622_s0 + $0xd8] sm:$0xff] %vm2619_vm5, %v4100_v1  ;;  %v4066_v52 = vadd.f32 %v7257_v21, %v4027_v46  ;;  %v4030_v6 = vmul.f32 %v7251_v24, %v3991_v44 }
 0x6a1   : > { %v5315_v7 = vpop.eup %5314  ;;  %4129 = vst.msk [vmem:[%s5622_s0 + $0xc0] sm:$0xff] %vm2619_vm5, %v4097_v25 }
 0x6a2   : > { %v5317_v18 = vpop.eup %5316  ;;  %v4098_v38 = vadd.f32 %v5347_v3, %v4066_v52  ;;  %v4069_v50 = vadd.f32 %v7257_v21, %v4030_v6  ;;  %v3992_v26 = vmul.f32 %v5315_v7, %v7230_v27 }
 0x6a3   : > { %v3993_v35 = vmul.f32 %v5317_v18, %v7233_v56 }
 0x6a4   : > { %4130 = vst.msk [vmem:[%s5622_s0 + $0xc8] sm:$0xff] %vm2619_vm5, %v4098_v38  ;;  %v4101_v5 = vadd.f32 %v5348_v47, %v4069_v50  ;;  %v4031_v58 = vmul.f32 %v7251_v24, %v3992_v26 }
 0x6a5   : > { %v5319_v45 = vpop.eup %5318  ;;  %v4032_v13 = vmul.f32 %v7251_v24, %v3993_v35 }
 0x6a6   : > { %4133 = vst.msk [vmem:[%s5622_s0 + $0xe0] sm:$0xff] %vm2619_vm5, %v4101_v5  ;;  %v4070_v53 = vadd.f32 %v7257_v21, %v4031_v58  ;;  %v3994_v27 = vmul.f32 %v5319_v45, %v7241_v23 }
 0x6a7   : > { %v4071_v56 = vadd.f32 %v7257_v21, %v4032_v13 }
 0x6a8   : > { %v4102_v61 = vadd.f32 %v5349_v42, %v4070_v53  ;;  %v4033_v34 = vmul.f32 %v7251_v24, %v3994_v27 }
 0x6a9   : > { %v4103_v40 = vadd.f32 %v5350_v28, %v4071_v56 }
 0x6aa   : > { %4134 = vst.msk [vmem:[%s5622_s0 + $0xe8] sm:$0xff] %vm2619_vm5, %v4102_v61  ;;  %v4072_v36 = vadd.f32 %v7257_v21, %v4033_v34 }
 0x6ab   : > { %4135 = vst.msk [vmem:[%s5622_s0 + $0xf0] sm:$0xff] %vm2619_vm5, %v4103_v40 }
 0x6ac   : > { %v4104_v0 = vadd.f32 %v5351_v10, %v4072_v36 }
 0x6ae   : > { %4136 = vst.msk [vmem:[%s5622_s0 + $0xf8] sm:$0xff] %vm2619_vm5, %v4104_v0 }
 0x6af PF: > { %s32_s17 = sadd.s32 1, %s5432_s17   ;;  %s7514_s21 = sld [smem:[#allocation9_spill]] }
 0x6b0   : > { %p29_p5 = scmp.ge.s32.totalorder %s32_s17, 12   ;;  %s7515_s20 = sld [smem:[#allocation8_spill]] }
 0x6b1   : > { %s7516_s1 = smov %s5412_s30  ;;  %s7517_s30 = smov %s5577_s9 }
 0x6b2   : > { %s7518_s13 = smov %s5424_s15  ;;  %s7519_s14 = smov %s5428_s16 }
 0x6b3   :  { %31 = sbr.rel (!%p29_p5) target bundleno = 31 (0x1f), region = 136 }
 0x6b5   : > { %s7520_s15 = smov %s7514_s21 }
 0x6b6   : > { %s7521_s16 = smov %s7515_s20 }

</bundles_post_ra>
